<compile_context>
chip_gen: v7x
topology: tpu7x:2x2x1
jax: 0.10.0
libtpu: 0.0.40
codegen_flags: <defaults>
</compile_context>

<pallas_src>
import functools

import jax
import jax.numpy as jnp
from jax.experimental import pallas as pl
from jax.experimental.pallas import tpu as pltpu

_LANE = 128
_INV_SQRT2 = 0.7071067811865476


def _gelu(x):
    # exact (erf) GELU, matching torch.nn.GELU() default (approximate='none').
    return 0.5 * x * (1.0 + jax.lax.erf(x * _INV_SQRT2))


def _round_up(x, m):
    return (x + m - 1) // m * m


def _vmem_limit(bytes_estimate):
    # Explicit scoped-VMEM limit: never below 32 MiB (>= default on all gens),
    # raised with ~2.5x headroom when the estimated working set demands it.
    return int(max(32 * 1024 * 1024, 2.5 * bytes_estimate))


# ----------------------------------------------------------------------------
# AttentionBranch kernel: LayerNorm -> windowed multi-head self-attention.
# One grid step = one (ws, ws) window taken straight from the padded image via
# the BlockSpec index_map (window partition/reverse need no wrapper transposes).
# ----------------------------------------------------------------------------
def attn_window_kernel(x_ref, ln_w_ref, ln_b_ref, wqkv_ref, bqkv_ref,
                       wo_ref, bo_ref, o_ref, *, num_heads, true_c):
    ws0, ws1, cp = x_ref.shape[1], x_ref.shape[2], x_ref.shape[3]
    s_len = ws0 * ws1
    hd_p = cp // num_heads
    hd_true = true_c // num_heads

    x = x_ref[0].astype(jnp.float32).reshape(s_len, cp)

    # LayerNorm over the TRUE channel count (eps=1e-5, PyTorch default).
    # Padded lanes are exactly zero, so the padded-width sums equal the true
    # reductions; only the divisor uses true_c.
    ssum = jnp.sum(x, axis=-1, keepdims=True)
    ssq = jnp.sum(x * x, axis=-1, keepdims=True)
    mu = ssum * (1.0 / true_c)
    var = jnp.maximum(ssq * (1.0 / true_c) - mu * mu, 0.0)
    xn = (x - mu) * jax.lax.rsqrt(var + 1e-5) * ln_w_ref[0] + ln_b_ref[0]

    # Fused QKV projection: one MXU pass, K = Cp, N = 3*Cp (bf16 operands,
    # f32 accumulation).  Columns are pre-permuted (q|k|v) x head-major.
    qkv = jnp.dot(xn.astype(jnp.bfloat16), wqkv_ref[...],
                  preferred_element_type=jnp.float32) + bqkv_ref[0]

    def heads(t):
        # (S, Cp) slab -> (num_heads, S, hd_p), via aligned per-head slices.
        base = t * cp
        return jnp.stack(
            [qkv[:, base + h * hd_p:base + (h + 1) * hd_p]
             for h in range(num_heads)], axis=0).astype(jnp.bfloat16)

    qh, kh, vh = heads(0), heads(1), heads(2)

    # Head-batched score / AV matmuls (batch dim = heads).  torch scales by
    # the TRUE head_dim; padded q/k/v lanes are zero so dot products are exact.
    scale = 1.0 / float(hd_true) ** 0.5
    s = jax.lax.dot_general(qh, kh, (((2,), (2,)), ((0,), (0,))),
                            preferred_element_type=jnp.float32) * scale
    s = s - jnp.max(s, axis=-1, keepdims=True)
    e = jnp.exp(s)
    p = e * pl.reciprocal(jnp.sum(e, axis=-1, keepdims=True), approx=True)
    o = jax.lax.dot_general(p.astype(jnp.bfloat16), vh,
                            (((2,), (1,)), ((0,), (0,))),
                            preferred_element_type=jnp.float32)  # (nh, S, hd_p)

    # Single out-projection with contraction K = Cp (no per-head matmuls).
    oc = jnp.concatenate([o[h] for h in range(num_heads)], axis=-1)  # (S, Cp)
    out = jnp.dot(oc.astype(jnp.bfloat16), wo_ref[...],
                  preferred_element_type=jnp.float32) + bo_ref[0]

    o_ref[0] = out.reshape(ws0, ws1, cp).astype(o_ref.dtype)


def attention_branch(x_img, params, num_heads, window_size, true_c):
    B, H, W, Cp = x_img.shape
    ws = window_size
    pad_h = (-H) % ws
    pad_w = (-W) % ws
    xi = x_img
    if pad_h or pad_w:
        # Like the PyTorch reference, zero-padded spatial tokens attend
        # UNMASKED (nn.MultiheadAttention is called without a mask); padded
        # outputs are cropped afterwards.
        xi = jnp.pad(xi, ((0, 0), (0, pad_h), (0, pad_w), (0, 0)))
    Hp, Wp = H + pad_h, W + pad_w
    nH, nW = Hp // ws, Wp // ws

    ln_w, ln_b, wqkv, bqkv, wo, bo = params
    blk = ws * ws * Cp * 4
    wbytes = (wqkv.size + wo.size) * wqkv.dtype.itemsize
    kern = functools.partial(attn_window_kernel, num_heads=num_heads,
                             true_c=true_c)
    out = pl.pallas_call(
        kern,
        out_shape=jax.ShapeDtypeStruct((B, Hp, Wp, Cp), jnp.float32),
        grid=(B, nH, nW),
        in_specs=[
            # window partition straight from the padded image (no transposes)
            pl.BlockSpec((1, ws, ws, Cp), lambda b, i, j: (b, i, j, 0)),
            pl.BlockSpec((1, Cp), lambda b, i, j: (0, 0)),
            pl.BlockSpec((1, Cp), lambda b, i, j: (0, 0)),
            pl.BlockSpec((Cp, 3 * Cp), lambda b, i, j: (0, 0)),
            pl.BlockSpec((1, 3 * Cp), lambda b, i, j: (0, 0)),
            pl.BlockSpec((Cp, Cp), lambda b, i, j: (0, 0)),
            pl.BlockSpec((1, Cp), lambda b, i, j: (0, 0)),
        ],
        # window reverse via the output index_map
        out_specs=pl.BlockSpec((1, ws, ws, Cp), lambda b, i, j: (b, i, j, 0)),
        compiler_params=pltpu.CompilerParams(
            dimension_semantics=("parallel", "parallel", "parallel"),
            vmem_limit_bytes=_vmem_limit(4 * blk + 2 * wbytes)),
    )(xi, ln_w, ln_b, wqkv, bqkv, wo, bo)

    if pad_h or pad_w:
        out = out[:, :H, :W, :]
    return out


# ----------------------------------------------------------------------------
# Fused kernel: ConvBranch (dw3x3 -> GELU -> 1x1)  +  fusion MLP + residual.
# One grid step = one row strip (with a 1-row halo) of one image.
# ----------------------------------------------------------------------------
def conv_fuse_kernel(xs_ref, glob_ref, dw_w_ref, dw_b_ref, pw_wt_ref, pw_b_ref,
                     lnw_l_ref, lnb_l_ref, lnw_g_ref, lnb_g_ref,
                     w1l_ref, w1g_ref, b1_ref, w2_ref, b2_ref, o_ref,
                     *, true_c):
    TH, W, Cp = o_ref.shape[1], o_ref.shape[2], o_ref.shape[3]
    two_c = 2 * true_c

    xp = xs_ref[0, 0].astype(jnp.float32)          # (TH+2, W+2, Cp) halo'd strip

    # depthwise 3x3: the nine taps are static strided slices of the halo'd
    # strip (no in-kernel pad/concat).
    # TODO(synk): move the dx taps onto pltpu.roll along the sublane axis so
    # the shifted copies ride the XLU slot instead of vld/VALU.
    acc = jnp.zeros((TH, W, Cp), jnp.float32)
    for dy in range(3):
        for dx in range(3):
            acc = acc + xp[dy:dy + TH, dx:dx + W, :] * dw_w_ref[dy, dx, :]
    acc = _gelu(acc + dw_b_ref[0])
    loc = jnp.dot(acc.reshape(TH * W, Cp).astype(jnp.bfloat16), pw_wt_ref[...],
                  preferred_element_type=jnp.float32) + pw_b_ref[0]   # (M, Cp)

    glob = glob_ref[0].astype(jnp.float32).reshape(TH * W, Cp)
    x_center = xp[1:1 + TH, 1:1 + W, :].reshape(TH * W, Cp)           # residual

    # fusion LayerNorm over the TRUE 2C features from per-half reductions
    # (no materialized (M, 2C) concat; padded lanes of loc/glob are zero).
    ssum = (jnp.sum(loc, axis=-1, keepdims=True)
            + jnp.sum(glob, axis=-1, keepdims=True))
    ssq = (jnp.sum(loc * loc, axis=-1, keepdims=True)
           + jnp.sum(glob * glob, axis=-1, keepdims=True))
    mu = ssum * (1.0 / two_c)
    var = jnp.maximum(ssq * (1.0 / two_c) - mu * mu, 0.0)
    rstd = jax.lax.rsqrt(var + 1e-5)
    loc_n = (loc - mu) * rstd * lnw_l_ref[0] + lnb_l_ref[0]
    glob_n = (glob - mu) * rstd * lnw_g_ref[0] + lnb_g_ref[0]

    # first Linear split into two half matmuls sharing one f32 accumulator.
    h1 = (jnp.dot(loc_n.astype(jnp.bfloat16), w1l_ref[...],
                  preferred_element_type=jnp.float32)
          + jnp.dot(glob_n.astype(jnp.bfloat16), w1g_ref[...],
                    preferred_element_type=jnp.float32)
          + b1_ref[0])
    h1 = _gelu(h1)
    out = jnp.dot(h1.astype(jnp.bfloat16), w2_ref[...],
                  preferred_element_type=jnp.float32) + b2_ref[0]

    # residual add (x never re-read: it is the centre tap of the halo'd strip)
    o_ref[0] = (x_center + out).reshape(TH, W, Cp).astype(o_ref.dtype)


def conv_fuse(x_img, glob_img, params, true_c, strip_rows):
    B, H, W, Cp = x_img.shape
    (dw_w, dw_b, pw_wt, pw_b, lnw_l, lnb_l, lnw_g, lnb_g,
     w1l, w1g, b1, w2, b2) = params
    hid = w1l.shape[1]

    # row-strip height: largest divisor of H not exceeding `strip_rows`.
    TH = 1
    for d in range(1, min(H, strip_rows) + 1):
        if H % d == 0:
            TH = d
    nS = H // TH

    # zero-pad once, then build duplicate-halo row strips so each grid step
    # holds a bounded (TH+2, W+2, Cp) slab instead of the whole image.
    # TODO(synk): replace the duplicate-halo copy with a manual
    # make_async_copy of the two halo rows from the unpadded image.
    x_pad = jnp.pad(x_img, ((0, 0), (1, 1), (1, 1), (0, 0)))
    strips = jnp.stack([x_pad[:, i * TH:i * TH + TH + 2] for i in range(nS)],
                       axis=1)                        # (B, nS, TH+2, W+2, Cp)

    blk = ((TH + 2) * (W + 2) + 2 * TH * W) * Cp * 4
    wbytes = (pw_wt.size + w1l.size + w1g.size + w2.size) * pw_wt.dtype.itemsize
    kern = functools.partial(conv_fuse_kernel, true_c=true_c)
    return pl.pallas_call(
        kern,
        out_shape=jax.ShapeDtypeStruct((B, H, W, Cp), x_img.dtype),
        grid=(B, nS),
        in_specs=[
            pl.BlockSpec((1, 1, TH + 2, W + 2, Cp), lambda b, s: (b, s, 0, 0, 0)),
            pl.BlockSpec((1, TH, W, Cp), lambda b, s: (b, s, 0, 0)),
            pl.BlockSpec((3, 3, Cp), lambda b, s: (0, 0, 0)),
            pl.BlockSpec((1, Cp), lambda b, s: (0, 0)),
            pl.BlockSpec((Cp, Cp), lambda b, s: (0, 0)),
            pl.BlockSpec((1, Cp), lambda b, s: (0, 0)),
            pl.BlockSpec((1, Cp), lambda b, s: (0, 0)),
            pl.BlockSpec((1, Cp), lambda b, s: (0, 0)),
            pl.BlockSpec((1, Cp), lambda b, s: (0, 0)),
            pl.BlockSpec((1, Cp), lambda b, s: (0, 0)),
            pl.BlockSpec((Cp, hid), lambda b, s: (0, 0)),
            pl.BlockSpec((Cp, hid), lambda b, s: (0, 0)),
            pl.BlockSpec((1, hid), lambda b, s: (0, 0)),
            pl.BlockSpec((hid, Cp), lambda b, s: (0, 0)),
            pl.BlockSpec((1, Cp), lambda b, s: (0, 0)),
        ],
        out_specs=pl.BlockSpec((1, TH, W, Cp), lambda b, s: (b, s, 0, 0)),
        compiler_params=pltpu.CompilerParams(
            dimension_semantics=("parallel", "parallel"),
            vmem_limit_bytes=_vmem_limit(4 * blk + 2 * wbytes)),
    )(strips, glob_img, dw_w, dw_b, pw_wt, pw_b,
      lnw_l, lnb_l, lnw_g, lnb_g, w1l, w1g, b1, w2, b2)


# ----------------------------------------------------------------------------
# Parameter construction (deterministic, synthetic) with lane-dense padding.
# ----------------------------------------------------------------------------
def init_params(key, dim, num_heads, mlp_ratio):
    """Builds PyTorch-shaped parameters, then zero-pads channels / per-head
    dims / MLP hidden width to multiples of 128.  Padding is exact: padded
    weight rows & cols and biases are zero (so padded activation lanes stay
    zero), and LayerNorm statistics use the true widths."""
    hidden = int(dim * mlp_ratio)
    cp = _round_up(dim, _LANE)
    hp = _round_up(hidden, _LANE)
    assert dim % num_heads == 0 and cp % num_heads == 0
    hd, hd_p = dim // num_heads, cp // num_heads

    ks = jax.random.split(key, 12)
    s = 0.02
    f32, bf16 = jnp.float32, jnp.bfloat16

    def pad2(a, rows, cols):
        return jnp.pad(a, ((0, rows - a.shape[0]), (0, cols - a.shape[1])))

    p = {}
    # ConvBranch: depthwise Conv2d(dim,dim,3,groups=dim) + Conv2d(dim,dim,1)
    dw_w = jax.random.normal(ks[0], (3, 3, dim), f32) * s
    p["dw_w"] = jnp.pad(dw_w, ((0, 0), (0, 0), (0, cp - dim)))
    p["dw_b"] = pad2(jax.random.normal(ks[1], (1, dim), f32) * s, 1, cp)
    pw_w = jax.random.normal(ks[2], (dim, dim), f32) * s             # (out, in)
    p["pw_wt"] = pad2(pw_w.T, cp, cp).astype(bf16)                   # (in, out)
    p["pw_b"] = pad2(jax.random.normal(ks[3], (1, dim), f32) * s, 1, cp)

    # AttentionBranch: LayerNorm(dim) + MultiheadAttention(dim, num_heads)
    p["attn_ln_w"] = pad2(jnp.ones((1, dim), f32), 1, cp)
    p["attn_ln_b"] = jnp.zeros((1, cp), f32)
    in_proj_w = jax.random.normal(ks[4], (3 * dim, dim), f32) * s    # torch (3C, C)
    in_proj_b = jax.random.normal(ks[5], (3 * dim,), f32) * s
    # padded QKV weight columns ordered (q|k|v) x head-major, each head padded
    # hd -> hd_p so in-kernel per-head views are aligned slices.
    wqkv = jnp.zeros((cp, 3 * cp), f32)
    bqkv = jnp.zeros((1, 3 * cp), f32)
    for t in range(3):
        for h in range(num_heads):
            rows = in_proj_w[t * dim + h * hd:t * dim + (h + 1) * hd, :]  # (hd, C)
            col0 = t * cp + h * hd_p
            wqkv = wqkv.at[:dim, col0:col0 + hd].set(rows.T)
            bqkv = bqkv.at[0, col0:col0 + hd].set(
                in_proj_b[t * dim + h * hd:t * dim + (h + 1) * hd])
    p["wqkv"] = wqkv.astype(bf16)
    p["bqkv"] = bqkv
    out_proj_w = jax.random.normal(ks[6], (dim, dim), f32) * s       # (out, in)
    wo = jnp.zeros((cp, cp), f32)
    for h in range(num_heads):
        wo = wo.at[h * hd_p:h * hd_p + hd, :dim].set(
            out_proj_w.T[h * hd:(h + 1) * hd, :])
    p["wo"] = wo.astype(bf16)
    p["bo"] = pad2(jax.random.normal(ks[7], (1, dim), f32) * s, 1, cp)

    # fusion MLP: LayerNorm(2*dim) -> Linear(2*dim,hidden) -> GELU -> Linear
    # (LN gain/bias and W1 are pre-split into the loc / glob halves).
    p["mlp_lnw_l"] = pad2(jnp.ones((1, dim), f32), 1, cp)
    p["mlp_lnw_g"] = pad2(jnp.ones((1, dim), f32), 1, cp)
    p["mlp_lnb_l"] = jnp.zeros((1, cp), f32)
    p["mlp_lnb_g"] = jnp.zeros((1, cp), f32)
    w1 = jax.random.normal(ks[8], (hidden, 2 * dim), f32) * s        # (out, in)
    w1_t = w1.T                                                      # (2C, hidden)
    p["w1l"] = pad2(w1_t[:dim], cp, hp).astype(bf16)
    p["w1g"] = pad2(w1_t[dim:], cp, hp).astype(bf16)
    p["b1"] = pad2(jax.random.normal(ks[9], (1, hidden), f32) * s, 1, hp)
    w2 = jax.random.normal(ks[10], (dim, hidden), f32) * s           # (out, in)
    p["w2"] = pad2(w2.T, hp, cp).astype(bf16)
    p["b2"] = pad2(jax.random.normal(ks[11], (1, dim), f32) * s, 1, cp)
    return p


# ----------------------------------------------------------------------------
# Full block forward
# ----------------------------------------------------------------------------
@functools.partial(jax.jit, static_argnums=(1, 2, 4, 5, 6))
def multi_branch_block(x_tokens, h, w, p, num_heads=4, window_size=8,
                       strip_rows=64):
    B, L, C = x_tokens.shape
    Cp = p["dw_w"].shape[-1]
    x_img = x_tokens.reshape(B, h, w, C)
    if Cp != C:
        x_img = jnp.pad(x_img, ((0, 0), (0, 0), (0, 0), (0, Cp - C)))

    glob = attention_branch(
        x_img,
        (p["attn_ln_w"], p["attn_ln_b"], p["wqkv"], p["bqkv"], p["wo"], p["bo"]),
        num_heads, window_size, C)

    out = conv_fuse(
        x_img, glob,
        (p["dw_w"], p["dw_b"], p["pw_wt"], p["pw_b"],
         p["mlp_lnw_l"], p["mlp_lnb_l"], p["mlp_lnw_g"], p["mlp_lnb_g"],
         p["w1l"], p["w1g"], p["b1"], p["w2"], p["b2"]),
        C, strip_rows)

    return out.reshape(B, h * w, Cp)[:, :, :C]


if __name__ == "__main__":
    key = jax.random.PRNGKey(0)
    kx, kp = jax.random.split(key)

    # small shapes consistent with the module: dim divisible by num_heads=4,
    # spatial divisible by window_size=8 (padding paths exist in the glue).
    B, C, H, W = 2, 32, 16, 16
    num_heads, window_size, mlp_ratio = 4, 8, 2.0

    x_nchw = jax.random.normal(kx, (B, C, H, W), jnp.float32)
    # x.flatten(2).permute(0, 2, 1)  -> tokens (B, L, C)
    x_tokens = jnp.transpose(x_nchw, (0, 2, 3, 1)).reshape(B, H * W, C)

    params = init_params(kp, C, num_heads, mlp_ratio)
    # strip_rows=8 -> conv_fuse grid (B, 2) = 4 steps; attention grid 2x2x2 = 8.
    out = multi_branch_block(x_tokens, H, W, params, num_heads, window_size, 8)
    out = jax.block_until_ready(out)

    assert out.shape == (B, H * W, C), out.shape
    assert bool(jnp.all(jnp.isfinite(out)))
    print("KERNEL_OK")
</pallas_src>

<mosaic_0001>
module attributes {stable_mosaic.version = 11 : i64} {
  func.func @attn_window_kernel(%arg0: i32, %arg1: i32, %arg2: i32, %arg3: memref<1x8x8x128xf32, #tpu.memory_space<vmem>>, %arg4: memref<1x128xf32, #tpu.memory_space<vmem>>, %arg5: memref<1x128xf32, #tpu.memory_space<vmem>>, %arg6: memref<128x384xbf16, #tpu.memory_space<vmem>>, %arg7: memref<1x384xf32, #tpu.memory_space<vmem>>, %arg8: memref<128x128xbf16, #tpu.memory_space<vmem>>, %arg9: memref<1x128xf32, #tpu.memory_space<vmem>>, %arg10: memref<1x8x8x128xf32, #tpu.memory_space<vmem>>) attributes {dimension_semantics = [#tpu.dimension_semantics<parallel>, #tpu.dimension_semantics<parallel>, #tpu.dimension_semantics<parallel>], iteration_bounds = array<i64: 2, 2, 2>, scalar_prefetch = 0 : i64, scratch_operands = 0 : i64, tpu.core_type = #tpu.core_type<tc>, window_params = [{transform_indices = @transform_0, window_bounds = array<i64: 1, 8, 8, 128>}, {pipeline_mode = #tpu.pipeline_mode<synchronous>, transform_indices = @transform_1, window_bounds = array<i64: 1, 128>}, {pipeline_mode = #tpu.pipeline_mode<synchronous>, transform_indices = @transform_2, window_bounds = array<i64: 1, 128>}, {pipeline_mode = #tpu.pipeline_mode<synchronous>, transform_indices = @transform_3, window_bounds = array<i64: 128, 384>}, {pipeline_mode = #tpu.pipeline_mode<synchronous>, transform_indices = @transform_4, window_bounds = array<i64: 1, 384>}, {pipeline_mode = #tpu.pipeline_mode<synchronous>, transform_indices = @transform_5, window_bounds = array<i64: 128, 128>}, {pipeline_mode = #tpu.pipeline_mode<synchronous>, transform_indices = @transform_6, window_bounds = array<i64: 1, 128>}, {transform_indices = @transform_7, window_bounds = array<i64: 1, 8, 8, 128>}]} {
    %c0 = arith.constant 0 : index
    %c0_0 = arith.constant 0 : index
    %c0_1 = arith.constant 0 : index
    %c0_2 = arith.constant 0 : index
    %0 = vector.load %arg3[%c0, %c0_0, %c0_1, %c0_2] : memref<1x8x8x128xf32, #tpu.memory_space<vmem>>, vector<1x8x8x128xf32>
    %1 = vector.shape_cast %0 : vector<1x8x8x128xf32> to vector<8x8x128xf32>
    %2 = vector.shape_cast %1 : vector<8x8x128xf32> to vector<64x128xf32>
    %cst = arith.constant dense<0.000000e+00> : vector<64xf32>
    %3 = vector.multi_reduction <add>, %2, %cst [1] : vector<64x128xf32> to vector<64xf32>
    %4 = vector.shape_cast %3 : vector<64xf32> to vector<64x1xf32>
    %5 = arith.mulf %2, %2 : vector<64x128xf32>
    %cst_3 = arith.constant dense<0.000000e+00> : vector<64xf32>
    %6 = vector.multi_reduction <add>, %5, %cst_3 [1] : vector<64x128xf32> to vector<64xf32>
    %7 = vector.shape_cast %6 : vector<64xf32> to vector<64x1xf32>
    %cst_4 = arith.constant 3.125000e-02 : f32
    %8 = vector.broadcast %cst_4 : f32 to vector<64x1xf32>
    %9 = arith.mulf %4, %8 : vector<64x1xf32>
    %cst_5 = arith.constant 3.125000e-02 : f32
    %10 = vector.broadcast %cst_5 : f32 to vector<64x1xf32>
    %11 = arith.mulf %7, %10 : vector<64x1xf32>
    %12 = arith.mulf %9, %9 : vector<64x1xf32>
    %13 = arith.subf %11, %12 : vector<64x1xf32>
    %cst_6 = arith.constant 0.000000e+00 : f32
    %14 = vector.broadcast %cst_6 : f32 to vector<64x1xf32>
    %15 = arith.maximumf %13, %14 : vector<64x1xf32>
    %16 = vector.broadcast %9 : vector<64x1xf32> to vector<64x128xf32>
    %17 = arith.subf %2, %16 : vector<64x128xf32>
    %cst_7 = arith.constant 9.99999974E-6 : f32
    %18 = vector.broadcast %cst_7 : f32 to vector<64x1xf32>
    %19 = arith.addf %15, %18 : vector<64x1xf32>
    %20 = math.rsqrt %19 : vector<64x1xf32>
    %21 = vector.broadcast %20 : vector<64x1xf32> to vector<64x128xf32>
    %22 = arith.mulf %17, %21 : vector<64x128xf32>
    %c0_8 = arith.constant 0 : index
    %c0_9 = arith.constant 0 : index
    %23 = vector.load %arg4[%c0_8, %c0_9] : memref<1x128xf32, #tpu.memory_space<vmem>>, vector<1x128xf32>
    %24 = vector.shape_cast %23 : vector<1x128xf32> to vector<128xf32>
    %25 = vector.shape_cast %24 : vector<128xf32> to vector<1x128xf32>
    %26 = vector.broadcast %25 : vector<1x128xf32> to vector<64x128xf32>
    %27 = arith.mulf %22, %26 : vector<64x128xf32>
    %c0_10 = arith.constant 0 : index
    %c0_11 = arith.constant 0 : index
    %28 = vector.load %arg5[%c0_10, %c0_11] : memref<1x128xf32, #tpu.memory_space<vmem>>, vector<1x128xf32>
    %29 = vector.shape_cast %28 : vector<1x128xf32> to vector<128xf32>
    %30 = vector.shape_cast %29 : vector<128xf32> to vector<1x128xf32>
    %31 = vector.broadcast %30 : vector<1x128xf32> to vector<64x128xf32>
    %32 = arith.addf %27, %31 : vector<64x128xf32>
    %33 = arith.truncf %32 : vector<64x128xf32> to vector<64x128xbf16>
    %c0_12 = arith.constant 0 : index
    %c0_13 = arith.constant 0 : index
    %34 = vector.load %arg6[%c0_12, %c0_13] : memref<128x384xbf16, #tpu.memory_space<vmem>>, vector<128x384xbf16>
    %cst_14 = arith.constant dense<0.000000e+00> : vector<64x384xf32>
    %35 = tpu.matmul %33, %34, %cst_14 {dimension_numbers = #tpu.dot_dimension_numbers<[1], [0], [0], [1], [0, 0, 1, 1], [], []>} : vector<64x128xbf16>, vector<128x384xbf16>, vector<64x384xf32> -> vector<64x384xf32>
    %c0_15 = arith.constant 0 : index
    %c0_16 = arith.constant 0 : index
    %36 = vector.load %arg7[%c0_15, %c0_16] : memref<1x384xf32, #tpu.memory_space<vmem>>, vector<1x384xf32>
    %37 = vector.shape_cast %36 : vector<1x384xf32> to vector<384xf32>
    %38 = vector.shape_cast %37 : vector<384xf32> to vector<1x384xf32>
    %39 = vector.broadcast %38 : vector<1x384xf32> to vector<64x384xf32>
    %40 = arith.addf %35, %39 : vector<64x384xf32>
    %41 = vector.extract_strided_slice %40 {offsets = [0, 0], sizes = [64, 32], strides = [1, 1]} : vector<64x384xf32> to vector<64x32xf32>
    %42 = vector.extract_strided_slice %40 {offsets = [0, 32], sizes = [64, 32], strides = [1, 1]} : vector<64x384xf32> to vector<64x32xf32>
    %43 = vector.extract_strided_slice %40 {offsets = [0, 64], sizes = [64, 32], strides = [1, 1]} : vector<64x384xf32> to vector<64x32xf32>
    %44 = vector.extract_strided_slice %40 {offsets = [0, 96], sizes = [64, 32], strides = [1, 1]} : vector<64x384xf32> to vector<64x32xf32>
    %45 = vector.shape_cast %41 : vector<64x32xf32> to vector<1x64x32xf32>
    %46 = vector.shape_cast %42 : vector<64x32xf32> to vector<1x64x32xf32>
    %47 = vector.shape_cast %43 : vector<64x32xf32> to vector<1x64x32xf32>
    %48 = vector.shape_cast %44 : vector<64x32xf32> to vector<1x64x32xf32>
    %49 = tpu.concatenate %45, %46, %47, %48 in 0 : vector<1x64x32xf32>, vector<1x64x32xf32>, vector<1x64x32xf32>, vector<1x64x32xf32> -> vector<4x64x32xf32>
    %50 = arith.truncf %49 : vector<4x64x32xf32> to vector<4x64x32xbf16>
    %51 = vector.extract_strided_slice %40 {offsets = [0, 128], sizes = [64, 32], strides = [1, 1]} : vector<64x384xf32> to vector<64x32xf32>
    %52 = vector.extract_strided_slice %40 {offsets = [0, 160], sizes = [64, 32], strides = [1, 1]} : vector<64x384xf32> to vector<64x32xf32>
    %53 = vector.extract_strided_slice %40 {offsets = [0, 192], sizes = [64, 32], strides = [1, 1]} : vector<64x384xf32> to vector<64x32xf32>
    %54 = vector.extract_strided_slice %40 {offsets = [0, 224], sizes = [64, 32], strides = [1, 1]} : vector<64x384xf32> to vector<64x32xf32>
    %55 = vector.shape_cast %51 : vector<64x32xf32> to vector<1x64x32xf32>
    %56 = vector.shape_cast %52 : vector<64x32xf32> to vector<1x64x32xf32>
    %57 = vector.shape_cast %53 : vector<64x32xf32> to vector<1x64x32xf32>
    %58 = vector.shape_cast %54 : vector<64x32xf32> to vector<1x64x32xf32>
    %59 = tpu.concatenate %55, %56, %57, %58 in 0 : vector<1x64x32xf32>, vector<1x64x32xf32>, vector<1x64x32xf32>, vector<1x64x32xf32> -> vector<4x64x32xf32>
    %60 = arith.truncf %59 : vector<4x64x32xf32> to vector<4x64x32xbf16>
    %61 = vector.extract_strided_slice %40 {offsets = [0, 256], sizes = [64, 32], strides = [1, 1]} : vector<64x384xf32> to vector<64x32xf32>
    %62 = vector.extract_strided_slice %40 {offsets = [0, 288], sizes = [64, 32], strides = [1, 1]} : vector<64x384xf32> to vector<64x32xf32>
    %63 = vector.extract_strided_slice %40 {offsets = [0, 320], sizes = [64, 32], strides = [1, 1]} : vector<64x384xf32> to vector<64x32xf32>
    %64 = vector.extract_strided_slice %40 {offsets = [0, 352], sizes = [64, 32], strides = [1, 1]} : vector<64x384xf32> to vector<64x32xf32>
    %65 = vector.shape_cast %61 : vector<64x32xf32> to vector<1x64x32xf32>
    %66 = vector.shape_cast %62 : vector<64x32xf32> to vector<1x64x32xf32>
    %67 = vector.shape_cast %63 : vector<64x32xf32> to vector<1x64x32xf32>
    %68 = vector.shape_cast %64 : vector<64x32xf32> to vector<1x64x32xf32>
    %69 = tpu.concatenate %65, %66, %67, %68 in 0 : vector<1x64x32xf32>, vector<1x64x32xf32>, vector<1x64x32xf32>, vector<1x64x32xf32> -> vector<4x64x32xf32>
    %70 = arith.truncf %69 : vector<4x64x32xf32> to vector<4x64x32xbf16>
    %cst_17 = arith.constant dense<0.000000e+00> : vector<4x64x64xf32>
    %71 = tpu.matmul %50, %60, %cst_17 {dimension_numbers = #tpu.dot_dimension_numbers<[2], [2], [1], [1], [0, 0, 0, 1, 1, 1], [0], [0]>} : vector<4x64x32xbf16>, vector<4x64x32xbf16>, vector<4x64x64xf32> -> vector<4x64x64xf32>
    %cst_18 = arith.constant 0.353553385 : f32
    %72 = vector.broadcast %cst_18 : f32 to vector<4x64x64xf32>
    %73 = arith.mulf %71, %72 : vector<4x64x64xf32>
    %cst_19 = arith.constant dense<0xFF800000> : vector<4x64xf32>
    %74 = vector.multi_reduction <maximumf>, %73, %cst_19 [2] : vector<4x64x64xf32> to vector<4x64xf32>
    %75 = vector.shape_cast %74 : vector<4x64xf32> to vector<4x64x1xf32>
    %76 = vector.broadcast %75 : vector<4x64x1xf32> to vector<4x64x64xf32>
    %77 = arith.subf %73, %76 : vector<4x64x64xf32>
    %78 = math.exp %77 : vector<4x64x64xf32>
    %cst_20 = arith.constant dense<0.000000e+00> : vector<4x64xf32>
    %79 = vector.multi_reduction <add>, %78, %cst_20 [2] : vector<4x64x64xf32> to vector<4x64xf32>
    %80 = vector.shape_cast %79 : vector<4x64xf32> to vector<4x64x1xf32>
    %81 = tpu.reciprocal %80 {approx = true} : vector<4x64x1xf32> -> vector<4x64x1xf32>
    %82 = vector.broadcast %81 : vector<4x64x1xf32> to vector<4x64x64xf32>
    %83 = arith.mulf %78, %82 : vector<4x64x64xf32>
    %84 = arith.truncf %83 : vector<4x64x64xf32> to vector<4x64x64xbf16>
    %cst_21 = arith.constant dense<0.000000e+00> : vector<4x64x32xf32>
    %85 = tpu.matmul %84, %70, %cst_21 {dimension_numbers = #tpu.dot_dimension_numbers<[2], [1], [1], [2], [0, 0, 0, 1, 1, 2], [0], [0]>} : vector<4x64x64xbf16>, vector<4x64x32xbf16>, vector<4x64x32xf32> -> vector<4x64x32xf32>
    %86 = vector.extract_strided_slice %85 {offsets = [0, 0, 0], sizes = [1, 64, 32], strides = [1, 1, 1]} : vector<4x64x32xf32> to vector<1x64x32xf32>
    %87 = vector.shape_cast %86 : vector<1x64x32xf32> to vector<64x32xf32>
    %88 = vector.extract_strided_slice %85 {offsets = [1, 0, 0], sizes = [1, 64, 32], strides = [1, 1, 1]} : vector<4x64x32xf32> to vector<1x64x32xf32>
    %89 = vector.shape_cast %88 : vector<1x64x32xf32> to vector<64x32xf32>
    %90 = vector.extract_strided_slice %85 {offsets = [2, 0, 0], sizes = [1, 64, 32], strides = [1, 1, 1]} : vector<4x64x32xf32> to vector<1x64x32xf32>
    %91 = vector.shape_cast %90 : vector<1x64x32xf32> to vector<64x32xf32>
    %92 = vector.extract_strided_slice %85 {offsets = [3, 0, 0], sizes = [1, 64, 32], strides = [1, 1, 1]} : vector<4x64x32xf32> to vector<1x64x32xf32>
    %93 = vector.shape_cast %92 : vector<1x64x32xf32> to vector<64x32xf32>
    %94 = tpu.concatenate %87, %89, %91, %93 in 1 : vector<64x32xf32>, vector<64x32xf32>, vector<64x32xf32>, vector<64x32xf32> -> vector<64x128xf32>
    %95 = arith.truncf %94 : vector<64x128xf32> to vector<64x128xbf16>
    %c0_22 = arith.constant 0 : index
    %c0_23 = arith.constant 0 : index
    %96 = vector.load %arg8[%c0_22, %c0_23] : memref<128x128xbf16, #tpu.memory_space<vmem>>, vector<128x128xbf16>
    %cst_24 = arith.constant dense<0.000000e+00> : vector<64x128xf32>
    %97 = tpu.matmul %95, %96, %cst_24 {dimension_numbers = #tpu.dot_dimension_numbers<[1], [0], [0], [1], [0, 0, 1, 1], [], []>} : vector<64x128xbf16>, vector<128x128xbf16>, vector<64x128xf32> -> vector<64x128xf32>
    %c0_25 = arith.constant 0 : index
    %c0_26 = arith.constant 0 : index
    %98 = vector.load %arg9[%c0_25, %c0_26] : memref<1x128xf32, #tpu.memory_space<vmem>>, vector<1x128xf32>
    %99 = vector.shape_cast %98 : vector<1x128xf32> to vector<128xf32>
    %100 = vector.shape_cast %99 : vector<128xf32> to vector<1x128xf32>
    %101 = vector.broadcast %100 : vector<1x128xf32> to vector<64x128xf32>
    %102 = arith.addf %97, %101 : vector<64x128xf32>
    %103 = vector.shape_cast %102 : vector<64x128xf32> to vector<8x8x128xf32>
    %c0_27 = arith.constant 0 : index
    %c0_28 = arith.constant 0 : index
    %c0_29 = arith.constant 0 : index
    %c0_30 = arith.constant 0 : index
    %104 = vector.load %arg10[%c0_27, %c0_28, %c0_29, %c0_30] : memref<1x8x8x128xf32, #tpu.memory_space<vmem>>, vector<1x8x8x128xf32>
    %105 = vector.shape_cast %104 : vector<1x8x8x128xf32> to vector<8x8x128xf32>
    %106 = vector.shape_cast %103 : vector<8x8x128xf32> to vector<1x8x8x128xf32>
    tpu.vector_store %arg10[%c0_27, %c0_28, %c0_29, %c0_30], %106 {strides = array<i32>} : memref<1x8x8x128xf32, #tpu.memory_space<vmem>>, vector<1x8x8x128xf32>,
    return
  }
  func.func @transform_0(%arg0: i32, %arg1: i32, %arg2: i32) -> (i32, i32, i32, i32) {
    %c0_i32 = arith.constant 0 : i32
    %c0_i32_0 = arith.constant 0 : i32
    return %arg0, %arg1, %arg2, %c0_i32 : i32, i32, i32, i32
  }
  func.func @transform_1(%arg0: i32, %arg1: i32, %arg2: i32) -> (i32, i32) {
    %c0_i32 = arith.constant 0 : i32
    %c0_i32_0 = arith.constant 0 : i32
    %c0_i32_1 = arith.constant 0 : i32
    return %c0_i32, %c0_i32_0 : i32, i32
  }
  func.func @transform_2(%arg0: i32, %arg1: i32, %arg2: i32) -> (i32, i32) {
    %c0_i32 = arith.constant 0 : i32
    %c0_i32_0 = arith.constant 0 : i32
    %c0_i32_1 = arith.constant 0 : i32
    return %c0_i32, %c0_i32_0 : i32, i32
  }
  func.func @transform_3(%arg0: i32, %arg1: i32, %arg2: i32) -> (i32, i32) {
    %c0_i32 = arith.constant 0 : i32
    %c0_i32_0 = arith.constant 0 : i32
    %c0_i32_1 = arith.constant 0 : i32
    return %c0_i32, %c0_i32_0 : i32, i32
  }
  func.func @transform_4(%arg0: i32, %arg1: i32, %arg2: i32) -> (i32, i32) {
    %c0_i32 = arith.constant 0 : i32
    %c0_i32_0 = arith.constant 0 : i32
    %c0_i32_1 = arith.constant 0 : i32
    return %c0_i32, %c0_i32_0 : i32, i32
  }
  func.func @transform_5(%arg0: i32, %arg1: i32, %arg2: i32) -> (i32, i32) {
    %c0_i32 = arith.constant 0 : i32
    %c0_i32_0 = arith.constant 0 : i32
    %c0_i32_1 = arith.constant 0 : i32
    return %c0_i32, %c0_i32_0 : i32, i32
  }
  func.func @transform_6(%arg0: i32, %arg1: i32, %arg2: i32) -> (i32, i32) {
    %c0_i32 = arith.constant 0 : i32
    %c0_i32_0 = arith.constant 0 : i32
    %c0_i32_1 = arith.constant 0 : i32
    return %c0_i32, %c0_i32_0 : i32, i32
  }
  func.func @transform_7(%arg0: i32, %arg1: i32, %arg2: i32) -> (i32, i32, i32, i32) {
    %c0_i32 = arith.constant 0 : i32
    %c0_i32_0 = arith.constant 0 : i32
    return %arg0, %arg1, %arg2, %c0_i32 : i32, i32, i32, i32
  }
}

module attributes {stable_mosaic.version = 11 : i64} {
  func.func @conv_fuse_kernel(%arg0: i32, %arg1: i32, %arg2: memref<1x1x10x18x128xf32, #tpu.memory_space<vmem>>, %arg3: memref<1x8x16x128xf32, #tpu.memory_space<vmem>>, %arg4: memref<3x3x128xf32, #tpu.memory_space<vmem>>, %arg5: memref<1x128xf32, #tpu.memory_space<vmem>>, %arg6: memref<128x128xbf16, #tpu.memory_space<vmem>>, %arg7: memref<1x128xf32, #tpu.memory_space<vmem>>, %arg8: memref<1x128xf32, #tpu.memory_space<vmem>>, %arg9: memref<1x128xf32, #tpu.memory_space<vmem>>, %arg10: memref<1x128xf32, #tpu.memory_space<vmem>>, %arg11: memref<1x128xf32, #tpu.memory_space<vmem>>, %arg12: memref<128x128xbf16, #tpu.memory_space<vmem>>, %arg13: memref<128x128xbf16, #tpu.memory_space<vmem>>, %arg14: memref<1x128xf32, #tpu.memory_space<vmem>>, %arg15: memref<128x128xbf16, #tpu.memory_space<vmem>>, %arg16: memref<1x128xf32, #tpu.memory_space<vmem>>, %arg17: memref<1x8x16x128xf32, #tpu.memory_space<vmem>>) attributes {dimension_semantics = [#tpu.dimension_semantics<parallel>, #tpu.dimension_semantics<parallel>], iteration_bounds = array<i64: 2, 2>, scalar_prefetch = 0 : i64, scratch_operands = 0 : i64, tpu.core_type = #tpu.core_type<tc>, window_params = [{transform_indices = @transform_0, window_bounds = array<i64: 1, 1, 10, 18, 128>}, {transform_indices = @transform_1, window_bounds = array<i64: 1, 8, 16, 128>}, {pipeline_mode = #tpu.pipeline_mode<synchronous>, transform_indices = @transform_2, window_bounds = array<i64: 3, 3, 128>}, {pipeline_mode = #tpu.pipeline_mode<synchronous>, transform_indices = @transform_3, window_bounds = array<i64: 1, 128>}, {pipeline_mode = #tpu.pipeline_mode<synchronous>, transform_indices = @transform_4, window_bounds = array<i64: 128, 128>}, {pipeline_mode = #tpu.pipeline_mode<synchronous>, transform_indices = @transform_5, window_bounds = array<i64: 1, 128>}, {pipeline_mode = #tpu.pipeline_mode<synchronous>, transform_indices = @transform_6, window_bounds = array<i64: 1, 128>}, {pipeline_mode = #tpu.pipeline_mode<synchronous>, transform_indices = @transform_7, window_bounds = array<i64: 1, 128>}, {pipeline_mode = #tpu.pipeline_mode<synchronous>, transform_indices = @transform_8, window_bounds = array<i64: 1, 128>}, {pipeline_mode = #tpu.pipeline_mode<synchronous>, transform_indices = @transform_9, window_bounds = array<i64: 1, 128>}, {pipeline_mode = #tpu.pipeline_mode<synchronous>, transform_indices = @transform_10, window_bounds = array<i64: 128, 128>}, {pipeline_mode = #tpu.pipeline_mode<synchronous>, transform_indices = @transform_11, window_bounds = array<i64: 128, 128>}, {pipeline_mode = #tpu.pipeline_mode<synchronous>, transform_indices = @transform_12, window_bounds = array<i64: 1, 128>}, {pipeline_mode = #tpu.pipeline_mode<synchronous>, transform_indices = @transform_13, window_bounds = array<i64: 128, 128>}, {pipeline_mode = #tpu.pipeline_mode<synchronous>, transform_indices = @transform_14, window_bounds = array<i64: 1, 128>}, {transform_indices = @transform_15, window_bounds = array<i64: 1, 8, 16, 128>}]} {
    %c0 = arith.constant 0 : index
    %c0_0 = arith.constant 0 : index
    %c0_1 = arith.constant 0 : index
    %c0_2 = arith.constant 0 : index
    %c0_3 = arith.constant 0 : index
    %0 = vector.load %arg2[%c0, %c0_0, %c0_1, %c0_2, %c0_3] : memref<1x1x10x18x128xf32, #tpu.memory_space<vmem>>, vector<1x1x10x18x128xf32>
    %1 = vector.shape_cast %0 : vector<1x1x10x18x128xf32> to vector<10x18x128xf32>
    %cst = arith.constant 0.000000e+00 : f32
    %2 = vector.broadcast %cst : f32 to vector<8x16x128xf32>
    %3 = vector.extract_strided_slice %1 {offsets = [0, 0, 0], sizes = [8, 16, 128], strides = [1, 1, 1]} : vector<10x18x128xf32> to vector<8x16x128xf32>
    %c0_4 = arith.constant 0 : index
    %c0_5 = arith.constant 0 : index
    %c0_6 = arith.constant 0 : index
    %4 = vector.load %arg4[%c0_4, %c0_5, %c0_6] : memref<3x3x128xf32, #tpu.memory_space<vmem>>, vector<1x1x128xf32>
    %5 = vector.shape_cast %4 : vector<1x1x128xf32> to vector<128xf32>
    %6 = vector.shape_cast %5 : vector<128xf32> to vector<1x1x128xf32>
    %7 = vector.broadcast %6 : vector<1x1x128xf32> to vector<8x16x128xf32>
    %8 = arith.mulf %3, %7 : vector<8x16x128xf32>
    %9 = arith.addf %2, %8 : vector<8x16x128xf32>
    %10 = vector.extract_strided_slice %1 {offsets = [0, 1, 0], sizes = [8, 16, 128], strides = [1, 1, 1]} : vector<10x18x128xf32> to vector<8x16x128xf32>
    %c0_7 = arith.constant 0 : index
    %c1 = arith.constant 1 : index
    %c0_8 = arith.constant 0 : index
    %11 = vector.load %arg4[%c0_7, %c1, %c0_8] : memref<3x3x128xf32, #tpu.memory_space<vmem>>, vector<1x1x128xf32>
    %12 = vector.shape_cast %11 : vector<1x1x128xf32> to vector<128xf32>
    %13 = vector.shape_cast %12 : vector<128xf32> to vector<1x1x128xf32>
    %14 = vector.broadcast %13 : vector<1x1x128xf32> to vector<8x16x128xf32>
    %15 = arith.mulf %10, %14 : vector<8x16x128xf32>
    %16 = arith.addf %9, %15 : vector<8x16x128xf32>
    %17 = vector.extract_strided_slice %1 {offsets = [0, 2, 0], sizes = [8, 16, 128], strides = [1, 1, 1]} : vector<10x18x128xf32> to vector<8x16x128xf32>
    %c0_9 = arith.constant 0 : index
    %c2 = arith.constant 2 : index
    %c0_10 = arith.constant 0 : index
    %18 = vector.load %arg4[%c0_9, %c2, %c0_10] : memref<3x3x128xf32, #tpu.memory_space<vmem>>, vector<1x1x128xf32>
    %19 = vector.shape_cast %18 : vector<1x1x128xf32> to vector<128xf32>
    %20 = vector.shape_cast %19 : vector<128xf32> to vector<1x1x128xf32>
    %21 = vector.broadcast %20 : vector<1x1x128xf32> to vector<8x16x128xf32>
    %22 = arith.mulf %17, %21 : vector<8x16x128xf32>
    %23 = arith.addf %16, %22 : vector<8x16x128xf32>
    %24 = vector.extract_strided_slice %1 {offsets = [1, 0, 0], sizes = [8, 16, 128], strides = [1, 1, 1]} : vector<10x18x128xf32> to vector<8x16x128xf32>
    %c1_11 = arith.constant 1 : index
    %c0_12 = arith.constant 0 : index
    %c0_13 = arith.constant 0 : index
    %25 = vector.load %arg4[%c1_11, %c0_12, %c0_13] : memref<3x3x128xf32, #tpu.memory_space<vmem>>, vector<1x1x128xf32>
    %26 = vector.shape_cast %25 : vector<1x1x128xf32> to vector<128xf32>
    %27 = vector.shape_cast %26 : vector<128xf32> to vector<1x1x128xf32>
    %28 = vector.broadcast %27 : vector<1x1x128xf32> to vector<8x16x128xf32>
    %29 = arith.mulf %24, %28 : vector<8x16x128xf32>
    %30 = arith.addf %23, %29 : vector<8x16x128xf32>
    %31 = vector.extract_strided_slice %1 {offsets = [1, 1, 0], sizes = [8, 16, 128], strides = [1, 1, 1]} : vector<10x18x128xf32> to vector<8x16x128xf32>
    %c1_14 = arith.constant 1 : index
    %c1_15 = arith.constant 1 : index
    %c0_16 = arith.constant 0 : index
    %32 = vector.load %arg4[%c1_14, %c1_15, %c0_16] : memref<3x3x128xf32, #tpu.memory_space<vmem>>, vector<1x1x128xf32>
    %33 = vector.shape_cast %32 : vector<1x1x128xf32> to vector<128xf32>
    %34 = vector.shape_cast %33 : vector<128xf32> to vector<1x1x128xf32>
    %35 = vector.broadcast %34 : vector<1x1x128xf32> to vector<8x16x128xf32>
    %36 = arith.mulf %31, %35 : vector<8x16x128xf32>
    %37 = arith.addf %30, %36 : vector<8x16x128xf32>
    %38 = vector.extract_strided_slice %1 {offsets = [1, 2, 0], sizes = [8, 16, 128], strides = [1, 1, 1]} : vector<10x18x128xf32> to vector<8x16x128xf32>
    %c1_17 = arith.constant 1 : index
    %c2_18 = arith.constant 2 : index
    %c0_19 = arith.constant 0 : index
    %39 = vector.load %arg4[%c1_17, %c2_18, %c0_19] : memref<3x3x128xf32, #tpu.memory_space<vmem>>, vector<1x1x128xf32>
    %40 = vector.shape_cast %39 : vector<1x1x128xf32> to vector<128xf32>
    %41 = vector.shape_cast %40 : vector<128xf32> to vector<1x1x128xf32>
    %42 = vector.broadcast %41 : vector<1x1x128xf32> to vector<8x16x128xf32>
    %43 = arith.mulf %38, %42 : vector<8x16x128xf32>
    %44 = arith.addf %37, %43 : vector<8x16x128xf32>
    %45 = vector.extract_strided_slice %1 {offsets = [2, 0, 0], sizes = [8, 16, 128], strides = [1, 1, 1]} : vector<10x18x128xf32> to vector<8x16x128xf32>
    %c2_20 = arith.constant 2 : index
    %c0_21 = arith.constant 0 : index
    %c0_22 = arith.constant 0 : index
    %46 = vector.load %arg4[%c2_20, %c0_21, %c0_22] : memref<3x3x128xf32, #tpu.memory_space<vmem>>, vector<1x1x128xf32>
    %47 = vector.shape_cast %46 : vector<1x1x128xf32> to vector<128xf32>
    %48 = vector.shape_cast %47 : vector<128xf32> to vector<1x1x128xf32>
    %49 = vector.broadcast %48 : vector<1x1x128xf32> to vector<8x16x128xf32>
    %50 = arith.mulf %45, %49 : vector<8x16x128xf32>
    %51 = arith.addf %44, %50 : vector<8x16x128xf32>
    %52 = vector.extract_strided_slice %1 {offsets = [2, 1, 0], sizes = [8, 16, 128], strides = [1, 1, 1]} : vector<10x18x128xf32> to vector<8x16x128xf32>
    %c2_23 = arith.constant 2 : index
    %c1_24 = arith.constant 1 : index
    %c0_25 = arith.constant 0 : index
    %53 = vector.load %arg4[%c2_23, %c1_24, %c0_25] : memref<3x3x128xf32, #tpu.memory_space<vmem>>, vector<1x1x128xf32>
    %54 = vector.shape_cast %53 : vector<1x1x128xf32> to vector<128xf32>
    %55 = vector.shape_cast %54 : vector<128xf32> to vector<1x1x128xf32>
    %56 = vector.broadcast %55 : vector<1x1x128xf32> to vector<8x16x128xf32>
    %57 = arith.mulf %52, %56 : vector<8x16x128xf32>
    %58 = arith.addf %51, %57 : vector<8x16x128xf32>
    %59 = vector.extract_strided_slice %1 {offsets = [2, 2, 0], sizes = [8, 16, 128], strides = [1, 1, 1]} : vector<10x18x128xf32> to vector<8x16x128xf32>
    %c2_26 = arith.constant 2 : index
    %c2_27 = arith.constant 2 : index
    %c0_28 = arith.constant 0 : index
    %60 = vector.load %arg4[%c2_26, %c2_27, %c0_28] : memref<3x3x128xf32, #tpu.memory_space<vmem>>, vector<1x1x128xf32>
    %61 = vector.shape_cast %60 : vector<1x1x128xf32> to vector<128xf32>
    %62 = vector.shape_cast %61 : vector<128xf32> to vector<1x1x128xf32>
    %63 = vector.broadcast %62 : vector<1x1x128xf32> to vector<8x16x128xf32>
    %64 = arith.mulf %59, %63 : vector<8x16x128xf32>
    %65 = arith.addf %58, %64 : vector<8x16x128xf32>
    %c0_29 = arith.constant 0 : index
    %c0_30 = arith.constant 0 : index
    %66 = vector.load %arg5[%c0_29, %c0_30] : memref<1x128xf32, #tpu.memory_space<vmem>>, vector<1x128xf32>
    %67 = vector.shape_cast %66 : vector<1x128xf32> to vector<128xf32>
    %68 = vector.shape_cast %67 : vector<128xf32> to vector<1x1x128xf32>
    %69 = vector.broadcast %68 : vector<1x1x128xf32> to vector<8x16x128xf32>
    %70 = arith.addf %65, %69 : vector<8x16x128xf32>
    %cst_31 = arith.constant 5.000000e-01 : f32
    %71 = vector.broadcast %cst_31 : f32 to vector<8x16x128xf32>
    %72 = arith.mulf %71, %70 : vector<8x16x128xf32>
    %cst_32 = arith.constant 0.707106769 : f32
    %73 = vector.broadcast %cst_32 : f32 to vector<8x16x128xf32>
    %74 = arith.mulf %70, %73 : vector<8x16x128xf32>
    %75 = math.erf %74 : vector<8x16x128xf32>
    %cst_33 = arith.constant 1.000000e+00 : f32
    %76 = vector.broadcast %cst_33 : f32 to vector<8x16x128xf32>
    %77 = arith.addf %76, %75 : vector<8x16x128xf32>
    %78 = arith.mulf %72, %77 : vector<8x16x128xf32>
    %79 = vector.shape_cast %78 : vector<8x16x128xf32> to vector<128x128xf32>
    %80 = arith.truncf %79 : vector<128x128xf32> to vector<128x128xbf16>
    %c0_34 = arith.constant 0 : index
    %c0_35 = arith.constant 0 : index
    %81 = vector.load %arg6[%c0_34, %c0_35] : memref<128x128xbf16, #tpu.memory_space<vmem>>, vector<128x128xbf16>
    %cst_36 = arith.constant dense<0.000000e+00> : vector<128x128xf32>
    %82 = tpu.matmul %80, %81, %cst_36 {dimension_numbers = #tpu.dot_dimension_numbers<[1], [0], [0], [1], [0, 0, 1, 1], [], []>} : vector<128x128xbf16>, vector<128x128xbf16>, vector<128x128xf32> -> vector<128x128xf32>
    %c0_37 = arith.constant 0 : index
    %c0_38 = arith.constant 0 : index
    %83 = vector.load %arg7[%c0_37, %c0_38] : memref<1x128xf32, #tpu.memory_space<vmem>>, vector<1x128xf32>
    %84 = vector.shape_cast %83 : vector<1x128xf32> to vector<128xf32>
    %85 = vector.shape_cast %84 : vector<128xf32> to vector<1x128xf32>
    %86 = vector.broadcast %85 : vector<1x128xf32> to vector<128x128xf32>
    %87 = arith.addf %82, %86 : vector<128x128xf32>
    %c0_39 = arith.constant 0 : index
    %c0_40 = arith.constant 0 : index
    %c0_41 = arith.constant 0 : index
    %c0_42 = arith.constant 0 : index
    %88 = vector.load %arg3[%c0_39, %c0_40, %c0_41, %c0_42] : memref<1x8x16x128xf32, #tpu.memory_space<vmem>>, vector<1x8x16x128xf32>
    %89 = vector.shape_cast %88 : vector<1x8x16x128xf32> to vector<8x16x128xf32>
    %90 = vector.shape_cast %89 : vector<8x16x128xf32> to vector<128x128xf32>
    %91 = vector.extract_strided_slice %1 {offsets = [1, 1, 0], sizes = [8, 16, 128], strides = [1, 1, 1]} : vector<10x18x128xf32> to vector<8x16x128xf32>
    %92 = vector.shape_cast %91 : vector<8x16x128xf32> to vector<128x128xf32>
    %cst_43 = arith.constant dense<0.000000e+00> : vector<128xf32>
    %93 = vector.multi_reduction <add>, %87, %cst_43 [1] : vector<128x128xf32> to vector<128xf32>
    %94 = vector.shape_cast %93 : vector<128xf32> to vector<128x1xf32>
    %cst_44 = arith.constant dense<0.000000e+00> : vector<128xf32>
    %95 = vector.multi_reduction <add>, %90, %cst_44 [1] : vector<128x128xf32> to vector<128xf32>
    %96 = vector.shape_cast %95 : vector<128xf32> to vector<128x1xf32>
    %97 = arith.addf %94, %96 : vector<128x1xf32>
    %98 = arith.mulf %87, %87 : vector<128x128xf32>
    %cst_45 = arith.constant dense<0.000000e+00> : vector<128xf32>
    %99 = vector.multi_reduction <add>, %98, %cst_45 [1] : vector<128x128xf32> to vector<128xf32>
    %100 = vector.shape_cast %99 : vector<128xf32> to vector<128x1xf32>
    %101 = arith.mulf %90, %90 : vector<128x128xf32>
    %cst_46 = arith.constant dense<0.000000e+00> : vector<128xf32>
    %102 = vector.multi_reduction <add>, %101, %cst_46 [1] : vector<128x128xf32> to vector<128xf32>
    %103 = vector.shape_cast %102 : vector<128xf32> to vector<128x1xf32>
    %104 = arith.addf %100, %103 : vector<128x1xf32>
    %cst_47 = arith.constant 1.562500e-02 : f32
    %105 = vector.broadcast %cst_47 : f32 to vector<128x1xf32>
    %106 = arith.mulf %97, %105 : vector<128x1xf32>
    %cst_48 = arith.constant 1.562500e-02 : f32
    %107 = vector.broadcast %cst_48 : f32 to vector<128x1xf32>
    %108 = arith.mulf %104, %107 : vector<128x1xf32>
    %109 = arith.mulf %106, %106 : vector<128x1xf32>
    %110 = arith.subf %108, %109 : vector<128x1xf32>
    %cst_49 = arith.constant 0.000000e+00 : f32
    %111 = vector.broadcast %cst_49 : f32 to vector<128x1xf32>
    %112 = arith.maximumf %110, %111 : vector<128x1xf32>
    %cst_50 = arith.constant 9.99999974E-6 : f32
    %113 = vector.broadcast %cst_50 : f32 to vector<128x1xf32>
    %114 = arith.addf %112, %113 : vector<128x1xf32>
    %115 = math.rsqrt %114 : vector<128x1xf32>
    %116 = vector.broadcast %106 : vector<128x1xf32> to vector<128x128xf32>
    %117 = arith.subf %87, %116 : vector<128x128xf32>
    %118 = vector.broadcast %115 : vector<128x1xf32> to vector<128x128xf32>
    %119 = arith.mulf %117, %118 : vector<128x128xf32>
    %c0_51 = arith.constant 0 : index
    %c0_52 = arith.constant 0 : index
    %120 = vector.load %arg8[%c0_51, %c0_52] : memref<1x128xf32, #tpu.memory_space<vmem>>, vector<1x128xf32>
    %121 = vector.shape_cast %120 : vector<1x128xf32> to vector<128xf32>
    %122 = vector.shape_cast %121 : vector<128xf32> to vector<1x128xf32>
    %123 = vector.broadcast %122 : vector<1x128xf32> to vector<128x128xf32>
    %124 = arith.mulf %119, %123 : vector<128x128xf32>
    %c0_53 = arith.constant 0 : index
    %c0_54 = arith.constant 0 : index
    %125 = vector.load %arg9[%c0_53, %c0_54] : memref<1x128xf32, #tpu.memory_space<vmem>>, vector<1x128xf32>
    %126 = vector.shape_cast %125 : vector<1x128xf32> to vector<128xf32>
    %127 = vector.shape_cast %126 : vector<128xf32> to vector<1x128xf32>
    %128 = vector.broadcast %127 : vector<1x128xf32> to vector<128x128xf32>
    %129 = arith.addf %124, %128 : vector<128x128xf32>
    %130 = vector.broadcast %106 : vector<128x1xf32> to vector<128x128xf32>
    %131 = arith.subf %90, %130 : vector<128x128xf32>
    %132 = vector.broadcast %115 : vector<128x1xf32> to vector<128x128xf32>
    %133 = arith.mulf %131, %132 : vector<128x128xf32>
    %c0_55 = arith.constant 0 : index
    %c0_56 = arith.constant 0 : index
    %134 = vector.load %arg10[%c0_55, %c0_56] : memref<1x128xf32, #tpu.memory_space<vmem>>, vector<1x128xf32>
    %135 = vector.shape_cast %134 : vector<1x128xf32> to vector<128xf32>
    %136 = vector.shape_cast %135 : vector<128xf32> to vector<1x128xf32>
    %137 = vector.broadcast %136 : vector<1x128xf32> to vector<128x128xf32>
    %138 = arith.mulf %133, %137 : vector<128x128xf32>
    %c0_57 = arith.constant 0 : index
    %c0_58 = arith.constant 0 : index
    %139 = vector.load %arg11[%c0_57, %c0_58] : memref<1x128xf32, #tpu.memory_space<vmem>>, vector<1x128xf32>
    %140 = vector.shape_cast %139 : vector<1x128xf32> to vector<128xf32>
    %141 = vector.shape_cast %140 : vector<128xf32> to vector<1x128xf32>
    %142 = vector.broadcast %141 : vector<1x128xf32> to vector<128x128xf32>
    %143 = arith.addf %138, %142 : vector<128x128xf32>
    %144 = arith.truncf %129 : vector<128x128xf32> to vector<128x128xbf16>
    %c0_59 = arith.constant 0 : index
    %c0_60 = arith.constant 0 : index
    %145 = vector.load %arg12[%c0_59, %c0_60] : memref<128x128xbf16, #tpu.memory_space<vmem>>, vector<128x128xbf16>
    %cst_61 = arith.constant dense<0.000000e+00> : vector<128x128xf32>
    %146 = tpu.matmul %144, %145, %cst_61 {dimension_numbers = #tpu.dot_dimension_numbers<[1], [0], [0], [1], [0, 0, 1, 1], [], []>} : vector<128x128xbf16>, vector<128x128xbf16>, vector<128x128xf32> -> vector<128x128xf32>
    %147 = arith.truncf %143 : vector<128x128xf32> to vector<128x128xbf16>
    %c0_62 = arith.constant 0 : index
    %c0_63 = arith.constant 0 : index
    %148 = vector.load %arg13[%c0_62, %c0_63] : memref<128x128xbf16, #tpu.memory_space<vmem>>, vector<128x128xbf16>
    %cst_64 = arith.constant dense<0.000000e+00> : vector<128x128xf32>
    %149 = tpu.matmul %147, %148, %cst_64 {dimension_numbers = #tpu.dot_dimension_numbers<[1], [0], [0], [1], [0, 0, 1, 1], [], []>} : vector<128x128xbf16>, vector<128x128xbf16>, vector<128x128xf32> -> vector<128x128xf32>
    %150 = arith.addf %146, %149 : vector<128x128xf32>
    %c0_65 = arith.constant 0 : index
    %c0_66 = arith.constant 0 : index
    %151 = vector.load %arg14[%c0_65, %c0_66] : memref<1x128xf32, #tpu.memory_space<vmem>>, vector<1x128xf32>
    %152 = vector.shape_cast %151 : vector<1x128xf32> to vector<128xf32>
    %153 = vector.shape_cast %152 : vector<128xf32> to vector<1x128xf32>
    %154 = vector.broadcast %153 : vector<1x128xf32> to vector<128x128xf32>
    %155 = arith.addf %150, %154 : vector<128x128xf32>
    %cst_67 = arith.constant 5.000000e-01 : f32
    %156 = vector.broadcast %cst_67 : f32 to vector<128x128xf32>
    %157 = arith.mulf %156, %155 : vector<128x128xf32>
    %cst_68 = arith.constant 0.707106769 : f32
    %158 = vector.broadcast %cst_68 : f32 to vector<128x128xf32>
    %159 = arith.mulf %155, %158 : vector<128x128xf32>
    %160 = math.erf %159 : vector<128x128xf32>
    %cst_69 = arith.constant 1.000000e+00 : f32
    %161 = vector.broadcast %cst_69 : f32 to vector<128x128xf32>
    %162 = arith.addf %161, %160 : vector<128x128xf32>
    %163 = arith.mulf %157, %162 : vector<128x128xf32>
    %164 = arith.truncf %163 : vector<128x128xf32> to vector<128x128xbf16>
    %c0_70 = arith.constant 0 : index
    %c0_71 = arith.constant 0 : index
    %165 = vector.load %arg15[%c0_70, %c0_71] : memref<128x128xbf16, #tpu.memory_space<vmem>>, vector<128x128xbf16>
    %cst_72 = arith.constant dense<0.000000e+00> : vector<128x128xf32>
    %166 = tpu.matmul %164, %165, %cst_72 {dimension_numbers = #tpu.dot_dimension_numbers<[1], [0], [0], [1], [0, 0, 1, 1], [], []>} : vector<128x128xbf16>, vector<128x128xbf16>, vector<128x128xf32> -> vector<128x128xf32>
    %c0_73 = arith.constant 0 : index
    %c0_74 = arith.constant 0 : index
    %167 = vector.load %arg16[%c0_73, %c0_74] : memref<1x128xf32, #tpu.memory_space<vmem>>, vector<1x128xf32>
    %168 = vector.shape_cast %167 : vector<1x128xf32> to vector<128xf32>
    %169 = vector.shape_cast %168 : vector<128xf32> to vector<1x128xf32>
    %170 = vector.broadcast %169 : vector<1x128xf32> to vector<128x128xf32>
    %171 = arith.addf %166, %170 : vector<128x128xf32>
    %172 = arith.addf %92, %171 : vector<128x128xf32>
    %173 = vector.shape_cast %172 : vector<128x128xf32> to vector<8x16x128xf32>
    %c0_75 = arith.constant 0 : index
    %c0_76 = arith.constant 0 : index
    %c0_77 = arith.constant 0 : index
    %c0_78 = arith.constant 0 : index
    %174 = vector.load %arg17[%c0_75, %c0_76, %c0_77, %c0_78] : memref<1x8x16x128xf32, #tpu.memory_space<vmem>>, vector<1x8x16x128xf32>
    %175 = vector.shape_cast %174 : vector<1x8x16x128xf32> to vector<8x16x128xf32>
    %176 = vector.shape_cast %173 : vector<8x16x128xf32> to vector<1x8x16x128xf32>
    tpu.vector_store %arg17[%c0_75, %c0_76, %c0_77, %c0_78], %176 {strides = array<i32>} : memref<1x8x16x128xf32, #tpu.memory_space<vmem>>, vector<1x8x16x128xf32>,
    return
  }
  func.func @transform_0(%arg0: i32, %arg1: i32) -> (i32, i32, i32, i32, i32) {
    %c0_i32 = arith.constant 0 : i32
    %c0_i32_0 = arith.constant 0 : i32
    %c0_i32_1 = arith.constant 0 : i32
    %c0_i32_2 = arith.constant 0 : i32
    return %arg0, %arg1, %c0_i32, %c0_i32_0, %c0_i32_1 : i32, i32, i32, i32, i32
  }
  func.func @transform_1(%arg0: i32, %arg1: i32) -> (i32, i32, i32, i32) {
    %c0_i32 = arith.constant 0 : i32
    %c0_i32_0 = arith.constant 0 : i32
    %c0_i32_1 = arith.constant 0 : i32
    return %arg0, %arg1, %c0_i32, %c0_i32_0 : i32, i32, i32, i32
  }
  func.func @transform_2(%arg0: i32, %arg1: i32) -> (i32, i32, i32) {
    %c0_i32 = arith.constant 0 : i32
    %c0_i32_0 = arith.constant 0 : i32
    %c0_i32_1 = arith.constant 0 : i32
    %c0_i32_2 = arith.constant 0 : i32
    return %c0_i32, %c0_i32_0, %c0_i32_1 : i32, i32, i32
  }
  func.func @transform_3(%arg0: i32, %arg1: i32) -> (i32, i32) {
    %c0_i32 = arith.constant 0 : i32
    %c0_i32_0 = arith.constant 0 : i32
    %c0_i32_1 = arith.constant 0 : i32
    return %c0_i32, %c0_i32_0 : i32, i32
  }
  func.func @transform_4(%arg0: i32, %arg1: i32) -> (i32, i32) {
    %c0_i32 = arith.constant 0 : i32
    %c0_i32_0 = arith.constant 0 : i32
    %c0_i32_1 = arith.constant 0 : i32
    return %c0_i32, %c0_i32_0 : i32, i32
  }
  func.func @transform_5(%arg0: i32, %arg1: i32) -> (i32, i32) {
    %c0_i32 = arith.constant 0 : i32
    %c0_i32_0 = arith.constant 0 : i32
    %c0_i32_1 = arith.constant 0 : i32
    return %c0_i32, %c0_i32_0 : i32, i32
  }
  func.func @transform_6(%arg0: i32, %arg1: i32) -> (i32, i32) {
    %c0_i32 = arith.constant 0 : i32
    %c0_i32_0 = arith.constant 0 : i32
    %c0_i32_1 = arith.constant 0 : i32
    return %c0_i32, %c0_i32_0 : i32, i32
  }
  func.func @transform_7(%arg0: i32, %arg1: i32) -> (i32, i32) {
    %c0_i32 = arith.constant 0 : i32
    %c0_i32_0 = arith.constant 0 : i32
    %c0_i32_1 = arith.constant 0 : i32
    return %c0_i32, %c0_i32_0 : i32, i32
  }
  func.func @transform_8(%arg0: i32, %arg1: i32) -> (i32, i32) {
    %c0_i32 = arith.constant 0 : i32
    %c0_i32_0 = arith.constant 0 : i32
    %c0_i32_1 = arith.constant 0 : i32
    return %c0_i32, %c0_i32_0 : i32, i32
  }
  func.func @transform_9(%arg0: i32, %arg1: i32) -> (i32, i32) {
    %c0_i32 = arith.constant 0 : i32
    %c0_i32_0 = arith.constant 0 : i32
    %c0_i32_1 = arith.constant 0 : i32
    return %c0_i32, %c0_i32_0 : i32, i32
  }
  func.func @transform_10(%arg0: i32, %arg1: i32) -> (i32, i32) {
    %c0_i32 = arith.constant 0 : i32
    %c0_i32_0 = arith.constant 0 : i32
    %c0_i32_1 = arith.constant 0 : i32
    return %c0_i32, %c0_i32_0 : i32, i32
  }
  func.func @transform_11(%arg0: i32, %arg1: i32) -> (i32, i32) {
    %c0_i32 = arith.constant 0 : i32
    %c0_i32_0 = arith.constant 0 : i32
    %c0_i32_1 = arith.constant 0 : i32
    return %c0_i32, %c0_i32_0 : i32, i32
  }
  func.func @transform_12(%arg0: i32, %arg1: i32) -> (i32, i32) {
    %c0_i32 = arith.constant 0 : i32
    %c0_i32_0 = arith.constant 0 : i32
    %c0_i32_1 = arith.constant 0 : i32
    return %c0_i32, %c0_i32_0 : i32, i32
  }
  func.func @transform_13(%arg0: i32, %arg1: i32) -> (i32, i32) {
    %c0_i32 = arith.constant 0 : i32
    %c0_i32_0 = arith.constant 0 : i32
    %c0_i32_1 = arith.constant 0 : i32
    return %c0_i32, %c0_i32_0 : i32, i32
  }
  func.func @transform_14(%arg0: i32, %arg1: i32) -> (i32, i32) {
    %c0_i32 = arith.constant 0 : i32
    %c0_i32_0 = arith.constant 0 : i32
    %c0_i32_1 = arith.constant 0 : i32
    return %c0_i32, %c0_i32_0 : i32, i32
  }
  func.func @transform_15(%arg0: i32, %arg1: i32) -> (i32, i32, i32, i32) {
    %c0_i32 = arith.constant 0 : i32
    %c0_i32_0 = arith.constant 0 : i32
    %c0_i32_1 = arith.constant 0 : i32
    return %arg0, %arg1, %c0_i32, %c0_i32_0 : i32, i32, i32, i32
  }
}

</mosaic_0001>

<bundles_post_ra>
// kernel: multi_branch_block.2
= control target key start
LH: loop header
LB: loop body
LE: loop exit
PB: predicated region body
PF: predicated region fallthrough
CT: control target
= control target key end

     0   :  { %s3602_s24 = smov 0   ;;  %s3604_s25 = smov 0   ;;  %s4557_s0 = inlined_call_operand.vmem [shape: f32[2,16,16,128], index: 0, kind: input, shape index: {}]   ;;  %s4558_s1 = inlined_call_operand.vmem [shape: f32[1,128], index: 1, kind: input, shape index: {}]   ;;  %s4559_s2 = inlined_call_operand.vmem [shape: f32[1,128], index: 2, kind: input, shape index: {}]   ;;  %s4560_s3 = inlined_call_operand.vmem [shape: bf16[128,384], index: 3, kind: input, shape index: {}]   ;;  %s4561_s4 = inlined_call_operand.vmem [shape: f32[1,384], index: 4, kind: input, shape index: {}]   ;;  %s4562_s5 = inlined_call_operand.vmem [shape: bf16[128,128], index: 5, kind: input, shape index: {}]   ;;  %s4563_s6 = inlined_call_operand.vmem [shape: f32[1,128], index: 6, kind: input, shape index: {}]   ;;  %s4564_s7 = inlined_call_operand.vmem [shape: f32[2,16,16,128], index: 7, kind: output, shape index: {}]  }
   0x1   :  { %s3606_s26 = smov 0   ;;  %s3608_s27 = smov 0  }
   0x2   :  { %s3610_s28 = smov 0   ;;  %s3612_s29 = smov 0  }
   0x3   :  { %s3614_s30 = smov 0   ;;  %s3616_s8 = smov 0  }
   0x4   :  { %s3618_s9 = smov 0  }
   0x5 LB: > { %s29_s10 = sadd.s32 1, %s3544_s29  ;;  %s32_s11 = sadd.s32 1, %s3548_s30  ;;  %s3556_s9 = sphi %s3618_s9, %s17_s9   ;;  %s3552_s8 = sphi %s3616_s8, %s4580_s8   ;;  %s3548_s30 = sphi %s3614_s30, %s4579_s30   ;;  %s3544_s29 = sphi %s3612_s29, %s4578_s29   ;;  %s3540_s28 = sphi %s3610_s28, %s4577_s28   ;;  %s3536_s27 = sphi %s3608_s27, %s4576_s27   ;;  %s3532_s26 = sphi %s3606_s26, %s4575_s26   ;;  %s3528_s25 = sphi %s3604_s25, %s4574_s25   ;;  %s3524_s24 = sphi %s3602_s24, %s4573_s24  }
   0x6   : > { %p30_p0 = scmp.ge.s32.totalorder %s29_s10, 2  ;;  %s2618_s12 = sadd.s32 4294967295, %s3556_s9  }
   0x7   : > { %s36_s13 = sadd.s32 1, %s3552_s8  ;;  %p54_p1 = scmp.ne.s32.totalorder %s3528_s25, %s3524_s24 }
   0x8   : > { %s4582_s10 = smov (%p30_p0, %s29_s10), 0  ;;  %s4584_s11 = smov (!%p30_p0, %s32_s11), %s3548_s30 }
   0x9   : > { %p34_p2 = scmp.ge.s32.totalorder %s4584_s11, 2  ;;  %p55_p3 = scmp.eq.s32.totalorder %s3556_s9, 0 }
   0xa   : > { %p214_p4 = scmp.eq.s32.totalorder %s2618_s12, 7  ;;  %s43_s17 = ssub.s32 %s3544_s29, %s4582_s10 }
   0xb   : > { %s4586_s11 = smov (%p34_p2, %s4584_s11), 0  ;;  %s4588_s13 = smov (!%p34_p2, %s36_s13), %s3552_s8 }
   0xc   : > { %4567 = sst [smem:[#allocation4_spill]] %s4586_s11  ;;  %p3660_p5 = por %p55_p3, %p54_p1 }
   0xd   : > { %p38_p6 = scmp.ge.s32.totalorder %s4588_s13, 2  ;;  %p3664_p7 = por %p214_p4, %p54_p1 }
   0xe   : > { %s41_s16 = ssub.s32 %s3548_s30, %s4586_s11  ;;  %s47_s21 = sadd.s32 1, %s3528_s25 }
   0xf   : > { %s4590_s13 = smov (%p38_p6, %s4588_s13), 0  ;;  %p2621_p9 = scmp.ge.s32.totalorder %s3556_s9, 8 }
  0x10   : > { %4570 = sst [smem:[#allocation5_spill]] %s4590_s13  ;;  %s40_s18 = ssub.s32 %s3552_s8, %s4590_s13 }
  0x11   : > { %s42_s19 = sor.u32 %s41_s16, %s40_s18  ;;  %254 = sbr.rel (%p2621_p9) target bundleno = 35 (0x23), region = 40 }
  0x12   : > { %s44_s20 = sor.u32 %s43_s17, %s42_s19 }
  0x13   : > { %p45_p8 = scmp.eq.s32.totalorder %s44_s20, 0 }
  0x15   : > { %s3678_s22 = scalar_select %p45_p8, %s3528_s25, %s47_s21  }
  0x18   : > { %257 = sbr.rel (!%p3660_p5) target bundleno = 35 (0x23), region = 44  ;;  %s259_s23 = sand.u32 (%p3660_p5), 1, %s3528_s25  }
  0x19   : > { %s2704_s12 = sshll.u32 (%p3660_p5), %s3548_s30, 4  ;;  %s2622_s11 = sshll.u32 (%p3660_p5), %s259_s23, 6 }
  0x1a   : > { %s264_s13 = sadd.s32 (%p3660_p5), %s3544_s29, %s2704_s12  ;;  %s2625_s16 = sshll.u32 (%p3660_p5), %s3552_s8, 5 }
  0x1b   : > { %s266_s17 = sadd.s32 (%p3660_p5), %s2625_s16, %s264_s13  ;;  %s261_s14 = scalar_lea.vmem (%p3660_p5), [#allocation2], %s2622_s11 }
  0x1c   : > { %s2626_s18 = sshll.u32 (%p3660_p5), %s266_s17, 3 }
  0x1d   : > { %s268_s21 = scalar_lea.vmem (%p3660_p5), %s4557_s0, %s2626_s18 }
  0x1e   : > { %v310_v0 = vld [vmem:[%s268_s21] sm:$0xff] (%p3660_p5)  ;;  %v312_v1 = vld [vmem:[%s268_s21 + $0x10] sm:$0xff] (%p3660_p5) }
  0x1f   : > { %v314_v2 = vld [vmem:[%s268_s21 + $0x20] sm:$0xff]  ;;  %311 = vst [vmem:[%s261_s14] sm:$0xff] %v310_v0  ;;  %313 = vst [vmem:[%s261_s14 + $0x8] sm:$0xff] %v312_v1  ;;  %v316_v3 = vld [vmem:[%s268_s21 + $0x30] sm:$0xff] }
  0x20   : > { %315 = vst [vmem:[%s261_s14 + $0x10] sm:$0xff] %v314_v2  ;;  %v318_v4 = vld [vmem:[%s268_s21 + $0x40] sm:$0xff]  ;;  %v320_v5 = vld [vmem:[%s268_s21 + $0x50] sm:$0xff]  ;;  %317 = vst [vmem:[%s261_s14 + $0x18] sm:$0xff] %v316_v3 }
  0x21   : > { %319 = vst [vmem:[%s261_s14 + $0x20] sm:$0xff] %v318_v4  ;;  %321 = vst [vmem:[%s261_s14 + $0x28] sm:$0xff] %v320_v5  ;;  %v322_v6 = vld [vmem:[%s268_s21 + $0x60] sm:$0xff]  ;;  %v324_v7 = vld [vmem:[%s268_s21 + $0x70] sm:$0xff] }
  0x22   : > { %323 = vst [vmem:[%s261_s14 + $0x30] sm:$0xff] %v322_v6  ;;  %325 = vst [vmem:[%s261_s14 + $0x38] sm:$0xff] %v324_v7 }
  0x23 PF: > { %p2627_p10 = scmp.ge.s32.totalorder %s3556_s9, 1  ;;  %p330_p11 = scmp.lt.s32.totalorder %s3556_s9, 9 }
  0x25   : > { %p331_p12 = pnand %p2627_p10, %p330_p11 }
  0x26   : > { %s337_s11 = sand.u32 (!%p331_p12), 1, %s3524_s24   ;;  %v3302_v17 = vld [vmem:[%s4560_s3 + $0x4] ss:$12 sps:$4 sm:$0xff] (!%p331_p12)   ;;  %v3304_v18 = vld [vmem:[%s4560_s3] ss:$12 sps:$4 sm:$0xff] (!%p331_p12)   ;;  %v3558_v47 = vmov (!%p331_p12), 0  }
  0x27   : > { %334 = sbr.rel (%p331_p12) target bundleno = 1762 (0x6e2), region = 82  ;;  %s3693_s13 = sshll.u32 (!%p331_p12), %s337_s11, 6  ;;  %701 = vmatprep.subr.bf16.mxu0 (!%p331_p12), %v3302_v17  ;;  %v3305_v21 = vld [vmem:[%s4560_s3 + $0x1c] ss:$12 sps:$4 sm:$0xff] (!%p331_p12)   ;;  %v3307_v23 = vld [vmem:[%s4560_s3 + $0x18] ss:$12 sps:$4 sm:$0xff] (!%p331_p12)   ;;  %733 = vmatprep.mubr.bf16.mxu0 (!%p331_p12), %v3558_v47 }
  0x28   : > { %s3696_s23 = scalar_lea.vmem (!%p331_p12), [#allocation2], %s3693_s13  ;;  %702 = vmatpush1.bf16.msra.mxu0 (!%p331_p12), %v3304_v18  ;;  %v3308_v25 = vld [vmem:[%s4560_s3 + $0x34] ss:$12 sps:$4 sm:$0xff] (!%p331_p12)   ;;  %v3311_v28 = vld [vmem:[%s4560_s3 + $0x30] ss:$12 sps:$4 sm:$0xff] (!%p331_p12)   ;;  %vm1127_vm0 = vcmask (!%p331_p12), 261120  }
  0x29   : > { %v3699_v8 = vld [vmem:[%s3696_s23] sm:$0xff] (!%p331_p12)  ;;  %v3702_v9 = vld [vmem:[%s3696_s23 + $0x8] sm:$0xff] (!%p331_p12)  ;;  %v3710_v12 = vld [vmem:[%s3696_s23 + $0x10] sm:$0xff] (!%p331_p12)  ;;  %703 = vmatprep.subr.bf16.mxu0 (!%p331_p12), %v3305_v21  ;;  %s3559_s24 = smov (!%p331_p12), 96   ;;  %s3560_s12 = smov (!%p331_p12), 64   ;;  %vm1516_vm1 = vcmask (!%p331_p12), 523264  }
  0x2a   : > { %378 = vadd.xlane.f32.xlu0 (!%p331_p12), %v3699_v8  ;;  %v394_v10 = vmul.f32 (!%p331_p12), %v3699_v8, %v3699_v8  ;;  %v395_v11 = vmul.f32 (!%p331_p12), %v3702_v9, %v3702_v9  ;;  %v3714_v13 = vld [vmem:[%s3696_s23 + $0x18] sm:$0xff] (!%p331_p12)  ;;  %v396_v14 = vmul.f32 (!%p331_p12), %v3710_v12, %v3710_v12  ;;  %v3723_v16 = vld [vmem:[%s3696_s23 + $0x20] sm:$0xff] (!%p331_p12)  ;;  %v3732_v19 = vld [vmem:[%s3696_s23 + $0x28] sm:$0xff] (!%p331_p12)  ;;  %s3561_s16 = smov (!%p331_p12), 32   ;;  %vm2305_vm2 = vcmask (!%p331_p12), 785408  }
  0x2b   : > { %v397_v15 = vmul.f32 (!%p331_p12), %v3714_v13, %v3714_v13  ;;  %v398_v20 = vmul.f32 (!%p331_p12), %v3723_v16, %v3723_v16  ;;  %v399_v22 = vmul.f32 (!%p331_p12), %v3732_v19, %v3732_v19  ;;  %v3747_v24 = vld [vmem:[%s3696_s23 + $0x30] sm:$0xff] (!%p331_p12)  ;;  %v3756_v27 = vld [vmem:[%s3696_s23 + $0x38] sm:$0xff] (!%p331_p12)  ;;  %v3314_v32 = vld [vmem:[%s4560_s3 + $0x20] ss:$12 sps:$4 sm:$0xff] (!%p331_p12)  }
  0x2c   : > { %402 = vadd.xlane.f32.xlu1 (!%p331_p12), %v394_v10  ;;  %704 = vmatpush1.bf16.msra.mxu0 (!%p331_p12), %v3307_v23  ;;  %v3310_v26 = vld [vmem:[%s4560_s3 + $0x8] ss:$12 sps:$4 sm:$0xff] (!%p331_p12)   ;;  %v400_v29 = vmul.f32 (!%p331_p12), %v3747_v24, %v3747_v24  ;;  %v401_v30 = vmul.f32 (!%p331_p12), %v3756_v27, %v3756_v27  ;;  %v3312_v31 = vld [vmem:[%s4560_s3 + $0x4c] ss:$12 sps:$4 sm:$0xff] (!%p331_p12)   ;;  %v3316_v34 = vld [vmem:[%s4560_s3 + $0x64] ss:$12 sps:$4 sm:$0xff] (!%p331_p12)  }
  0x2d   : > { %705 = vmatprep.subr.bf16.mxu0 (!%p331_p12), %v3308_v25  ;;  %2794 = vmatprep.subr.bf16.mxu1 (!%p331_p12), %v3310_v26  ;;  %v3315_v33 = vld [vmem:[%s4560_s3 + $0x48] ss:$12 sps:$4 sm:$0xff] (!%p331_p12)   ;;  %v3318_v35 = vld [vmem:[%s4560_s3 + $0x38] ss:$12 sps:$4 sm:$0xff] (!%p331_p12)   ;;  %v3319_v36 = vld [vmem:[%s4560_s3 + $0x60] ss:$12 sps:$4 sm:$0xff] (!%p331_p12)  }
  0x2e   : > { %380 = vadd.xlane.f32.xlu0 %v3702_v9  ;;  %2795 = vmatpush3.bf16.msra.mxu1 %v3310_v26  ;;  %v3320_v37 = vld [vmem:[%s4560_s3 + $0x7c] ss:$12 sps:$4 sm:$0xff]   ;;  %v3323_v39 = vld [vmem:[%s4560_s3 + $0x78] ss:$12 sps:$4 sm:$0xff]   ;;  %v3324_v40 = vld [vmem:[%s4560_s3 + $0x94] ss:$12 sps:$4 sm:$0xff]  }
  0x2f   : > { %2796 = vmatprep.subr.bf16.mxu1 %v3314_v32  ;;  %v3322_v38 = vld [vmem:[%s4560_s3 + $0x50] ss:$12 sps:$4 sm:$0xff]   ;;  %v3326_v41 = vld [vmem:[%s4560_s3 + $0x68] ss:$12 sps:$4 sm:$0xff]   ;;  %v3328_v43 = vld [vmem:[%s4560_s3 + $0xac] ss:$12 sps:$4 sm:$0xff]  }
  0x30   : > { %404 = vadd.xlane.f32.xlu1 %v395_v11  ;;  %706 = vmatpush1.bf16.msra.mxu0 %v3311_v28  ;;  %v3327_v42 = vld [vmem:[%s4560_s3 + $0x90] ss:$12 sps:$4 sm:$0xff]   ;;  %v3330_v44 = vld [vmem:[%s4560_s3 + $0x80] ss:$12 sps:$4 sm:$0xff]   ;;  %v3331_v45 = vld [vmem:[%s4560_s3 + $0xa8] ss:$12 sps:$4 sm:$0xff]  }
  0x31   : > { %707 = vmatprep.subr.bf16.mxu0 %v3312_v31  ;;  %v3332_v46 = vld [vmem:[%s4560_s3 + $0x98] ss:$12 sps:$4 sm:$0xff]   ;;  %v3333_v48 = vld [vmem:[%s4560_s3 + $0xb0] ss:$12 sps:$4 sm:$0xff]   ;;  %s2700_s17 = sshll.u32 (%p3664_p7), %s3540_s28, 5 }
  0x32   : > { %382 = vadd.xlane.f32.xlu0 %v3710_v12  ;;  %2797 = vmatpush3.bf16.msra.mxu1 %v3314_v32 }
  0x33   : > { %2798 = vmatprep.subr.bf16.mxu1 %v3318_v35 }
  0x34   : > { %384 = vadd.xlane.f32.xlu1 %v3714_v13  ;;  %708 = vmatpush1.bf16.msra.mxu0 %v3315_v33 }
  0x35   : > { %709 = vmatprep.subr.bf16.mxu0 %v3316_v34 }
  0x36   : > { %406 = vadd.xlane.f32.xlu0 %v396_v14  ;;  %2799 = vmatpush3.bf16.msra.mxu1 %v3318_v35 }
  0x37   : > { %2800 = vmatprep.subr.bf16.mxu1 %v3322_v38 }
  0x38   : > { %408 = vadd.xlane.f32.xlu1 %v397_v15  ;;  %710 = vmatpush1.bf16.msra.mxu0 %v3319_v36 }
  0x39   : > { %711 = vmatprep.subr.bf16.mxu0 %v3320_v37 }
  0x3a   : > { %386 = vadd.xlane.f32.xlu0 %v3723_v16  ;;  %2801 = vmatpush3.bf16.msra.mxu1 %v3322_v38 }
  0x3b   : > { %2802 = vmatprep.subr.bf16.mxu1 %v3326_v41 }
  0x3c   : > { %388 = vadd.xlane.f32.xlu1 %v3732_v19  ;;  %712 = vmatpush1.bf16.msra.mxu0 %v3323_v39  ;;  %v3839_v39 = vld [vmem:[%s4558_s1] ss:$0 sm:$0xff] }
  0x3d   : > { %713 = vmatprep.subr.bf16.mxu0 %v3324_v40 }
  0x3e   : > { %410 = vadd.xlane.f32.xlu0 %v398_v20  ;;  %2803 = vmatpush3.bf16.msra.mxu1 %v3326_v41 }
  0x3f   : > { %2804 = vmatprep.subr.bf16.mxu1 %v3330_v44 }
  0x40   : > { %412 = vadd.xlane.f32.xlu1 %v399_v22  ;;  %714 = vmatpush1.bf16.msra.mxu0 %v3327_v42 }
  0x41   : > { %715 = vmatprep.subr.bf16.mxu0 %v3328_v43 }
  0x42   : > { %390 = vadd.xlane.f32.xlu0 %v3747_v24  ;;  %2805 = vmatpush3.bf16.msra.mxu1 %v3330_v44 }
  0x43   : > { %2806 = vmatprep.subr.bf16.mxu1 %v3332_v46 }
  0x44   : > { %392 = vadd.xlane.f32.xlu1 %v3756_v27  ;;  %716 = vmatpush1.bf16.msra.mxu0 %v3331_v45 }
  0x46   : > { %414 = vadd.xlane.f32.xlu0 %v400_v29  ;;  %2807 = vmatpush3.bf16.msra.mxu1 %v3332_v46 }
  0x47   : > { %2808 = vmatprep.subr.bf16.mxu1 %v3333_v48 }
  0x48   : > { %416 = vadd.xlane.f32.xlu1 %v401_v30 }
  0x4a   : > { %2809 = vmatpush3.bf16.msra.mxu1 %v3333_v48 }
  0xb7   : > { %v379_v49 = vpop.xlane.xlu0 %378 }
  0xb8   : > { %v418_v50 = vmul.f32 0.03125, %v379_v49 }
  0xb9   : > { %v403_v51 = vpop.xlane.xlu1 %402 }
  0xba   : > { %v434_v52 = vmul.f32 %v418_v50, %v418_v50  ;;  %v426_v53 = vmul.f32 0.03125, %v403_v51  ;;  %v458_v28 = vsub.f32 %v3699_v8, %v418_v50 }
  0xbb   : > { %v381_v54 = vpop.xlane.xlu0 %380 }
  0xbc   : > { %v442_v55 = vsub.f32 %v426_v53, %v434_v52  ;;  %v419_v56 = vmul.f32 0.03125, %v381_v54  ;;  %v2631_v52 = vld [vmem:[%s4559_s2] ss:$0 sm:$0xff] }
  0xbd   : > { %v405_v57 = vpop.xlane.xlu1 %404 }
  0xbe   : > { %v450_v58 = vmax.f32 %v442_v55, 0.0  ;;  %v435_v59 = vmul.f32 %v419_v56, %v419_v56  ;;  %v427_v60 = vmul.f32 0.03125, %v405_v57  ;;  %v459_v8 = vsub.f32 %v3702_v9, %v419_v56 }
  0xbf   : > { %v383_v61 = vpop.xlane.xlu0 %382 }
  0xc0   : > { %v466_v62 = vadd.f32 1e-05, %v450_v58  ;;  %v443_v63 = vsub.f32 %v427_v60, %v435_v59  ;;  %v3819_v0 = vmul.f32 0.03125, %v383_v61 }
  0xc1   : > { %v385_v1 = vpop.xlane.xlu1 %384 }
  0xc2   : > { %3342 = vrsqrt.f32 %v466_v62  ;;  %v451_v2 = vmax.f32 %v443_v63, 0.0  ;;  %v436_v3 = vmul.f32 %v3819_v0, %v3819_v0  ;;  %v3823_v4 = vmul.f32 0.03125, %v385_v1 }
  0xc3   : > { %v407_v5 = vpop.xlane.xlu0 %406  ;;  %v460_v57 = vsub.f32 %v3710_v12, %v3819_v0 }
  0xc4   : > { %v467_v6 = vadd.f32 1e-05, %v451_v2  ;;  %v428_v7 = vmul.f32 0.03125, %v407_v5  ;;  %v437_v11 = vmul.f32 %v3823_v4, %v3823_v4  ;;  %v461_v2 = vsub.f32 %v3714_v13, %v3823_v4 }
  0xc5   : > { %v409_v10 = vpop.xlane.xlu1 %408 }
  0xc6   : > { %3344 = vrsqrt.f32 %v467_v6  ;;  %v444_v14 = vsub.f32 %v428_v7, %v436_v3  ;;  %v429_v15 = vmul.f32 0.03125, %v409_v10 }
  0xc7   : > { %v387_v17 = vpop.xlane.xlu0 %386 }
  0xc8   : > { %v452_v18 = vmax.f32 %v444_v14, 0.0  ;;  %v445_v20 = vsub.f32 %v429_v15, %v437_v11  ;;  %v3827_v21 = vmul.f32 0.03125, %v387_v17 }
  0xc9   : > { %v389_v22 = vpop.xlane.xlu1 %388 }
  0xca   : > { %v468_v23 = vadd.f32 1e-05, %v452_v18  ;;  %v453_v25 = vmax.f32 %v445_v20, 0.0  ;;  %v438_v26 = vmul.f32 %v3827_v21, %v3827_v21  ;;  %v3832_v29 = vmul.f32 0.03125, %v389_v22 }
  0xcb   : > { %v411_v30 = vpop.xlane.xlu0 %410  ;;  %v462_v13 = vsub.f32 %v3723_v16, %v3827_v21 }
  0xcc   : > { %v3343_v31 = vpop.eup %3342  ;;  %3346 = vrsqrt.f32 %v468_v23  ;;  %v469_v32 = vadd.f32 1e-05, %v453_v25  ;;  %v430_v33 = vmul.f32 0.03125, %v411_v30  ;;  %v439_v36 = vmul.f32 %v3832_v29, %v3832_v29 }
  0xcd   : > { %v413_v34 = vpop.xlane.xlu1 %412  ;;  %v482_v35 = vmul.f32 %v3343_v31, %v458_v28  ;;  %v463_v22 = vsub.f32 %v3732_v19, %v3832_v29 }
  0xce   : > { %3348 = vrsqrt.f32 %v469_v32  ;;  %v446_v37 = vsub.f32 %v430_v33, %v438_v26  ;;  %v431_v38 = vmul.f32 0.03125, %v413_v34 }
  0xcf   : > { %v391_v40 = vpop.xlane.xlu0 %390  ;;  %v497_v48 = vmul.f32 %v3839_v39, %v482_v35 }
  0xd0   : > { %v3345_v41 = vpop.eup %3344  ;;  %v454_v42 = vmax.f32 %v446_v37, 0.0  ;;  %v447_v43 = vsub.f32 %v431_v38, %v439_v36  ;;  %v424_v44 = vmul.f32 0.03125, %v391_v40 }
  0xd1   : > { %v393_v45 = vpop.xlane.xlu1 %392  ;;  %v483_v46 = vmul.f32 %v3345_v41, %v459_v8  ;;  %v512_v59 = vadd.f32 %v2631_v52, %v497_v48  ;;  %v558_v41 = vlaneseq }
  0xd2   : > { %v470_v49 = vadd.f32 1e-05, %v454_v42  ;;  %v455_v50 = vmax.f32 %v447_v43, 0.0  ;;  %v440_v51 = vmul.f32 %v424_v44, %v424_v44  ;;  %v425_v53 = vmul.f32 0.03125, %v393_v45  ;;  %v556_v43 = vld [vmem:[%s4561_s4] sm:$0x7] }
  0xd3   : > { %v415_v54 = vpop.xlane.xlu0 %414  ;;  %v498_v9 = vmul.f32 %v3839_v39, %v483_v46  ;;  %v464_v16 = vsub.f32 %v3747_v24, %v424_v44  ;;  %v559_v42 = vshrl.u32 %v558_v41, 7 }
  0xd4   : > { %3350 = vrsqrt.f32 %v470_v49  ;;  %v471_v55 = vadd.f32 1e-05, %v455_v50  ;;  %v432_v56 = vmul.f32 0.03125, %v415_v54  ;;  %v441_v62 = vmul.f32 %v425_v53, %v425_v53 }
  0xd5   : > { %v417_v58 = vpop.xlane.xlu1 %416  ;;  %v513_v60 = vadd.f32 %v2631_v52, %v498_v9  ;;  %v465_v34 = vsub.f32 %v3756_v27, %v425_v53  ;;  %v560_v27 = vsub.s32 0, %v559_v42  ;;  %v564_v44 = vsub.s32 1, %v559_v42 }
  0xd6   : > { %v3347_v61 = vpop.eup %3346  ;;  %3352 = vrsqrt.f32 %v471_v55  ;;  %v448_v63 = vsub.f32 %v432_v56, %v440_v51  ;;  %v433_v1 = vmul.f32 0.03125, %v417_v58 }
  0xd7   : > { %v520_v3 = vpack.c.bf16 %v513_v60, %v512_v59  ;;  %v484_v5 = vmul.f32 %v3347_v61, %v460_v57  ;;  %v3869_v45 = vrot.slane %v556_v43, %v560_v27  ;;  %v3871_v48 = vrot.slane %v556_v43, %v564_v44 }
  0xd8   : > { %v3349_v6 = vpop.eup %3348  ;;  %v456_v7 = vmax.f32 %v448_v63, 0.0  ;;  %v449_v10 = vsub.f32 %v433_v1, %v441_v62 }
  0xd9   : > { %734 = vmatmul.mubr.bf16.vlgmr.msra.gmra.mrb[0].mxu0 %v520_v3  ;;  %2810 = vmatprep.mubr.bf16.mxu1 %v520_v3  ;;  %v485_v11 = vmul.f32 %v3349_v6, %v461_v2  ;;  %v499_v12 = vmul.f32 %v3839_v39, %v484_v5 }
  0xda   : > { %v472_v0 = vadd.f32 1e-05, %v456_v7  ;;  %v457_v14 = vmax.f32 %v449_v10, 0.0  ;;  %743 = vmatprep.mubr.bf16.mxu0 %v3558_v47 }
  0xdb   : > { %v500_v15 = vmul.f32 %v3839_v39, %v485_v11  ;;  %v514_v4 = vadd.f32 %v2631_v52, %v499_v12 }
  0xdc   : > { %3354 = vrsqrt.f32 %v472_v0  ;;  %v473_v17 = vadd.f32 1e-05, %v457_v14 }
  0xdd   : > { %v515_v18 = vadd.f32 %v2631_v52, %v500_v15 }
  0xde   : > { %v3351_v20 = vpop.eup %3350  ;;  %3356 = vrsqrt.f32 %v473_v17 }
  0xdf   : > { %v521_v23 = vpack.c.bf16 %v515_v18, %v514_v4  ;;  %v486_v25 = vmul.f32 %v3351_v20, %v462_v13 }
  0xe0   : > { %v3353_v26 = vpop.eup %3352 }
  0xe1   : > { %744 = vmatmul.mubr.bf16.gmra.mrb[4].mxu0 %v521_v23  ;;  %2811 = vmatmul.mubr.bf16.vlgmr.msra.gmra.mrb[0].mxu1 %v521_v23  ;;  %v487_v28 = vmul.f32 %v3353_v26, %v463_v22  ;;  %v501_v30 = vmul.f32 %v3839_v39, %v486_v25 }
  0xe2   : > { %753 = vmatprep.mubr.bf16.mxu0 %v3558_v47 }
  0xe3   : > { %v502_v31 = vmul.f32 %v3839_v39, %v487_v28  ;;  %v516_v21 = vadd.f32 %v2631_v52, %v501_v30 }
  0xe5   : > { %v517_v32 = vadd.f32 %v2631_v52, %v502_v31 }
  0xe6   : > { %v3355_v33 = vpop.eup %3354 }
  0xe7   : > { %v522_v19 = vpack.c.bf16 %v517_v32, %v516_v21  ;;  %v488_v29 = vmul.f32 %v3355_v33, %v464_v16 }
  0xe8   : > { %v3357_v35 = vpop.eup %3356 }
  0xe9   : > { %754 = vmatmul.mubr.bf16.gmra.mrb[8].mxu0 %v522_v19  ;;  %2814 = vmatprep.mubr.bf16.mxu1 %v522_v19  ;;  %v489_v36 = vmul.f32 %v3357_v35, %v465_v34  ;;  %v503_v37 = vmul.f32 %v3839_v39, %v488_v29 }
  0xea   : > { %763 = vmatprep.mubr.bf16.mxu0 %v3558_v47 }
  0xeb   : > { %v504_v38 = vmul.f32 %v3839_v39, %v489_v36  ;;  %v518_v8 = vadd.f32 %v2631_v52, %v503_v37 }
  0xed   : > { %v519_v40 = vadd.f32 %v2631_v52, %v504_v38  ;;  %v568_v52 = vsub.s32 2, %v559_v42 }
  0xef   : > { %v523_v24 = vpack.c.bf16 %v519_v40, %v518_v8  ;;  %v3880_v58 = vrot.slane %v556_v43, %v568_v52 }
  0xf1   : > { %764 = vmatmul.mubr.bf16.gmra.mrb[12].mxu0 %v523_v24  ;;  %2815 = vmatmul.mubr.bf16.gmra.mrb[4].mxu1 %v523_v24 }
 0x1ac   : > { %v735_v46 = vpop.f32.mrb[0].mxu0 }
 0x1ad   : > { %v737_v47 = vpop.f32.mrb[1].mxu0  ;;  %v736_v49 = vadd.f32 %v735_v46, %v3869_v45 }
 0x1ae   : > { %v739_v39 = vpop.f32.mrb[2].mxu0  ;;  %v738_v53 = vadd.f32 %v737_v47, %v3871_v48 }
 0x1af   : > { %v740_v50 = vadd.f32 %v739_v39, %v3869_v45  ;;  %v741_v51 = vpop.f32.mrb[3].mxu0 }
 0x1b0   : > { %v742_v54 = vadd.f32 %v741_v51, %v3871_v48 }
 0x1b1   : > { %v919_v9 = vpack.c.bf16 %v740_v50, %v736_v49  ;;  %v3877_v55 = vpack.i.bf16 %v740_v50, %v736_v49 }
 0x1b2   : > { %v3062_v56 = vpack.i.bf16 %v742_v54, %v738_v53  ;;  %v1015_v57 = vpack.c.bf16 %v742_v54, %v738_v53 }
 0x1b3   : > { %2826 = vmatprep.mubr.msk.bf16.mxu0 %vm1127_vm0, %v919_v9 }
 0x1b4   : > { %3063 = vrot.lane.b32.xlu0 %v3062_v56, %s3559_s24  ;;  %v745_v59 = vpop.f32.mrb[4].mxu0  ;;  %v2812_v60 = vpop.f32.mrb[0].mxu1  ;;  %2970 = vmatprep.subr.msk.bf16.mxu0 %vm1127_vm0, %v1015_v57  ;;  %v1141_v61 = vsel %vm1127_vm0, %v1015_v57, 0 }
 0x1b5   : > { %v747_v62 = vpop.f32.mrb[5].mxu0  ;;  %v808_v63 = vpop.f32.mrb[1].mxu1  ;;  %2819 = vmatpush3.bf16.xpose.msra.mxu0 %v1141_v61  ;;  %v3886_v3 = vadd.f32 %v745_v59, %v3869_v45  ;;  %v817_v5 = vadd.f32 %v2812_v60, %v3880_v58 }
 0x1b6   : > { %v749_v1 = vpop.f32.mrb[6].mxu0  ;;  %v2813_v2 = vpop.f32.mrb[2].mxu1  ;;  %v748_v12 = vadd.f32 %v747_v62, %v3871_v48  ;;  %v809_v0 = vadd.f32 %v808_v63, %v3880_v58 }
 0x1b7   : > { %v3890_v6 = vadd.f32 %v749_v1, %v3869_v45  ;;  %v820_v7 = vadd.f32 %v2813_v2, %v3880_v58  ;;  %v751_v10 = vpop.f32.mrb[7].mxu0  ;;  %v811_v11 = vpop.f32.mrb[3].mxu1 }
 0x1b8   : > { %v752_v14 = vadd.f32 %v751_v10, %v3871_v48  ;;  %v812_v15 = vadd.f32 %v811_v11, %v3880_v58  ;;  %3083 = vrot.lane.b32.xlu0 %v3062_v56, %s3560_s12 }
 0x1b9   : > { %v920_v17 = vpack.c.bf16 %v3890_v6, %v3886_v3  ;;  %v3902_v13 = vpack.i.bf16 %v3890_v6, %v3886_v3  ;;  %v3908_v22 = vpack.i.bf16 %v820_v7, %v817_v5  ;;  %v3917_v30 = vpack.c.bf16 %v820_v7, %v817_v5 }
 0x1ba   : > { %v3904_v4 = vpack.i.bf16 %v752_v14, %v748_v12  ;;  %v1016_v18 = vpack.c.bf16 %v752_v14, %v748_v12  ;;  %v3906_v20 = vpack.i.bf16 %v812_v15, %v809_v0  ;;  %v3914_v26 = vpack.c.bf16 %v812_v15, %v809_v0 }
 0x1bc   : > { %3093 = vrot.lane.b32.xlu0 %v3062_v56, %s3561_s16  ;;  %3068 = vrot.lane.b32.xlu1 %v3904_v4, %s3559_s24  ;;  %v755_v23 = vpop.f32.mrb[8].mxu0  ;;  %v1144_v25 = vsel %vm1127_vm0, %v1016_v18, 0 }
 0x1bd   : > { %2971 = vmatprep.subr.msk.bf16.mxu0 %vm1127_vm0, %v1016_v18  ;;  %v757_v28 = vpop.f32.mrb[9].mxu0  ;;  %v756_v16 = vadd.f32 %v755_v23, %v3869_v45 }
 0x1be   : > { %2821 = vmatpush3.bf16.xpose.msra.mxu0 %v1144_v25  ;;  %v759_v31 = vpop.f32.mrb[10].mxu0  ;;  %v758_v33 = vadd.f32 %v757_v28, %v3871_v48 }
 0x1bf   : > { %v760_v21 = vadd.f32 %v759_v31, %v3869_v45  ;;  %v761_v32 = vpop.f32.mrb[11].mxu0 }
 0x1c0   : > { %v762_v34 = vadd.f32 %v761_v32, %v3871_v48  ;;  %3103 = vrot.lane.b32.xlu0 %v3904_v4, %s3560_s12 }
 0x1c1   : > { %v3122_v19 = vpack.i.bf16 %v760_v21, %v756_v16  ;;  %v921_v29 = vpack.c.bf16 %v760_v21, %v756_v16 }
 0x1c2   : > { %v3112_v35 = vpack.i.bf16 %v762_v34, %v758_v33  ;;  %v1017_v36 = vpack.c.bf16 %v762_v34, %v758_v33 }
 0x1c4   : > { %3113 = vrot.lane.b32.xlu0 %v3112_v35, %s3560_s12  ;;  %3073 = vrot.lane.b32.xlu1 %v3112_v35, %s3559_s24  ;;  %v765_v37 = vpop.f32.mrb[12].mxu0  ;;  %v2816_v38 = vpop.f32.mrb[4].mxu1  ;;  %v1147_v8 = vsel %vm1127_vm0, %v1017_v36, 0 }
 0x1c5   : > { %2972 = vmatprep.subr.msk.bf16.mxu0 %vm1127_vm0, %v1017_v36  ;;  %v767_v40 = vpop.f32.mrb[13].mxu0  ;;  %v824_v24 = vpop.f32.mrb[5].mxu1  ;;  %v766_v27 = vadd.f32 %v765_v37, %v3869_v45  ;;  %v833_v43 = vadd.f32 %v2816_v38, %v3880_v58 }
 0x1c6   : > { %2823 = vmatpush3.bf16.xpose.msra.mxu0 %v1147_v8  ;;  %v769_v41 = vpop.f32.mrb[14].mxu0  ;;  %v2817_v42 = vpop.f32.mrb[6].mxu1  ;;  %v768_v49 = vadd.f32 %v767_v40, %v3871_v48  ;;  %v825_v50 = vadd.f32 %v824_v24, %v3880_v58 }
 0x1c7   : > { %v770_v44 = vadd.f32 %v769_v41, %v3869_v45  ;;  %v836_v46 = vadd.f32 %v2817_v42, %v3880_v58  ;;  %v771_v47 = vpop.f32.mrb[15].mxu0  ;;  %v827_v39 = vpop.f32.mrb[7].mxu1 }
 0x1c8   : > { %v772_v51 = vadd.f32 %v771_v47, %v3871_v48  ;;  %v828_v52 = vadd.f32 %v827_v39, %v3880_v58  ;;  %3123 = vrot.lane.b32.xlu0 %v3122_v19, %s3559_s24 }
 0x1c9   : > { %v3127_v53 = vpack.i.bf16 %v770_v44, %v766_v27  ;;  %v922_v54 = vpack.c.bf16 %v770_v44, %v766_v27  ;;  %v3940_v45 = vpack.i.bf16 %v836_v46, %v833_v43  ;;  %v3944_v60 = vpack.c.bf16 %v836_v46, %v833_v43 }
 0x1ca   : > { %v3077_v9 = vpack.i.bf16 %v772_v51, %v768_v49  ;;  %v1018_v56 = vpack.c.bf16 %v772_v51, %v768_v49  ;;  %v3938_v57 = vpack.i.bf16 %v828_v52, %v825_v50  ;;  %v3942_v59 = vpack.c.bf16 %v828_v52, %v825_v50 }
 0x1cc   : > { %3078 = vrot.lane.b32.xlu1 %v3077_v9, %s3559_s24  ;;  %2973 = vmatprep.subr.msk.bf16.mxu0 %vm1127_vm0, %v1018_v56  ;;  %v1150_v48 = vsel %vm1127_vm0, %v1018_v56, 0 }
 0x1cd   : > { %3128 = vrot.lane.b32.xlu0 %v3127_v53, %s3559_s24 }
 0x1ce   : > { %2825 = vmatpush3.bf16.xpose.msra.mxu0 %v1150_v48 }
 0x1d0   : > { %3088 = vrot.lane.b32.xlu1 %v3877_v55, %s3559_s24 }
 0x1d1   : > { %3133 = vrot.lane.b32.xlu0 %v3877_v55, %s3560_s12 }
 0x1d4   : > { %3098 = vrot.lane.b32.xlu1 %v3902_v13, %s3559_s24 }
 0x1d5   : > { %2827 = vmatmul.mubr.msk.bf16.vlgmr.msra.gmra.mrb[16].mxu0 %vm1127_vm0, %v920_v17  ;;  %3153 = vrot.lane.b32.xlu0 %v3877_v55, %s3561_s16 }
 0x1d6   : > { %2830 = vmatprep.mubr.msk.bf16.mxu0 %vm1127_vm0, %v921_v29 }
 0x1d8   : > { %3108 = vrot.lane.b32.xlu1 %v3904_v4, %s3561_s16 }
 0x1d9   : > { %3163 = vrot.lane.b32.xlu0 %v3122_v19, %s3560_s12 }
 0x1dc   : > { %3118 = vrot.lane.b32.xlu1 %v3112_v35, %s3561_s16 }
 0x1dd   : > { %3173 = vrot.lane.b32.xlu0 %v3122_v19, %s3561_s16  ;;  %2831 = vmatmul.mubr.msk.bf16.gmra.mrb[20].mxu0 %vm1127_vm0, %v922_v54 }
 0x1e0   : > { %3138 = vrot.lane.b32.xlu1 %v3077_v9, %s3560_s12 }
 0x1e1   : > { %3183 = vrot.lane.b32.xlu0 %v3906_v20, %s3559_s24 }
 0x1e4   : > { %3143 = vrot.lane.b32.xlu1 %v3077_v9, %s3561_s16 }
 0x1e5   : > { %3193 = vrot.lane.b32.xlu0 %v3938_v57, %s3559_s24 }
 0x1e8   : > { %3148 = vrot.lane.b32.xlu1 %v3902_v13, %s3560_s12 }
 0x1e9   : > { %3203 = vrot.lane.b32.xlu0 %v3906_v20, %s3560_s12 }
 0x1ec   : > { %3158 = vrot.lane.b32.xlu1 %v3902_v13, %s3561_s16 }
 0x1f0   : > { %3168 = vrot.lane.b32.xlu1 %v3127_v53, %s3560_s12 }
 0x1f4   : > { %3178 = vrot.lane.b32.xlu1 %v3127_v53, %s3561_s16 }
 0x1f8   : > { %3188 = vrot.lane.b32.xlu1 %v3908_v22, %s3559_s24 }
 0x1fc   : > { %3198 = vrot.lane.b32.xlu1 %v3940_v45, %s3559_s24 }
 0x200   : > { %3208 = vrot.lane.b32.xlu1 %v3906_v20, %s3561_s16 }
 0x204   : > { %3213 = vrot.lane.b32.xlu1 %v3908_v22, %s3560_s12 }
 0x208   : > { %3218 = vrot.lane.b32.xlu1 %v3908_v22, %s3561_s16 }
 0x226   : > { %v3064_v55 = vpop.permute.xlu0 %3063 }
 0x227   : > { %v3066_v58 = vunpack.i.h.bf16 %v3064_v55  ;;  %v3065_v61 = vunpack.i.l.bf16 %v3064_v55 }
 0x229   : > { %v1019_v62 = vpack.c.bf16 %v3066_v58, %v3065_v61 }
 0x22a   : > { %v3084_v63 = vpop.permute.xlu0 %3083 }
 0x22b   : > { %v3086_v1 = vunpack.i.h.bf16 %v3084_v63  ;;  %v3085_v2 = vunpack.i.l.bf16 %v3084_v63  ;;  %2974 = vmatprep.subr.msk.bf16.mxu1 %vm1127_vm0, %v1019_v62  ;;  %v1230_v3 = vsel %vm1127_vm0, %v1019_v62, 0 }
 0x22c   : > { %2835 = vmatpush3.bf16.xpose.msra.mxu1 %v1230_v3 }
 0x22d   : > { %v1023_v5 = vpack.c.bf16 %v3086_v1, %v3085_v2 }
 0x22e   : > { %v3094_v6 = vpop.permute.xlu0 %3093  ;;  %v3069_v7 = vpop.permute.xlu1 %3068 }
 0x22f   : > { %v3071_v10 = vunpack.i.h.bf16 %v3069_v7  ;;  %v3070_v11 = vunpack.i.l.bf16 %v3069_v7  ;;  %2978 = vmatprep.subr.msk.bf16.mxu0 %vm1127_vm0, %v1023_v5  ;;  %v1319_v12 = vsel %vm1127_vm0, %v1023_v5, 0  ;;  %v3096_v19 = vunpack.i.h.bf16 %v3094_v6 }
 0x230   : > { %2851 = vmatpush3.bf16.xpose.msra.mxu0 %v1319_v12  ;;  %v3095_v29 = vunpack.i.l.bf16 %v3094_v6 }
 0x231   : > { %v1020_v0 = vpack.c.bf16 %v3071_v10, %v3070_v11 }
 0x232   : > { %v3104_v14 = vpop.permute.xlu0 %3103  ;;  %v1027_v24 = vpack.c.bf16 %v3096_v19, %v3095_v29 }
 0x233   : > { %v3106_v15 = vunpack.i.h.bf16 %v3104_v14  ;;  %v3105_v17 = vunpack.i.l.bf16 %v3104_v14  ;;  %2975 = vmatprep.subr.msk.bf16.mxu1 %vm1127_vm0, %v1020_v0  ;;  %v1233_v13 = vsel %vm1127_vm0, %v1020_v0, 0 }
 0x234   : > { %2837 = vmatpush3.bf16.xpose.msra.mxu1 %v1233_v13  ;;  %v1408_v62 = vsel %vm1127_vm0, %v1027_v24, 0 }
 0x235   : > { %v1024_v4 = vpack.c.bf16 %v3106_v15, %v3105_v17 }
 0x236   : > { %v3114_v18 = vpop.permute.xlu0 %3113  ;;  %v3074_v20 = vpop.permute.xlu1 %3073 }
 0x237   : > { %v3116_v22 = vunpack.i.h.bf16 %v3114_v18  ;;  %v3115_v23 = vunpack.i.l.bf16 %v3114_v18  ;;  %v3076_v25 = vunpack.i.h.bf16 %v3074_v20  ;;  %v3075_v28 = vunpack.i.l.bf16 %v3074_v20  ;;  %2979 = vmatprep.subr.msk.bf16.mxu0 %vm1127_vm0, %v1024_v4 }
 0x238   : > { %v1322_v31 = vsel %vm1127_vm0, %v1024_v4, 0 }
 0x239   : > { %v1025_v16 = vpack.c.bf16 %v3116_v22, %v3115_v23  ;;  %v1021_v21 = vpack.c.bf16 %v3076_v25, %v3075_v28  ;;  %2853 = vmatpush3.bf16.xpose.msra.mxu0 %v1322_v31 }
 0x23a   : > { %v3124_v32 = vpop.permute.xlu0 %3123 }
 0x23b   : > { %2976 = vmatprep.subr.msk.bf16.mxu1 %vm1127_vm0, %v1021_v21  ;;  %2980 = vmatprep.subr.msk.bf16.mxu0 %vm1127_vm0, %v1025_v16  ;;  %v1236_v33 = vsel %vm1127_vm0, %v1021_v21, 0  ;;  %v1325_v38 = vsel %vm1127_vm0, %v1025_v16, 0  ;;  %v3126_v39 = vunpack.i.h.bf16 %v3124_v32  ;;  %v3125_v49 = vunpack.i.l.bf16 %v3124_v32 }
 0x23c   : > { %2839 = vmatpush3.bf16.xpose.msra.mxu1 %v1236_v33 }
 0x23d   : > { %v925_v56 = vpack.c.bf16 %v3126_v39, %v3125_v49 }
 0x23e   : > { %v3079_v34 = vpop.permute.xlu1 %3078 }
 0x23f   : > { %v3129_v35 = vpop.permute.xlu0 %3128  ;;  %v3081_v36 = vunpack.i.h.bf16 %v3079_v34  ;;  %v3080_v37 = vunpack.i.l.bf16 %v3079_v34 }
 0x240   : > { %v3131_v63 = vunpack.i.h.bf16 %v3129_v35  ;;  %v3130_v1 = vunpack.i.l.bf16 %v3129_v35 }
 0x241   : > { %v1022_v8 = vpack.c.bf16 %v3081_v36, %v3080_v37  ;;  %2855 = vmatpush3.bf16.xpose.msra.mxu0 %v1325_v38 }
 0x242   : > { %v3089_v40 = vpop.permute.xlu1 %3088  ;;  %v926_v12 = vpack.c.bf16 %v3131_v63, %v3130_v1 }
 0x243   : > { %v3134_v41 = vpop.permute.xlu0 %3133  ;;  %v3091_v42 = vunpack.i.h.bf16 %v3089_v40  ;;  %v3090_v27 = vunpack.i.l.bf16 %v3089_v40  ;;  %2977 = vmatprep.subr.msk.bf16.mxu1 %vm1127_vm0, %v1022_v8  ;;  %v1239_v43 = vsel %vm1127_vm0, %v1022_v8, 0 }
 0x244   : > { %v3136_v44 = vunpack.i.h.bf16 %v3134_v41  ;;  %v3135_v46 = vunpack.i.l.bf16 %v3134_v41  ;;  %2841 = vmatpush3.bf16.xpose.msra.mxu1 %v1239_v43 }
 0x245   : > { %v923_v47 = vpack.c.bf16 %v3091_v42, %v3090_v27  ;;  %2982 = vmatprep.subr.msk.bf16.mxu1 %vm1127_vm0, %v1027_v24 }
 0x246   : > { %v927_v50 = vpack.c.bf16 %v3136_v44, %v3135_v46  ;;  %v3099_v51 = vpop.permute.xlu1 %3098 }
 0x247   : > { %v3154_v52 = vpop.permute.xlu0 %3153  ;;  %v3101_v53 = vunpack.i.h.bf16 %v3099_v51  ;;  %v3100_v54 = vunpack.i.l.bf16 %v3099_v51  ;;  %2842 = vmatprep.mubr.msk.bf16.mxu1 %vm1127_vm0, %v923_v47 }
 0x248   : > { %2858 = vmatprep.mubr.msk.bf16.mxu0 %vm1127_vm0, %v927_v50  ;;  %v3156_v3 = vunpack.i.h.bf16 %v3154_v52  ;;  %v3155_v5 = vunpack.i.l.bf16 %v3154_v52 }
 0x249   : > { %v924_v9 = vpack.c.bf16 %v3101_v53, %v3100_v54 }
 0x24a   : > { %v3109_v48 = vpop.permute.xlu1 %3108  ;;  %v931_v0 = vpack.c.bf16 %v3156_v3, %v3155_v5 }
 0x24b   : > { %v3164_v55 = vpop.permute.xlu0 %3163  ;;  %v3111_v58 = vunpack.i.h.bf16 %v3109_v48  ;;  %v3110_v61 = vunpack.i.l.bf16 %v3109_v48  ;;  %2843 = vmatmul.mubr.msk.bf16.vlgmr.msra.gmra.mrb[8].mxu1 %vm1127_vm0, %v924_v9 }
 0x24c   : > { %2846 = vmatprep.mubr.msk.bf16.mxu1 %vm1127_vm0, %v925_v56  ;;  %2867 = vmatpush3.bf16.xpose.msra.mxu1 %v1408_v62  ;;  %v3166_v16 = vunpack.i.h.bf16 %v3164_v55  ;;  %v3165_v21 = vunpack.i.l.bf16 %v3164_v55 }
 0x24d   : > { %v1028_v2 = vpack.c.bf16 %v3111_v58, %v3110_v61 }
 0x24e   : > { %v3119_v6 = vpop.permute.xlu1 %3118  ;;  %v929_v8 = vpack.c.bf16 %v3166_v16, %v3165_v21 }
 0x24f   : > { %v3174_v7 = vpop.permute.xlu0 %3173  ;;  %v3121_v10 = vunpack.i.h.bf16 %v3119_v6  ;;  %v3120_v11 = vunpack.i.l.bf16 %v3119_v6  ;;  %2983 = vmatprep.subr.msk.bf16.mxu1 %vm1127_vm0, %v1028_v2  ;;  %v1411_v18 = vsel %vm1127_vm0, %v1028_v2, 0 }
 0x250   : > { %v3176_v39 = vunpack.i.h.bf16 %v3174_v7  ;;  %v3175_v49 = vunpack.i.l.bf16 %v3174_v7 }
 0x251   : > { %v1029_v15 = vpack.c.bf16 %v3121_v10, %v3120_v11 }
 0x252   : > { %v3139_v14 = vpop.permute.xlu1 %3138  ;;  %v933_v52 = vpack.c.bf16 %v3176_v39, %v3175_v49 }
 0x253   : > { %v4014_v17 = vpop.permute.xlu0 %3183  ;;  %v3141_v13 = vunpack.i.h.bf16 %v3139_v14  ;;  %v3140_v4 = vunpack.i.l.bf16 %v3139_v14  ;;  %2847 = vmatmul.mubr.msk.bf16.gmra.mrb[12].mxu1 %vm1127_vm0, %v926_v12  ;;  %v1414_v35 = vsel %vm1127_vm0, %v1029_v15, 0 }
 0x254   : > { %2869 = vmatpush3.bf16.xpose.msra.mxu1 %v1411_v18  ;;  %2874 = vmatprep.mubr.msk.bf16.mxu1 %vm1127_vm0, %v931_v0  ;;  %v3186_v58 = vunpack.i.h.bf16 %v4014_v17  ;;  %v3185_v61 = vunpack.i.l.bf16 %v4014_v17 }
 0x255   : > { %v1026_v20 = vpack.c.bf16 %v3141_v13, %v3140_v4  ;;  %2984 = vmatprep.subr.msk.bf16.mxu1 %vm1127_vm0, %v1029_v15 }
 0x256   : > { %v3144_v22 = vpop.permute.xlu1 %3143  ;;  %v4048_v62 = vpack.c.bf16 %v3186_v58, %v3185_v61 }
 0x257   : > { %v4020_v23 = vpop.permute.xlu0 %3193  ;;  %v3146_v25 = vunpack.i.h.bf16 %v3144_v22  ;;  %v3145_v28 = vunpack.i.l.bf16 %v3144_v22  ;;  %2981 = vmatprep.subr.msk.bf16.mxu0 %vm1127_vm0, %v1026_v20  ;;  %v1328_v31 = vsel %vm1127_vm0, %v1026_v20, 0 }
 0x258   : > { %2857 = vmatpush3.bf16.xpose.msra.mxu0 %v1328_v31 }
 0x259   : > { %v1030_v33 = vpack.c.bf16 %v3146_v25, %v3145_v28 }
 0x25a   : > { %v3149_v32 = vpop.permute.xlu1 %3148 }
 0x25b   : > { %v3204_v34 = vpop.permute.xlu0 %3203  ;;  %v3151_v19 = vunpack.i.h.bf16 %v3149_v32  ;;  %v3150_v29 = vunpack.i.l.bf16 %v3149_v32  ;;  %v1417_v43 = vsel %vm1127_vm0, %v1030_v33, 0 }
 0x25c   : > { %v3206_v36 = vunpack.i.h.bf16 %v3204_v34  ;;  %v3205_v37 = vunpack.i.l.bf16 %v3204_v34  ;;  %2871 = vmatpush3.bf16.xpose.msra.mxu1 %v1414_v35 }
 0x25d   : > { %v928_v38 = vpack.c.bf16 %v3151_v19, %v3150_v29  ;;  %2985 = vmatprep.subr.msk.bf16.mxu1 %vm1127_vm0, %v1030_v33 }
 0x25e   : > { %v1119_v40 = vpack.c.bf16 %v3206_v36, %v3205_v37  ;;  %v3159_v24 = vpop.permute.xlu1 %3158 }
 0x25f   : > { %2859 = vmatmul.mubr.msk.bf16.vlgmr.msra.gmra.mrb[24].mxu0 %vm1127_vm0, %v928_v38  ;;  %v3161_v44 = vunpack.i.h.bf16 %v3159_v24  ;;  %v3160_v46 = vunpack.i.l.bf16 %v3159_v24 }
 0x260   : > { %2914 = vmatprep.subr.bf16.mxu0 %v1119_v40  ;;  %2862 = vmatprep.mubr.msk.bf16.mxu0 %vm1127_vm0, %v929_v8 }
 0x261   : > { %2915 = vmatpush3.bf16.msra.mxu0 %v1119_v40  ;;  %v932_v51 = vpack.c.bf16 %v3161_v44, %v3160_v46 }
 0x262   : > { %v3169_v41 = vpop.permute.xlu1 %3168 }
 0x263   : > { %v3171_v42 = vunpack.i.h.bf16 %v3169_v41  ;;  %v3170_v27 = vunpack.i.l.bf16 %v3169_v41 }
 0x264   : > { %2873 = vmatpush3.bf16.xpose.msra.mxu1 %v1417_v43 }
 0x265   : > { %v930_v47 = vpack.c.bf16 %v3171_v42, %v3170_v27  ;;  %2882 = vmatprep.subr.bf16.mxu1 %v3914_v26 }
 0x266   : > { %v3179_v50 = vpop.permute.xlu1 %3178 }
 0x267   : > { %2863 = vmatmul.mubr.msk.bf16.gmra.mrb[28].mxu0 %vm1127_vm0, %v930_v47  ;;  %v3181_v54 = vunpack.i.h.bf16 %v3179_v50  ;;  %v3180_v9 = vunpack.i.l.bf16 %v3179_v50 }
 0x269   : > { %v934_v48 = vpack.c.bf16 %v3181_v54, %v3180_v9 }
 0x26a   : > { %v4031_v53 = vpop.permute.xlu1 %3188 }
 0x26b   : > { %2875 = vmatmul.mubr.msk.bf16.vlgmr.msra.gmra.mrb[16].mxu1 %vm1127_vm0, %v932_v51 }
 0x26c   : > { %2878 = vmatprep.mubr.msk.bf16.mxu1 %vm1127_vm0, %v933_v52  ;;  %2883 = vmatpush3.bf16.msra.mxu1 %v3914_v26 }
 0x26d   : > { %2884 = vmatprep.subr.bf16.mxu1 %v3917_v30 }
 0x26e   : > { %v4037_v56 = vpop.permute.xlu1 %3198 }
 0x270   : > { %2885 = vmatpush3.bf16.msra.mxu1 %v3917_v30 }
 0x271   : > { %2886 = vmatprep.subr.bf16.mxu1 %v3942_v59 }
 0x272   : > { %v4041_v55 = vpop.permute.xlu1 %3208 }
 0x273   : > { %2879 = vmatmul.mubr.msk.bf16.gmra.mrb[20].mxu1 %vm1127_vm0, %v934_v48 }
 0x274   : > { %2887 = vmatpush3.bf16.msra.mxu1 %v3942_v59 }
 0x275   : > { %2888 = vmatprep.subr.bf16.mxu1 %v3944_v60 }
 0x276   : > { %v3214_v26 = vpop.permute.xlu1 %3213 }
 0x277   : > { %v3216_v63 = vunpack.i.h.bf16 %v3214_v26  ;;  %v3215_v30 = vunpack.i.l.bf16 %v3214_v26 }
 0x278   : > { %2889 = vmatpush3.bf16.msra.mxu1 %v3944_v60 }
 0x279   : > { %v1120_v1 = vpack.c.bf16 %v3216_v63, %v3215_v30  ;;  %2898 = vmatprep.subr.bf16.mxu1 %v4048_v62 }
 0x27b   : > { %2916 = vmatprep.subr.bf16.mxu0 %v1120_v1 }
 0x27c   : > { %2917 = vmatpush3.bf16.msra.mxu0 %v1120_v1 }
 0x2a8   : > { %v2828_v2 = vpop.f32.mrb[16].mxu0 }
 0x2a9   : > { %v4052_v3 = vmul.f32 0.35355338, %v2828_v2  ;;  %v1186_v5 = vpop.f32.mrb[17].mxu0 }
 0x2aa   : > { %v2829_v59 = vpop.f32.mrb[18].mxu0  ;;  %v4054_v6 = vmul.f32 0.35355338, %v1186_v5 }
 0x2ab   : > { %v1189_v7 = vpop.f32.mrb[19].mxu0  ;;  %v1523_v10 = vsel %vm1516_vm1, %v4052_v3, -inf  ;;  %v4062_v12 = vmul.f32 0.35355338, %v2829_v59 }
 0x2ac   : > { %v4058_v11 = vmul.f32 0.35355338, %v1189_v7  ;;  %1524 = vmax.xlane.f32.xlu0 %v1523_v10  ;;  %v1517_v0 = vsel %vm1516_vm1, %v4054_v6, -inf }
 0x2ad   : > { %v1526_v20 = vsel %vm1516_vm1, %v4062_v12, -inf }
 0x2ae   : > { %v1520_v60 = vsel %vm1516_vm1, %v4058_v11, -inf }
 0x2af   : > { %1521 = vmax.xlane.f32.xlu1 %v1520_v60 }
 0x2b0   : > { %1518 = vmax.xlane.f32.xlu0 %v1517_v0  ;;  %v2832_v14 = vpop.f32.mrb[20].mxu0 }
 0x2b1   : > { %v1202_v15 = vpop.f32.mrb[21].mxu0  ;;  %v4066_v13 = vmul.f32 0.35355338, %v2832_v14 }
 0x2b2   : > { %v2833_v17 = vpop.f32.mrb[22].mxu0  ;;  %v4076_v28 = vmul.f32 0.35355338, %v1202_v15 }
 0x2b3   : > { %v4068_v4 = vmul.f32 0.35355338, %v2833_v17  ;;  %v1205_v18 = vpop.f32.mrb[23].mxu0  ;;  %v1535_v31 = vsel %vm1516_vm1, %v4066_v13, -inf }
 0x2b4   : > { %1527 = vmax.xlane.f32.xlu0 %v1526_v20  ;;  %v4072_v22 = vmul.f32 0.35355338, %v1205_v18  ;;  %v1529_v21 = vsel %vm1516_vm1, %v4076_v28, -inf }
 0x2b5   : > { %v1538_v25 = vsel %vm1516_vm1, %v4068_v4, -inf }
 0x2b6   : > { %1539 = vmax.xlane.f32.xlu1 %v1538_v25  ;;  %v1532_v16 = vsel %vm1516_vm1, %v4072_v22, -inf }
 0x2b8   : > { %1536 = vmax.xlane.f32.xlu0 %v1535_v31 }
 0x2ba   : > { %1533 = vmax.xlane.f32.xlu1 %v1532_v16 }
 0x2bc   : > { %1530 = vmax.xlane.f32.xlu0 %v1529_v21 }
 0x31e   : > { %v2844_v32 = vpop.f32.mrb[8].mxu1 }
 0x31f   : > { %v4084_v33 = vmul.f32 0.35355338, %v2844_v32  ;;  %v1275_v34 = vpop.f32.mrb[9].mxu1 }
 0x320   : > { %v2845_v19 = vpop.f32.mrb[10].mxu1  ;;  %v4094_v44 = vmul.f32 0.35355338, %v1275_v34 }
 0x321   : > { %v4086_v29 = vmul.f32 0.35355338, %v2845_v19  ;;  %v1278_v35 = vpop.f32.mrb[11].mxu1  ;;  %v1547_v36 = vsel %vm1516_vm1, %v4084_v33, -inf }
 0x322   : > { %1548 = vmax.xlane.f32.xlu0 %v1547_v36  ;;  %v4100_v49 = vmul.f32 0.35355338, %v1278_v35  ;;  %v1541_v52 = vsel %vm1516_vm1, %v4094_v44, -inf }
 0x323   : > { %v1550_v37 = vsel %vm1516_vm1, %v4086_v29, -inf }
 0x324   : > { %1551 = vmax.xlane.f32.xlu1 %v1550_v37  ;;  %v1544_v58 = vsel %vm1516_vm1, %v4100_v49, -inf }
 0x326   : > { %v2848_v38 = vpop.f32.mrb[12].mxu1 }
 0x327   : > { %v1291_v8 = vpop.f32.mrb[13].mxu1  ;;  %v4112_v26 = vmul.f32 0.35355338, %v2848_v38 }
 0x328   : > { %v2849_v40 = vpop.f32.mrb[14].mxu1  ;;  %v4128_v17 = vmul.f32 0.35355338, %v1291_v8 }
 0x329   : > { %v1294_v24 = vpop.f32.mrb[15].mxu1  ;;  %v4116_v2 = vmul.f32 0.35355338, %v2849_v40  ;;  %v1559_v0 = vsel %vm1516_vm1, %v4112_v26, -inf }
 0x32a   : > { %v4132_v25 = vmul.f32 0.35355338, %v1294_v24  ;;  %v1553_v19 = vsel %vm1516_vm1, %v4128_v17, -inf }
 0x32b   : > { %v1562_v15 = vsel %vm1516_vm1, %v4116_v2, -inf }
 0x32c   : > { %v1556_v36 = vsel %vm1516_vm1, %v4132_v25, -inf }
 0x332   : > { %v2860_v41 = vpop.f32.mrb[24].mxu0 }
 0x333   : > { %v4092_v42 = vmul.f32 0.35355338, %v2860_v41  ;;  %v1364_v27 = vpop.f32.mrb[25].mxu0 }
 0x334   : > { %v2861_v43 = vpop.f32.mrb[26].mxu0  ;;  %v4104_v51 = vmul.f32 0.35355338, %v1364_v27 }
 0x335   : > { %v4096_v46 = vmul.f32 0.35355338, %v2861_v43  ;;  %v1367_v47 = vpop.f32.mrb[27].mxu0  ;;  %v1571_v39 = vsel %vm1516_vm1, %v4092_v42, -inf }
 0x336   : > { %1572 = vmax.xlane.f32.xlu0 %v1571_v39  ;;  %v4108_v9 = vmul.f32 0.35355338, %v1367_v47  ;;  %v1565_v30 = vsel %vm1516_vm1, %v4104_v51, -inf }
 0x337   : > { %v1574_v50 = vsel %vm1516_vm1, %v4096_v46, -inf }
 0x338   : > { %1575 = vmax.xlane.f32.xlu1 %v1574_v50  ;;  %v1568_v59 = vsel %vm1516_vm1, %v4108_v9, -inf }
 0x33a   : > { %v2864_v54 = vpop.f32.mrb[28].mxu0  ;;  %1542 = vmax.xlane.f32.xlu0 %v1541_v52 }
 0x33b   : > { %v1380_v48 = vpop.f32.mrb[29].mxu0  ;;  %v4120_v10 = vmul.f32 0.35355338, %v2864_v54 }
 0x33c   : > { %v2865_v61 = vpop.f32.mrb[30].mxu0  ;;  %1545 = vmax.xlane.f32.xlu1 %v1544_v58  ;;  %v4136_v32 = vmul.f32 0.35355338, %v1380_v48 }
 0x33d   : > { %v1383_v63 = vpop.f32.mrb[31].mxu0  ;;  %v4124_v14 = vmul.f32 0.35355338, %v2865_v61  ;;  %v1583_v18 = vsel %vm1516_vm1, %v4120_v10, -inf }
 0x33e   : > { %1566 = vmax.xlane.f32.xlu0 %v1565_v30  ;;  %v2876_v1 = vpop.f32.mrb[16].mxu1  ;;  %v4140_v35 = vmul.f32 0.35355338, %v1383_v63  ;;  %v1577_v38 = vsel %vm1516_vm1, %v4136_v32, -inf }
 0x33f   : > { %v1453_v5 = vpop.f32.mrb[17].mxu1  ;;  %v1586_v16 = vsel %vm1516_vm1, %v4124_v14, -inf  ;;  %v4144_v37 = vmul.f32 0.35355338, %v2876_v1  ;;  %v1525_v1 = vpop.xlane.xlu0 %1524 }
 0x340   : > { %1569 = vmax.xlane.f32.xlu1 %v1568_v59  ;;  %v2877_v7 = vpop.f32.mrb[18].mxu1  ;;  %v1580_v40 = vsel %vm1516_vm1, %v4140_v35, -inf  ;;  %v4152_v24 = vmul.f32 0.35355338, %v1453_v5  ;;  %v4184_v59 = vpop.permute.xlu1 %3218 }
 0x341   : > { %v1456_v60 = vpop.f32.mrb[19].mxu1  ;;  %v4148_v8 = vmul.f32 0.35355338, %v2877_v7  ;;  %v1595_v41 = vsel %vm1516_vm1, %v4144_v37, -inf }
 0x342   : > { %1560 = vmax.xlane.f32.xlu0 %v1559_v0  ;;  %v4156_v27 = vmul.f32 0.35355338, %v1456_v60  ;;  %v1589_v39 = vsel %vm1516_vm1, %v4152_v24, -inf  ;;  %v1615_v60 = vsub.f32 %v4052_v3, %v1525_v1 }
 0x343   : > { %v1598_v43 = vsel %vm1516_vm1, %v4148_v8, -inf  ;;  %v1519_v5 = vpop.xlane.xlu0 %1518 }
 0x344   : > { %1563 = vmax.xlane.f32.xlu1 %v1562_v15  ;;  %v1592_v52 = vsel %vm1516_vm1, %v4156_v27, -inf  ;;  %v1522_v0 = vpop.xlane.xlu1 %1521 }
 0x346   : > { %1584 = vmax.xlane.f32.xlu0 %v1583_v18  ;;  %v2880_v20 = vpop.f32.mrb[20].mxu1 }
 0x347   : > { %v1469_v31 = vpop.f32.mrb[21].mxu1  ;;  %v4160_v47 = vmul.f32 0.35355338, %v2880_v20  ;;  %v1528_v7 = vpop.xlane.xlu0 %1527  ;;  %v1649_v20 = vmul.f32 1.442695, %v1615_v60 }
 0x348   : > { %1587 = vmax.xlane.f32.xlu1 %v1586_v16  ;;  %v2881_v21 = vpop.f32.mrb[22].mxu1  ;;  %v4168_v54 = vmul.f32 0.35355338, %v1469_v31  ;;  %v1616_v15 = vsub.f32 %v4062_v12, %v1528_v7  ;;  %v1613_v31 = vsub.f32 %v4054_v6, %v1519_v5  ;;  %v1540_v16 = vpop.xlane.xlu1 %1539 }
 0x349   : > { %v1472_v34 = vpop.f32.mrb[23].mxu1  ;;  %v4164_v50 = vmul.f32 0.35355338, %v2881_v21  ;;  %v1607_v48 = vsel %vm1516_vm1, %v4160_v47, -inf  ;;  %v1614_v21 = vsub.f32 %v4058_v11, %v1522_v0  ;;  %3358 = vpow2.f32 %v1649_v20 }
 0x34a   : > { %1554 = vmax.xlane.f32.xlu0 %v1553_v19  ;;  %v4172_v58 = vmul.f32 0.35355338, %v1472_v34  ;;  %v1601_v63 = vsel %vm1516_vm1, %v4168_v54, -inf  ;;  %v1651_v34 = vmul.f32 1.442695, %v1616_v15  ;;  %v1620_v3 = vsub.f32 %v4068_v4, %v1540_v16 }
 0x34b   : > { %v1610_v61 = vsel %vm1516_vm1, %v4164_v50, -inf  ;;  %v1537_v18 = vpop.xlane.xlu0 %1536  ;;  %v1645_v19 = vmul.f32 1.442695, %v1613_v31 }
 0x34c   : > { %1557 = vmax.xlane.f32.xlu1 %v1556_v36  ;;  %v1604_v30 = vsel %vm1516_vm1, %v4172_v58, -inf  ;;  %3360 = vpow2.f32 %v1651_v34  ;;  %v1659_v6 = vmul.f32 1.442695, %v1620_v3 }
 0x34d   : > { %3362 = vpow2.f32 %v1645_v19 }
 0x34e   : > { %1578 = vmax.xlane.f32.xlu0 %v1577_v38  ;;  %v1647_v38 = vmul.f32 1.442695, %v1614_v21 }
 0x34f   : > { %v1531_v36 = vpop.xlane.xlu0 %1530 }
 0x350   : > { %1581 = vmax.xlane.f32.xlu1 %v1580_v40  ;;  %v1534_v40 = vpop.xlane.xlu1 %1533  ;;  %3364 = vpow2.f32 %v1647_v38 }
 0x352   : > { %1596 = vmax.xlane.f32.xlu0 %v1595_v41  ;;  %v1617_v41 = vsub.f32 %v4076_v28, %v1531_v36 }
 0x354   : > { %1599 = vmax.xlane.f32.xlu1 %v1598_v43  ;;  %v1618_v43 = vsub.f32 %v4072_v22, %v1534_v40  ;;  %v1653_v11 = vmul.f32 1.442695, %v1617_v41 }
 0x356   : > { %1590 = vmax.xlane.f32.xlu0 %v1589_v39  ;;  %v4194_v39 = vpop.eup %3358 }
 0x357   : > { %v1715_v4 = vsel %vm1516_vm1, %v4194_v39, 0.0 }
 0x358   : > { %1593 = vmax.xlane.f32.xlu1 %v1592_v52  ;;  %v4196_v52 = vpop.eup %3360 }
 0x359   : > { %v1718_v28 = vsel %vm1516_vm1, %v4196_v52, 0.0 }
 0x35a   : > { %1608 = vmax.xlane.f32.xlu0 %v1607_v48  ;;  %v4200_v48 = vpop.eup %3362 }
 0x35b   : > { %v4204_v22 = vpop.eup %3364 }
 0x35c   : > { %1611 = vmax.xlane.f32.xlu1 %v1610_v61  ;;  %v1709_v61 = vsel %vm1516_vm1, %v4200_v48, 0.0 }
 0x35e   : > { %1602 = vmax.xlane.f32.xlu0 %v1601_v63 }
 0x360   : > { %1605 = vmax.xlane.f32.xlu1 %v1604_v30  ;;  %v1712_v30 = vsel %vm1516_vm1, %v4204_v22, 0.0 }
 0x371   : > { %3228 = vrot.lane.b32.xlu1 %v3938_v57, %s3561_s16 }
 0x374   : > { %3223 = vrot.lane.b32.xlu0 %v3938_v57, %s3560_s12  ;;  %v1619_v57 = vsub.f32 %v4066_v13, %v1537_v18  ;;  %v1655_v13 = vmul.f32 1.442695, %v1618_v43 }
 0x376   : > { %v1657_v12 = vmul.f32 1.442695, %v1619_v57 }
 0x378   : > { %3366 = vpow2.f32 %v1657_v12 }
 0x379   : > { %3368 = vpow2.f32 %v1659_v6 }
 0x37a   : > { %3370 = vpow2.f32 %v1653_v11 }
 0x37b   : > { %3372 = vpow2.f32 %v1655_v13 }
 0x382   : > { %v4208_v63 = vpop.eup %3366 }
 0x383   : > { %v4212_v1 = vpop.eup %3368  ;;  %v1727_v5 = vsel %vm1516_vm1, %v4208_v63, 0.0 }
 0x384   : > { %v4216_v7 = vpop.eup %3370  ;;  %v1730_v60 = vsel %vm1516_vm1, %v4212_v1, 0.0 }
 0x385   : > { %v4220_v0 = vpop.eup %3372  ;;  %v1721_v15 = vsel %vm1516_vm1, %v4216_v7, 0.0 }
 0x386   : > { %v1724_v18 = vsel %vm1516_vm1, %v4220_v0, 0.0 }
 0x393   : > { %1716 = vadd.xlane.f32.xlu0 %v1715_v4 }
 0x395   : > { %1719 = vadd.xlane.f32.xlu1 %v1718_v28 }
 0x397   : > { %1710 = vadd.xlane.f32.xlu0 %v1709_v61 }
 0x399   : > { %1713 = vadd.xlane.f32.xlu1 %v1712_v30 }
 0x39b   : > { %1728 = vadd.xlane.f32.xlu0 %v1727_v5 }
 0x39d   : > { %1731 = vadd.xlane.f32.xlu1 %v1730_v60 }
 0x39f   : > { %1722 = vadd.xlane.f32.xlu0 %v1721_v15 }
 0x3a1   : > { %1725 = vadd.xlane.f32.xlu1 %v1724_v18 }
 0x3af   : > { %v1549_v20 = vpop.xlane.xlu0 %1548 }
 0x3b0   : > { %v1623_v31 = vsub.f32 %v4084_v33, %v1549_v20 }
 0x3b1   : > { %v1552_v19 = vpop.xlane.xlu1 %1551 }
 0x3b2   : > { %v1665_v16 = vmul.f32 1.442695, %v1623_v31  ;;  %v1624_v33 = vsub.f32 %v4086_v29, %v1552_v19 }
 0x3b4   : > { %3374 = vpow2.f32 %v1665_v16  ;;  %v1667_v4 = vmul.f32 1.442695, %v1624_v33 }
 0x3be   : > { %v4227_v21 = vpop.eup %3374 }
 0x3bf   : > { %v1739_v34 = vsel %vm1516_vm1, %v4227_v21, 0.0 }
 0x3c0   : > { %1740 = vadd.xlane.f32.xlu0 %v1739_v34 }
 0x3c3   : > { %v1573_v57 = vpop.xlane.xlu0 %1572 }
 0x3c4   : > { %v1631_v36 = vsub.f32 %v4092_v42, %v1573_v57 }
 0x3c5   : > { %v1576_v38 = vpop.xlane.xlu1 %1575 }
 0x3c6   : > { %v1681_v3 = vmul.f32 1.442695, %v1631_v36  ;;  %v1632_v28 = vsub.f32 %v4096_v46, %v1576_v38 }
 0x3c7   : > { %v1543_v40 = vpop.xlane.xlu0 %1542 }
 0x3c8   : > { %3376 = vpow2.f32 %v1681_v3  ;;  %v1621_v12 = vsub.f32 %v4094_v44, %v1543_v40  ;;  %v1683_v44 = vmul.f32 1.442695, %v1632_v28 }
 0x3c9   : > { %v1546_v41 = vpop.xlane.xlu1 %1545 }
 0x3ca   : > { %v1661_v6 = vmul.f32 1.442695, %v1621_v12  ;;  %v1622_v29 = vsub.f32 %v4100_v49, %v1546_v41 }
 0x3cb   : > { %v1567_v43 = vpop.xlane.xlu0 %1566 }
 0x3cc   : > { %3378 = vpow2.f32 %v1661_v6  ;;  %v1629_v11 = vsub.f32 %v4104_v51, %v1567_v43 }
 0x3cd   : > { %v1570_v13 = vpop.xlane.xlu1 %1569 }
 0x3ce   : > { %v1677_v61 = vmul.f32 1.442695, %v1629_v11  ;;  %v1630_v16 = vsub.f32 %v4108_v9, %v1570_v13 }
 0x3cf   : > { %v1561_v42 = vpop.xlane.xlu0 %1560 }
 0x3d0   : > { %3380 = vpow2.f32 %v1677_v61  ;;  %v1627_v30 = vsub.f32 %v4112_v26, %v1561_v42  ;;  %v1663_v26 = vmul.f32 1.442695, %v1622_v29 }
 0x3d1   : > { %v1564_v5 = vpop.xlane.xlu1 %1563  ;;  %3382 = vpow2.f32 %v1667_v4 }
 0x3d2   : > { %v4237_v60 = vpop.eup %3376  ;;  %v1673_v15 = vmul.f32 1.442695, %v1627_v30  ;;  %v1628_v43 = vsub.f32 %v4116_v2, %v1564_v5 }
 0x3d3   : > { %v1585_v18 = vpop.xlane.xlu0 %1584  ;;  %v1763_v51 = vsel %vm1516_vm1, %v4237_v60, 0.0 }
 0x3d4   : > { %3384 = vpow2.f32 %v1673_v15  ;;  %v1635_v46 = vsub.f32 %v4120_v10, %v1585_v18  ;;  %1764 = vadd.xlane.f32.xlu0 %v1763_v51  ;;  %v1679_v10 = vmul.f32 1.442695, %v1630_v16 }
 0x3d5   : > { %v1588_v20 = vpop.xlane.xlu1 %1587  ;;  %3386 = vpow2.f32 %v1683_v44  ;;  %v1675_v44 = vmul.f32 1.442695, %v1628_v43 }
 0x3d6   : > { %v4243_v31 = vpop.eup %3378  ;;  %v1689_v34 = vmul.f32 1.442695, %v1635_v46  ;;  %v1636_v2 = vsub.f32 %v4124_v14, %v1588_v20 }
 0x3d7   : > { %v1555_v19 = vpop.xlane.xlu0 %1554  ;;  %v1733_v49 = vsel %vm1516_vm1, %v4243_v31, 0.0 }
 0x3d8   : > { %3388 = vpow2.f32 %v1689_v34  ;;  %v1625_v57 = vsub.f32 %v4128_v17, %v1555_v19  ;;  %1734 = vadd.xlane.f32.xlu0 %v1733_v49  ;;  %v1691_v16 = vmul.f32 1.442695, %v1636_v2 }
 0x3d9   : > { %v1558_v36 = vpop.xlane.xlu1 %1557  ;;  %3390 = vpow2.f32 %v1663_v26 }
 0x3da   : > { %v4249_v38 = vpop.eup %3380  ;;  %v1669_v3 = vmul.f32 1.442695, %v1625_v57  ;;  %v1626_v51 = vsub.f32 %v4132_v25, %v1558_v36 }
 0x3db   : > { %v1579_v40 = vpop.xlane.xlu0 %1578  ;;  %v1757_v12 = vsel %vm1516_vm1, %v4249_v38, 0.0  ;;  %v4253_v9 = vpop.eup %3382 }
 0x3dc   : > { %3392 = vpow2.f32 %v1669_v3  ;;  %v1633_v41 = vsub.f32 %v4136_v32, %v1579_v40  ;;  %1758 = vadd.xlane.f32.xlu1 %v1757_v12  ;;  %v1742_v4 = vsel %vm1516_vm1, %v4253_v9, 0.0  ;;  %v1671_v36 = vmul.f32 1.442695, %v1626_v51 }
 0x3dd   : > { %v1582_v33 = vpop.xlane.xlu1 %1581  ;;  %3394 = vpow2.f32 %v1679_v10 }
 0x3de   : > { %v4256_v6 = vpop.eup %3384  ;;  %v1685_v17 = vmul.f32 1.442695, %v1633_v41  ;;  %v1634_v3 = vsub.f32 %v4140_v35, %v1582_v33 }
 0x3df   : > { %v1597_v11 = vpop.xlane.xlu0 %1596  ;;  %v1751_v13 = vsel %vm1516_vm1, %v4256_v6, 0.0  ;;  %v4263_v28 = vpop.eup %3386 }
 0x3e0   : > { %v1639_v61 = vsub.f32 %v4144_v37, %v1597_v11  ;;  %1752 = vadd.xlane.f32.xlu0 %v1751_v13  ;;  %1743 = vadd.xlane.f32.xlu1 %v1742_v4  ;;  %3396 = vpow2.f32 %v1685_v17  ;;  %v1766_v15 = vsel %vm1516_vm1, %v4263_v28, 0.0  ;;  %v1687_v4 = vmul.f32 1.442695, %v1634_v3 }
 0x3e1   : > { %v1600_v32 = vpop.xlane.xlu1 %1599 }
 0x3e2   : > { %v4266_v42 = vpop.eup %3388  ;;  %v1697_v30 = vmul.f32 1.442695, %v1639_v61  ;;  %v1640_v35 = vsub.f32 %v4148_v8, %v1600_v32 }
 0x3e3   : > { %v1591_v5 = vpop.xlane.xlu0 %1590  ;;  %v1775_v29 = vsel %vm1516_vm1, %v4266_v42, 0.0  ;;  %v4273_v18 = vpop.eup %3390 }
 0x3e4   : > { %3398 = vpow2.f32 %v1697_v30  ;;  %v1637_v37 = vsub.f32 %v4152_v24, %v1591_v5  ;;  %1776 = vadd.xlane.f32.xlu0 %v1775_v29  ;;  %1767 = vadd.xlane.f32.xlu1 %v1766_v15  ;;  %v1736_v49 = vsel %vm1516_vm1, %v4273_v18, 0.0  ;;  %v1699_v8 = vmul.f32 1.442695, %v1640_v35 }
 0x3e5   : > { %v1594_v46 = vpop.xlane.xlu1 %1593  ;;  %3400 = vpow2.f32 %v1675_v44 }
 0x3e6   : > { %v4277_v26 = vpop.eup %3392  ;;  %v1693_v14 = vmul.f32 1.442695, %v1637_v37  ;;  %v1638_v20 = vsub.f32 %v4156_v27, %v1594_v46 }
 0x3e7   : > { %v1609_v34 = vpop.xlane.xlu0 %1608  ;;  %v1745_v19 = vsel %vm1516_vm1, %v4277_v26, 0.0  ;;  %v4284_v24 = vpop.eup %3394 }
 0x3e8   : > { %3402 = vpow2.f32 %v1693_v14  ;;  %v1695_v57 = vmul.f32 1.442695, %v1638_v20  ;;  %v1643_v25 = vsub.f32 %v4160_v47, %v1609_v34  ;;  %1746 = vadd.xlane.f32.xlu0 %v1745_v19  ;;  %1737 = vadd.xlane.f32.xlu1 %v1736_v49  ;;  %v1760_v12 = vsel %vm1516_vm1, %v4284_v24, 0.0 }
 0x3e9   : > { %v1612_v10 = vpop.xlane.xlu1 %1611 }
 0x3ea   : > { %3404 = vpow2.f32 %v1695_v57  ;;  %v1705_v27 = vmul.f32 1.442695, %v1643_v25  ;;  %v4290_v41 = vpop.eup %3396  ;;  %v1644_v32 = vsub.f32 %v4164_v50, %v1612_v10 }
 0x3eb   : > { %3406 = vpow2.f32 %v1691_v16  ;;  %v1603_v40 = vpop.xlane.xlu0 %1602  ;;  %v1769_v30 = vsel %vm1516_vm1, %v4290_v41, 0.0 }
 0x3ec   : > { %v1641_v17 = vsub.f32 %v4168_v54, %v1603_v40  ;;  %1761 = vadd.xlane.f32.xlu1 %v1760_v12  ;;  %3408 = vpow2.f32 %v1671_v36  ;;  %v1707_v20 = vmul.f32 1.442695, %v1644_v32 }
 0x3ed   : > { %v1606_v47 = vpop.xlane.xlu1 %1605  ;;  %3410 = vpow2.f32 %v1705_v27 }
 0x3ee   : > { %v4293_v43 = vpop.eup %3398  ;;  %v1701_v11 = vmul.f32 1.442695, %v1641_v17  ;;  %v1642_v13 = vsub.f32 %v4172_v58, %v1606_v47 }
 0x3ef   : > { %v3224_v33 = vpop.permute.xlu0 %3223  ;;  %v1787_v61 = vsel %vm1516_vm1, %v4293_v43, 0.0  ;;  %v4301_v2 = vpop.eup %3400 }
 0x3f0   : > { %v3226_v54 = vunpack.i.h.bf16 %v3224_v33  ;;  %v3225_v44 = vunpack.i.l.bf16 %v3224_v33  ;;  %1788 = vadd.xlane.f32.xlu0 %v1787_v61  ;;  %1770 = vadd.xlane.f32.xlu1 %v1769_v30  ;;  %3412 = vpow2.f32 %v1701_v11  ;;  %v1703_v58 = vmul.f32 1.442695, %v1642_v13 }
 0x3f1   : > { %3414 = vpow2.f32 %v1687_v4  ;;  %v1754_v51 = vsel %vm1516_vm1, %v4301_v2, 0.0  ;;  %v4350_v11 = vpop.permute.xlu1 %3228 }
 0x3f2   : > { %v4303_v5 = vpop.eup %3402  ;;  %v1121_v29 = vpack.c.bf16 %v3226_v54, %v3225_v44  ;;  %3416 = vpow2.f32 %v1703_v58 }
 0x3f3   : > { %v1781_v15 = vsel %vm1516_vm1, %v4303_v5, 0.0  ;;  %3418 = vpow2.f32 %v1699_v8 }
 0x3f4   : > { %v4308_v37 = vpop.eup %3404  ;;  %1782 = vadd.xlane.f32.xlu0 %v1781_v15  ;;  %2918 = vmatprep.subr.bf16.mxu0 %v1121_v29  ;;  %3420 = vpow2.f32 %v1707_v20  ;;  %v3191_v20 = vunpack.i.h.bf16 %v4031_v53 }
 0x3f5   : > { %v4312_v46 = vpop.eup %3406  ;;  %1755 = vadd.xlane.f32.xlu1 %v1754_v51  ;;  %2919 = vmatpush3.bf16.msra.mxu0 %v1121_v29  ;;  %v1784_v50 = vsel %vm1516_vm1, %v4308_v37, 0.0 }
 0x3f6   : > { %v4314_v14 = vpop.eup %3408  ;;  %v1778_v34 = vsel %vm1516_vm1, %v4312_v46, 0.0 }
 0x3f7   : > { %v4318_v16 = vpop.eup %3410  ;;  %v1748_v57 = vsel %vm1516_vm1, %v4314_v14, 0.0 }
 0x3f8   : > { %1785 = vadd.xlane.f32.xlu0 %v1784_v50  ;;  %v1799_v19 = vsel %vm1516_vm1, %v4318_v16, 0.0  ;;  %v3190_v50 = vunpack.i.l.bf16 %v4031_v53 }
 0x3f9   : > { %1779 = vadd.xlane.f32.xlu1 %v1778_v34 }
 0x3fa   : > { %v4324_v49 = vpop.eup %3412 }
 0x3fb   : > { %v4328_v25 = vpop.eup %3414  ;;  %v1793_v36 = vsel %vm1516_vm1, %v4324_v49, 0.0 }
 0x3fc   : > { %1800 = vadd.xlane.f32.xlu0 %v1799_v19  ;;  %v4332_v10 = vpop.eup %3416  ;;  %v1772_v27 = vsel %vm1516_vm1, %v4328_v25, 0.0 }
 0x3fd   : > { %1749 = vadd.xlane.f32.xlu1 %v1748_v57  ;;  %v4336_v3 = vpop.eup %3418  ;;  %v1796_v40 = vsel %vm1516_vm1, %v4332_v10, 0.0 }
 0x3fe   : > { %v1790_v12 = vsel %vm1516_vm1, %v4336_v3, 0.0  ;;  %v4342_v17 = vpop.eup %3420 }
 0x3ff   : > { %v1802_v47 = vsel %vm1516_vm1, %v4342_v17, 0.0 }
 0x400   : > { %1794 = vadd.xlane.f32.xlu0 %v1793_v36 }
 0x401   : > { %1773 = vadd.xlane.f32.xlu1 %v1772_v27 }
 0x404   : > { %1797 = vadd.xlane.f32.xlu0 %v1796_v40  ;;  %v3196_v40 = vunpack.i.h.bf16 %v4020_v23 }
 0x405   : > { %1791 = vadd.xlane.f32.xlu1 %v1790_v12  ;;  %v1116_v12 = vpack.c.bf16 %v3191_v20, %v3190_v50 }
 0x409   : > { %1803 = vadd.xlane.f32.xlu1 %v1802_v47 }
 0x41a   : > { %3238 = vrot.lane.b32.xlu1 %v3940_v45, %s3561_s16  ;;  %3233 = vrot.lane.b32.xlu0 %v3940_v45, %s3560_s12 }
 0x420   : > { %v1717_v13 = vpop.xlane.xlu0 %1716 }
 0x422   : > { %v1720_v4 = vpop.xlane.xlu1 %1719 }
 0x423   : > { %3422 = vrcp.f32 %v1720_v4  ;;  %v3201_v4 = vunpack.i.h.bf16 %v4037_v56 }
 0x424   : > { %v1711_v35 = vpop.xlane.xlu0 %1710 }
 0x425   : > { %3424 = vrcp.f32 %v1711_v35  ;;  %v3200_v35 = vunpack.i.l.bf16 %v4037_v56 }
 0x426   : > { %3426 = vrcp.f32 %v1717_v13  ;;  %v1714_v33 = vpop.xlane.xlu1 %1713 }
 0x427   : > { %3428 = vrcp.f32 %v1714_v33 }
 0x428   : > { %v1729_v61 = vpop.xlane.xlu0 %1728 }
 0x42a   : > { %v1732_v30 = vpop.xlane.xlu1 %1731 }
 0x42b   : > { %3430 = vrcp.f32 %v1732_v30 }
 0x42c   : > { %v1723_v54 = vpop.xlane.xlu0 %1722 }
 0x42d   : > { %3432 = vrcp.f32 %v1723_v54  ;;  %v3423_v44 = vpop.eup %3422 }
 0x42e   : > { %3434 = vrcp.f32 %v1729_v61  ;;  %v1726_v58 = vpop.xlane.xlu1 %1725  ;;  %v1840_v32 = vmul.f32 %v3423_v44, %v4196_v52  ;;  %v3195_v52 = vunpack.i.l.bf16 %v4020_v23 }
 0x42f   : > { %v3425_v29 = vpop.eup %3424  ;;  %3436 = vrcp.f32 %v1726_v58 }
 0x430   : > { %v3427_v45 = vpop.eup %3426  ;;  %v1837_v15 = vmul.f32 %v3425_v29, %v4200_v48  ;;  %v1117_v13 = vpack.c.bf16 %v3196_v40, %v3195_v52  ;;  %v3221_v40 = vunpack.i.h.bf16 %v4184_v59  ;;  %v3220_v52 = vunpack.i.l.bf16 %v4184_v59 }
 0x431   : > { %v3429_v8 = vpop.eup %3428  ;;  %v1839_v34 = vmul.f32 %v3427_v45, %v4194_v39 }
 0x432   : > { %v1838_v51 = vmul.f32 %v3429_v8, %v4204_v22 }
 0x433   : > { %v1870_v57 = vpack.c.bf16 %v1840_v32, %v1839_v34 }
 0x434   : > { %v1869_v19 = vpack.c.bf16 %v1838_v51, %v1837_v15 }
 0x435   : > { %v3431_v36 = vpop.eup %3430 }
 0x436   : > { %2890 = vmatprep.mubr.msk.bf16.mxu1 %vm1516_vm1, %v1869_v19  ;;  %v1844_v53 = vmul.f32 %v3431_v36, %v4212_v1  ;;  %v3211_v1 = vunpack.i.h.bf16 %v4041_v55 }
 0x437   : > { %v3433_v27 = vpop.eup %3432  ;;  %2891 = vmatmul.mubr.msk.bf16.vlgmr.msra.gmra.mrb[24].mxu1 %vm1516_vm1, %v1870_v57 }
 0x438   : > { %v3435_v48 = vpop.eup %3434  ;;  %2899 = vmatpush3.bf16.msra.mxu1 %v4048_v62  ;;  %v1841_v39 = vmul.f32 %v3433_v27, %v4216_v7  ;;  %v1118_v62 = vpack.c.bf16 %v3201_v4, %v3200_v35  ;;  %v3210_v7 = vunpack.i.l.bf16 %v4041_v55 }
 0x439   : > { %v3437_v22 = vpop.eup %3436  ;;  %2900 = vmatprep.subr.bf16.mxu1 %v1116_v12  ;;  %v1843_v23 = vmul.f32 %v3435_v48, %v4208_v63 }
 0x43a   : > { %v1842_v47 = vmul.f32 %v3437_v22, %v4220_v0  ;;  %v1123_v0 = vpack.c.bf16 %v3211_v1, %v3210_v7 }
 0x43b   : > { %v1872_v61 = vpack.c.bf16 %v1844_v53, %v1843_v23  ;;  %v1124_v23 = vpack.c.bf16 %v3221_v40, %v3220_v52 }
 0x43c   : > { %2901 = vmatpush3.bf16.msra.mxu1 %v1116_v12  ;;  %v1871_v33 = vpack.c.bf16 %v1842_v47, %v1841_v39 }
 0x43d   : > { %2902 = vmatprep.subr.bf16.mxu1 %v1117_v13 }
 0x43e   : > { %2894 = vmatprep.mubr.msk.bf16.mxu1 %vm1516_vm1, %v1871_v33 }
 0x43f   : > { %2895 = vmatmul.mubr.msk.bf16.gmra.mrb[28].mxu1 %vm1516_vm1, %v1872_v61 }
 0x440   : > { %2903 = vmatpush3.bf16.msra.mxu1 %v1117_v13 }
 0x441   : > { %2904 = vmatprep.subr.bf16.mxu1 %v1118_v62 }
 0x444   : > { %2905 = vmatpush3.bf16.msra.mxu1 %v1118_v62 }
 0x445   : > { %2930 = vmatprep.subr.bf16.mxu1 %v1123_v0 }
 0x44d   : > { %v1741_v56 = vpop.xlane.xlu0 %1740 }
 0x461   : > { %v1765_v63 = vpop.xlane.xlu0 %1764 }
 0x465   : > { %v1735_v30 = vpop.xlane.xlu0 %1734 }
 0x469   : > { %v1759_v54 = vpop.xlane.xlu1 %1758 }
 0x46d   : > { %v1753_v44 = vpop.xlane.xlu0 %1752  ;;  %v1744_v58 = vpop.xlane.xlu1 %1743 }
 0x46e   : > { %3438 = vrcp.f32 %v1744_v58 }
 0x46f   : > { %3440 = vrcp.f32 %v1735_v30 }
 0x470   : > { %3442 = vrcp.f32 %v1741_v56 }
 0x471   : > { %v1768_v29 = vpop.xlane.xlu1 %1767  ;;  %v4373_v45 = vpop.xlane.xlu0 %1776 }
 0x475   : > { %v1738_v8 = vpop.xlane.xlu1 %1737  ;;  %v1747_v55 = vpop.xlane.xlu0 %1746 }
 0x476   : > { %3444 = vrcp.f32 %v1738_v8 }
 0x477   : > { %3446 = vrcp.f32 %v1759_v54 }
 0x478   : > { %v3439_v20 = vpop.eup %3438 }
 0x479   : > { %v1762_v32 = vpop.xlane.xlu1 %1761  ;;  %v3441_v50 = vpop.eup %3440  ;;  %v1848_v57 = vmul.f32 %v3439_v20, %v4253_v9 }
 0x47a   : > { %3448 = vrcp.f32 %v1762_v32  ;;  %v3443_v34 = vpop.eup %3442  ;;  %v1845_v48 = vmul.f32 %v3441_v50, %v4243_v31  ;;  %v3231_v31 = vunpack.i.h.bf16 %v4350_v11 }
 0x47b   : > { %v1847_v53 = vmul.f32 %v3443_v34, %v4227_v21  ;;  %3450 = vrcp.f32 %v1753_v44 }
 0x47c   : > { %3452 = vrcp.f32 %v1768_v29 }
 0x47d   : > { %v1789_v15 = vpop.xlane.xlu0 %1788  ;;  %v1771_v51 = vpop.xlane.xlu1 %1770  ;;  %v1874_v13 = vpack.c.bf16 %v1848_v57, %v1847_v53  ;;  %3454 = vrcp.f32 %v1747_v55 }
 0x480   : > { %v3445_v19 = vpop.eup %3444 }
 0x481   : > { %v1783_v36 = vpop.xlane.xlu0 %1782  ;;  %v3447_v27 = vpop.eup %3446  ;;  %v1846_v22 = vmul.f32 %v3445_v19, %v4273_v18  ;;  %v3230_v18 = vunpack.i.l.bf16 %v4350_v11 }
 0x482   : > { %v1756_v12 = vpop.xlane.xlu1 %1755  ;;  %v1853_v9 = vmul.f32 %v3447_v27, %v4249_v38 }
 0x483   : > { %v1873_v47 = vpack.c.bf16 %v1846_v22, %v1845_v48  ;;  %3456 = vrcp.f32 %v1756_v12  ;;  %v1125_v33 = vpack.c.bf16 %v3231_v31, %v3230_v18 }
 0x484   : > { %v3449_v39 = vpop.eup %3448 }
 0x485   : > { %v1786_v4 = vpop.xlane.xlu0 %1785  ;;  %v1854_v35 = vmul.f32 %v3449_v39, %v4284_v24  ;;  %2906 = vmatprep.mubr.msk.bf16.mxu1 %vm1516_vm1, %v1873_v47  ;;  %v3451_v62 = vpop.eup %3450 }
 0x486   : > { %v1780_v59 = vpop.xlane.xlu1 %1779  ;;  %2907 = vmatmul.mubr.msk.bf16.vlgmr.msra.gmra.mrb[32].mxu1 %vm1516_vm1, %v1874_v13  ;;  %3458 = vrcp.f32 %v1786_v4  ;;  %v3453_v1 = vpop.eup %3452  ;;  %v1851_v57 = vmul.f32 %v3451_v62, %v4256_v6 }
 0x487   : > { %v1877_v21 = vpack.c.bf16 %v1854_v35, %v1853_v9  ;;  %2931 = vmatpush3.bf16.msra.mxu1 %v1123_v0  ;;  %3460 = vrcp.f32 %v1783_v36  ;;  %v3455_v7 = vpop.eup %3454  ;;  %v1856_v19 = vmul.f32 %v3453_v1, %v4263_v28  ;;  %v3335_v1 = vld [vmem:[%s4562_s5 + $0x8] sm:$0xff]  }
 0x488   : > { %2932 = vmatprep.subr.bf16.mxu1 %v1124_v23  ;;  %v1849_v29 = vmul.f32 %v3455_v7, %v4277_v26  ;;  %v3336_v7 = vld [vmem:[%s4562_s5 + $0x10] sm:$0xff]  }
 0x489   : > { %v1801_v38 = vpop.xlane.xlu0 %1800  ;;  %2922 = vmatprep.mubr.msk.bf16.mxu0 %vm1516_vm1, %v1877_v21 }
 0x48a   : > { %v1750_v24 = vpop.xlane.xlu1 %1749 }
 0x48b   : > { %3462 = vrcp.f32 %v1750_v24  ;;  %2933 = vmatpush3.bf16.msra.mxu1 %v1124_v23 }
 0x48c   : > { %3464 = vrcp.f32 %v1765_v63  ;;  %2934 = vmatprep.subr.bf16.mxu1 %v1125_v33 }
 0x48d   : > { %3466 = vrcp.f32 %v1789_v15  ;;  %v1795_v11 = vpop.xlane.xlu0 %1794  ;;  %v3457_v56 = vpop.eup %3456 }
 0x48e   : > { %3468 = vrcp.f32 %v1771_v51  ;;  %v1774_v61 = vpop.xlane.xlu1 %1773  ;;  %v1852_v8 = vmul.f32 %v3457_v56, %v4301_v2 }
 0x48f   : > { %3470 = vrcp.f32 %v1774_v61  ;;  %2935 = vmatpush3.bf16.msra.mxu1 %v1125_v33 }
 0x490   : > { %3472 = vrcp.f32 %v1780_v59  ;;  %v3459_v54 = vpop.eup %3458  ;;  %v1876_v40 = vpack.c.bf16 %v1852_v8, %v1851_v57  ;;  %v3339_v8 = vld [vmem:[%s4562_s5 + $0x28] sm:$0xff]  }
 0x491   : > { %3474 = vrcp.f32 %v1795_v11  ;;  %v1798_v0 = vpop.xlane.xlu0 %1797  ;;  %v3461_v63 = vpop.eup %3460  ;;  %v1862_v50 = vmul.f32 %v3459_v54, %v4308_v37 }
 0x492   : > { %3476 = vrcp.f32 %v1798_v0  ;;  %v1792_v30 = vpop.xlane.xlu1 %1791  ;;  %v1861_v26 = vmul.f32 %v3461_v63, %v4303_v5 }
 0x493   : > { %3478 = vrcp.f32 %v1792_v30 }
 0x494   : > { %3480 = vrcp.f32 %v4373_v45 }
 0x495   : > { %v3463_v44 = vpop.eup %3462  ;;  %v3234_v58 = vpop.permute.xlu0 %3233 }
 0x496   : > { %v3465_v55 = vpop.eup %3464  ;;  %v3236_v32 = vunpack.i.h.bf16 %v3234_v58  ;;  %v3235_v15 = vunpack.i.l.bf16 %v3234_v58  ;;  %v1804_v51 = vpop.xlane.xlu1 %1803  ;;  %v1850_v20 = vmul.f32 %v3463_v44, %v4314_v14  ;;  %v1881_v14 = vpack.c.bf16 %v1862_v50, %v1861_v26  ;;  %v3337_v44 = vld [vmem:[%s4562_s5 + $0x18] sm:$0xff]  }
 0x497   : > { %v3467_v34 = vpop.eup %3466  ;;  %3482 = vrcp.f32 %v1804_v51  ;;  %v1855_v12 = vmul.f32 %v3465_v55, %v4237_v60  ;;  %v3340_v51 = vld [vmem:[%s4562_s5 + $0x30] sm:$0xff]   ;;  %v3341_v26 = vld [vmem:[%s4562_s5 + $0x38] sm:$0xff]  }
 0x498   : > { %v3469_v36 = vpop.eup %3468  ;;  %v1122_v45 = vpack.c.bf16 %v3236_v32, %v3235_v15  ;;  %v1875_v27 = vpack.c.bf16 %v1850_v20, %v1849_v29  ;;  %3484 = vrcp.f32 %v1801_v38  ;;  %v1863_v4 = vmul.f32 %v3467_v34, %v4293_v43  ;;  %v3338_v29 = vld [vmem:[%s4562_s5 + $0x20] sm:$0xff]  }
 0x499   : > { %v3471_v2 = vpop.eup %3470  ;;  %v1857_v5 = vmul.f32 %v3469_v36, %v4290_v41  ;;  %v1878_v39 = vpack.c.bf16 %v1856_v19, %v1855_v12 }
 0x49a   : > { %v3473_v52 = vpop.eup %3472  ;;  %2910 = vmatprep.mubr.msk.bf16.mxu1 %vm1516_vm1, %v1875_v27  ;;  %v3239_v37 = vpop.permute.xlu1 %3238  ;;  %2920 = vmatprep.subr.bf16.mxu0 %v1122_v45  ;;  %v1858_v28 = vmul.f32 %v3471_v2, %v4328_v25 }
 0x49b   : > { %v3475_v6 = vpop.eup %3474  ;;  %v3241_v48 = vunpack.i.h.bf16 %v3239_v37  ;;  %v3240_v22 = vunpack.i.l.bf16 %v3239_v37  ;;  %2911 = vmatmul.mubr.msk.bf16.gmra.mrb[36].mxu1 %vm1516_vm1, %v1876_v40  ;;  %2921 = vmatpush3.bf16.msra.mxu0 %v1122_v45  ;;  %v1860_v59 = vmul.f32 %v3473_v52, %v4312_v46 }
 0x49c   : > { %v3477_v53 = vpop.eup %3476  ;;  %2938 = vmatprep.mubr.msk.bf16.mxu1 %vm1516_vm1, %v1881_v14  ;;  %v1879_v13 = vpack.c.bf16 %v1858_v28, %v1857_v5  ;;  %v1865_v23 = vmul.f32 %v3475_v6, %v4324_v49 }
 0x49d   : > { %v3479_v60 = vpop.eup %3478  ;;  %v1126_v47 = vpack.c.bf16 %v3241_v48, %v3240_v22  ;;  %v1866_v25 = vmul.f32 %v3477_v53, %v4332_v10 }
 0x49e   : > { %v1864_v9 = vmul.f32 %v3479_v60, %v4336_v3  ;;  %2923 = vmatmul.mubr.msk.bf16.vlgmr.msra.gmra.mrb[32].mxu0 %vm1516_vm1, %v1878_v39  ;;  %v3481_v35 = vpop.eup %3480 }
 0x49f   : > { %2936 = vmatprep.subr.bf16.mxu1 %v1126_v47  ;;  %2926 = vmatprep.mubr.msk.bf16.mxu0 %vm1516_vm1, %v1879_v13  ;;  %v1883_v18 = vpack.c.bf16 %v1866_v25, %v1865_v23  ;;  %v1859_v43 = vmul.f32 %v3481_v35, %v4266_v42 }
 0x4a0   : > { %v1882_v41 = vpack.c.bf16 %v1864_v9, %v1863_v4  ;;  %2937 = vmatpush3.bf16.msra.mxu1 %v1126_v47 }
 0x4a1   : > { %v3483_v31 = vpop.eup %3482  ;;  %v1880_v10 = vpack.c.bf16 %v1860_v59, %v1859_v43 }
 0x4a2   : > { %v3485_v3 = vpop.eup %3484  ;;  %v1868_v21 = vmul.f32 %v3483_v31, %v4342_v17 }
 0x4a3   : > { %2939 = vmatmul.mubr.msk.bf16.vlgmr.msra.gmra.mrb[40].mxu1 %vm1516_vm1, %v1882_v41  ;;  %v1867_v38 = vmul.f32 %v3485_v3, %v4318_v16  ;;  %v3334_v16 = vld [vmem:[%s4562_s5] sm:$0xff]  }
 0x4a4   : > { %2942 = vmatprep.mubr.msk.bf16.mxu1 %vm1516_vm1, %v1883_v18  ;;  %2946 = vmatprep.subr.bf16.mxu0 %v3334_v16 }
 0x4a5   : > { %v1884_v24 = vpack.c.bf16 %v1868_v21, %v1867_v38  ;;  %2947 = vmatpush3.bf16.msra.mxu0 %v3334_v16 }
 0x4a6   : > { %2927 = vmatmul.mubr.msk.bf16.gmra.mrb[36].mxu0 %vm1516_vm1, %v1880_v10  ;;  %2948 = vmatprep.subr.bf16.mxu0 %v3335_v1 }
 0x4a9   : > { %2949 = vmatpush3.bf16.msra.mxu0 %v3335_v1 }
 0x4aa   : > { %2950 = vmatprep.subr.bf16.mxu0 %v3336_v7 }
 0x4ab   : > { %2943 = vmatmul.mubr.msk.bf16.gmra.mrb[44].mxu1 %vm1516_vm1, %v1884_v24 }
 0x4ad   : > { %2951 = vmatpush3.bf16.msra.mxu0 %v3336_v7 }
 0x4ae   : > { %2952 = vmatprep.subr.bf16.mxu0 %v3337_v44 }
 0x4b1   : > { %2953 = vmatpush3.bf16.msra.mxu0 %v3337_v44 }
 0x4b2   : > { %2954 = vmatprep.subr.bf16.mxu0 %v3338_v29 }
 0x4b5   : > { %2955 = vmatpush3.bf16.msra.mxu0 %v3338_v29 }
 0x4b6   : > { %2956 = vmatprep.subr.bf16.mxu0 %v3339_v8 }
 0x4b9   : > { %2957 = vmatpush3.bf16.msra.mxu0 %v3339_v8 }
 0x4ba   : > { %2958 = vmatprep.subr.bf16.mxu0 %v3340_v51 }
 0x4bd   : > { %2959 = vmatpush3.bf16.msra.mxu0 %v3340_v51 }
 0x4be   : > { %2960 = vmatprep.subr.bf16.mxu0 %v3341_v26 }
 0x4c1   : > { %2961 = vmatpush3.bf16.msra.mxu0 %v3341_v26 }
 0x50a   : > { %v4416_v46 = vpop.f32.mrb[24].mxu1 }
 0x50b   : > { %v4418_v49 = vpop.f32.mrb[25].mxu1 }
 0x50c   : > { %v4420_v42 = vpop.f32.mrb[26].mxu1 }
 0x50d   : > { %v4422_v33 = vpop.f32.mrb[27].mxu1 }
 0x512   : > { %v4424_v11 = vpop.f32.mrb[28].mxu1 }
 0x513   : > { %v4426_v61 = vpop.f32.mrb[29].mxu1 }
 0x514   : > { %v4428_v17 = vpop.f32.mrb[30].mxu1 }
 0x515   : > { %v4430_v62 = vpop.f32.mrb[31].mxu1 }
 0x559   : > { %v2908_v0 = vpop.f32.mrb[32].mxu1 }
 0x55a   : > { %v2008_v56 = vpop.f32.mrb[33].mxu1 }
 0x55b   : > { %v2909_v30 = vpop.f32.mrb[34].mxu1 }
 0x55c   : > { %v3242_v54 = vpack.i.bf16 %v2909_v30, %v2908_v0  ;;  %v2011_v63 = vpop.f32.mrb[35].mxu1 }
 0x55d   : > { %v3252_v58 = vpack.i.bf16 %v2011_v63, %v2008_v56 }
 0x55e   : > { %3243 = vrot.lane.b32.xlu1 %v3242_v54, %s3561_s16 }
 0x55f   : > { %3253 = vrot.lane.b32.xlu0 %v3252_v58, %s3561_s16 }
 0x56e   : > { %v2912_v55 = vpop.f32.mrb[36].mxu1 }
 0x56f   : > { %v2024_v32 = vpop.f32.mrb[37].mxu1 }
 0x570   : > { %v2913_v15 = vpop.f32.mrb[38].mxu1 }
 0x571   : > { %v3262_v20 = vpack.i.bf16 %v2913_v15, %v2912_v55  ;;  %v2027_v50 = vpop.f32.mrb[39].mxu1  ;;  %v2924_v34 = vpop.f32.mrb[32].mxu0 }
 0x572   : > { %v3267_v19 = vpack.i.bf16 %v2027_v50, %v2024_v32  ;;  %v2085_v57 = vpop.f32.mrb[33].mxu0 }
 0x573   : > { %v2925_v36 = vpop.f32.mrb[34].mxu0 }
 0x574   : > { %v3247_v45 = vpack.i.bf16 %v2925_v36, %v2924_v34  ;;  %v2088_v27 = vpop.f32.mrb[35].mxu0 }
 0x575   : > { %v3257_v2 = vpack.i.bf16 %v2088_v27, %v2085_v57 }
 0x576   : > { %v2940_v40 = vpop.f32.mrb[40].mxu1  ;;  %3248 = vrot.lane.b32.xlu1 %v3247_v45, %s3560_s12 }
 0x577   : > { %v2162_v52 = vpop.f32.mrb[41].mxu1  ;;  %3258 = vrot.lane.b32.xlu0 %v3257_v2, %s3560_s12 }
 0x578   : > { %v2941_v12 = vpop.f32.mrb[42].mxu1 }
 0x579   : > { %v3272_v37 = vpack.i.bf16 %v2941_v12, %v2940_v40  ;;  %v2165_v14 = vpop.f32.mrb[43].mxu1  ;;  %v2928_v28 = vpop.f32.mrb[36].mxu0 }
 0x57a   : > { %v3277_v6 = vpack.i.bf16 %v2165_v14, %v2162_v52  ;;  %3263 = vrot.lane.b32.xlu1 %v3262_v20, %s3561_s16  ;;  %v2101_v48 = vpop.f32.mrb[37].mxu0 }
 0x57b   : > { %3268 = vrot.lane.b32.xlu0 %v3267_v19, %s3561_s16  ;;  %v2929_v22 = vpop.f32.mrb[38].mxu0  ;;  %s4504_s16 = scalar_lea.vmem [#allocation3], %s3693_s13  ;;  %s2705_s13 = sshll.u32 (%p3664_p7), %s3536_s27, 4 }
 0x57c   : > { %v3287_v5 = vpack.i.bf16 %v2929_v22, %v2928_v28  ;;  %v2104_v53 = vpop.f32.mrb[39].mxu0  ;;  %s2471_s23 = sadd.s32 (%p3664_p7), %s3532_s26, %s2705_s13 }
 0x57d   : > { %v3282_v39 = vpack.i.bf16 %v2104_v53, %v2101_v48  ;;  %s2473_s15 = sadd.s32 (%p3664_p7), %s2700_s17, %s2471_s23 }
 0x57e   : > { %v2944_v60 = vpop.f32.mrb[44].mxu1  ;;  %3273 = vrot.lane.b32.xlu1 %v3272_v37, %s3559_s24  ;;  %s2701_s18 = sshll.u32 (%p3664_p7), %s2473_s15, 3 }
 0x57f   : > { %v2178_v47 = vpop.f32.mrb[45].mxu1  ;;  %3278 = vrot.lane.b32.xlu0 %v3277_v6, %s3559_s24  ;;  %s2475_s21 = scalar_lea.vmem (%p3664_p7), %s4564_s7, %s2701_s18 }
 0x580   : > { %v2945_v13 = vpop.f32.mrb[46].mxu1 }
 0x581   : > { %v3297_v4 = vpack.i.bf16 %v2945_v13, %v2944_v60  ;;  %v2181_v9 = vpop.f32.mrb[47].mxu1 }
 0x582   : > { %v3292_v25 = vpack.i.bf16 %v2181_v9, %v2178_v47  ;;  %3288 = vrot.lane.b32.xlu1 %v3287_v5, %s3560_s12 }
 0x583   : > { %3283 = vrot.lane.b32.xlu0 %v3282_v39, %s3560_s12 }
 0x586   : > { %3298 = vrot.lane.b32.xlu1 %v3297_v4, %s3559_s24 }
 0x587   : > { %3293 = vrot.lane.b32.xlu0 %v3292_v25, %s3559_s24 }
 0x5d0   : > { %v3244_v35 = vpop.permute.xlu1 %3243 }
 0x5d1   : > { %v3254_v41 = vpop.permute.xlu0 %3253  ;;  %v3246_v31 = vunpack.i.h.bf16 %v3244_v35  ;;  %v3245_v18 = vunpack.i.l.bf16 %v3244_v35  ;;  %v2688_v35 = vld [vmem:[%s4563_s6] ss:$0 sm:$0xff] }
 0x5d2   : > { %v3256_v43 = vunpack.i.h.bf16 %v3254_v41  ;;  %v3255_v10 = vunpack.i.l.bf16 %v3254_v41 }
 0x5d3   : > { %v2292_v7 = vsel %vm1127_vm0, %v4420_v42, %v3246_v31  ;;  %v2291_v0 = vsel %vm1127_vm0, %v4416_v46, %v3245_v18 }
 0x5d4   : > { %v2290_v56 = vsel %vm1127_vm0, %v4422_v33, %v3256_v43  ;;  %v2289_v54 = vsel %vm1127_vm0, %v4418_v49, %v3255_v10 }
 0x5e8   : > { %v3249_v23 = vpop.permute.xlu1 %3248 }
 0x5e9   : > { %v3259_v59 = vpop.permute.xlu0 %3258  ;;  %v3250_v21 = vunpack.i.l.bf16 %v3249_v23  ;;  %v3251_v24 = vunpack.i.h.bf16 %v3249_v23 }
 0x5ea   : > { %v3261_v16 = vunpack.i.h.bf16 %v3259_v59  ;;  %v3260_v1 = vunpack.i.l.bf16 %v3259_v59 }
 0x5eb   : > { %v2299_v63 = vsel %vm1516_vm1, %v2291_v0, %v3250_v21  ;;  %v2300_v8 = vsel %vm1516_vm1, %v2292_v7, %v3251_v24 }
 0x5ec   : > { %v3264_v3 = vpop.permute.xlu1 %3263  ;;  %v2298_v42 = vsel %vm1516_vm1, %v2290_v56, %v3261_v16  ;;  %v2297_v46 = vsel %vm1516_vm1, %v2289_v54, %v3260_v1 }
 0x5ed   : > { %v3269_v38 = vpop.permute.xlu0 %3268  ;;  %v3266_v15 = vunpack.i.h.bf16 %v3264_v3  ;;  %v3265_v20 = vunpack.i.l.bf16 %v3264_v3 }
 0x5ee   : > { %v3271_v57 = vunpack.i.h.bf16 %v3269_v38  ;;  %v3270_v36 = vunpack.i.l.bf16 %v3269_v38 }
 0x5ef   : > { %v2296_v12 = vsel %vm1127_vm0, %v4428_v17, %v3266_v15  ;;  %v2295_v37 = vsel %vm1127_vm0, %v4424_v11, %v3265_v20 }
 0x5f0   : > { %v3274_v30 = vpop.permute.xlu1 %3273  ;;  %v2294_v28 = vsel %vm1127_vm0, %v4430_v62, %v3271_v57  ;;  %v2293_v6 = vsel %vm1127_vm0, %v4426_v61, %v3270_v36 }
 0x5f1   : > { %v3276_v44 = vunpack.i.h.bf16 %v3274_v30  ;;  %v3275_v58 = vunpack.i.l.bf16 %v3274_v30  ;;  %v3279_v29 = vpop.permute.xlu0 %3278 }
 0x5f2   : > { %v3281_v55 = vunpack.i.h.bf16 %v3279_v29  ;;  %v3280_v32 = vunpack.i.l.bf16 %v3279_v29 }
 0x5f3   : > { %v2309_v33 = vsel %vm2305_vm2, %v2300_v8, %v3276_v44  ;;  %v2308_v51 = vsel %vm2305_vm2, %v2299_v63, %v3275_v58 }
 0x5f4   : > { %v2315_v49 = vpack.c.bf16 %v2309_v33, %v2308_v51  ;;  %v3289_v50 = vpop.permute.xlu1 %3288  ;;  %v2306_v34 = vsel %vm2305_vm2, %v2297_v46, %v3280_v32  ;;  %v2307_v19 = vsel %vm2305_vm2, %v2298_v42, %v3281_v55 }
 0x5f5   : > { %v3284_v45 = vpop.permute.xlu0 %3283  ;;  %v2314_v27 = vpack.c.bf16 %v2307_v19, %v2306_v34  ;;  %v3291_v26 = vunpack.i.h.bf16 %v3289_v50  ;;  %v3290_v2 = vunpack.i.l.bf16 %v3289_v50 }
 0x5f6   : > { %v3286_v40 = vunpack.i.h.bf16 %v3284_v45  ;;  %v3285_v52 = vunpack.i.l.bf16 %v3284_v45 }
 0x5f7   : > { %2962 = vmatprep.mubr.bf16.mxu0 %v2314_v27  ;;  %v2304_v53 = vsel %vm1516_vm1, %v2296_v12, %v3291_v26  ;;  %v2303_v39 = vsel %vm1516_vm1, %v2295_v37, %v3290_v2 }
 0x5f8   : > { %2963 = vmatmul.mubr.bf16.vlgmr.msra.gmra.mrb[40].mxu0 %v2315_v49  ;;  %v3299_v14 = vpop.permute.xlu1 %3298  ;;  %v2302_v47 = vsel %vm1516_vm1, %v2294_v28, %v3286_v40  ;;  %v2301_v11 = vsel %vm1516_vm1, %v2293_v6, %v3285_v52 }
 0x5f9   : > { %v3301_v48 = vunpack.i.h.bf16 %v3299_v14  ;;  %v3300_v22 = vunpack.i.l.bf16 %v3299_v14  ;;  %v3294_v5 = vpop.permute.xlu0 %3293 }
 0x5fa   : > { %v3296_v60 = vunpack.i.h.bf16 %v3294_v5  ;;  %v3295_v17 = vunpack.i.l.bf16 %v3294_v5 }
 0x5fb   : > { %v2312_v13 = vsel %vm2305_vm2, %v2303_v39, %v3300_v22  ;;  %v2313_v62 = vsel %vm2305_vm2, %v2304_v53, %v3301_v48 }
 0x5fc   : > { %v2310_v61 = vsel %vm2305_vm2, %v2301_v11, %v3295_v17  ;;  %v2311_v4 = vsel %vm2305_vm2, %v2302_v47, %v3296_v60  ;;  %v2317_v9 = vpack.c.bf16 %v2313_v62, %v2312_v13 }
 0x5fd   : > { %v2316_v25 = vpack.c.bf16 %v2311_v4, %v2310_v61 }
 0x5ff   : > { %2966 = vmatprep.mubr.bf16.mxu0 %v2316_v25 }
 0x600   : > { %2967 = vmatmul.mubr.bf16.gmra.mrb[44].mxu0 %v2317_v9 }
 0x6cb   : > { %v2964_v41 = vpop.f32.mrb[40].mxu0 }
 0x6cc   : > { %v2432_v23 = vadd.f32 %v2964_v41, %v2688_v35  ;;  %v2423_v59 = vpop.f32.mrb[41].mxu0 }
 0x6cd   : > { %v2424_v31 = vadd.f32 %v2688_v35, %v2423_v59  ;;  %v2965_v18 = vpop.f32.mrb[42].mxu0 }
 0x6ce   : > { %2456 = vst [vmem:[%s4504_s16 + $0x10] sm:$0xff] %v2432_v23  ;;  %v2435_v43 = vadd.f32 %v2965_v18, %v2688_v35  ;;  %v2426_v3 = vpop.f32.mrb[43].mxu0 }
 0x6cf   : > { %2454 = vst [vmem:[%s4504_s16] sm:$0xff] %v2424_v31  ;;  %v2427_v10 = vadd.f32 %v2688_v35, %v2426_v3 }
 0x6d0   : > { %2457 = vst [vmem:[%s4504_s16 + $0x18] sm:$0xff] %v2435_v43 }
 0x6d1   : > { %2455 = vst [vmem:[%s4504_s16 + $0x8] sm:$0xff] %v2427_v10 }
 0x6d3   : > { %v2968_v21 = vpop.f32.mrb[44].mxu0  ;;  %2468 = sbr.rel (!%p3664_p7) target bundleno = 1762 (0x6e2), region = 90 }
 0x6d4   : > { %v2448_v38 = vadd.f32 %v2968_v21, %v2688_v35  ;;  %v2439_v24 = vpop.f32.mrb[45].mxu0 }
 0x6d5   : > { %v2440_v16 = vadd.f32 %v2688_v35, %v2439_v24  ;;  %v2969_v1 = vpop.f32.mrb[46].mxu0  ;;  %v2521_v63 = vld [vmem:[%s4504_s16 + $0x10] sm:$0xff] (%p3664_p7) }
 0x6d6   : > { %2460 = vst [vmem:[%s4504_s16 + $0x30] sm:$0xff] %v2448_v38  ;;  %v2451_v7 = vadd.f32 %v2969_v1, %v2688_v35  ;;  %v2442_v0 = vpop.f32.mrb[47].mxu0  ;;  %v2517_v30 = vld [vmem:[%s4504_s16] sm:$0xff] (%p3664_p7)  ;;  %2522 = vst [vmem:[%s2475_s21 + $0x20] sm:$0xff] (%p3664_p7), %v2521_v63 }
 0x6d7   : > { %2458 = vst [vmem:[%s4504_s16 + $0x20] sm:$0xff] %v2440_v16  ;;  %v2443_v56 = vadd.f32 %v2688_v35, %v2442_v0  ;;  %v2523_v44 = vld [vmem:[%s4504_s16 + $0x18] sm:$0xff] (%p3664_p7)  ;;  %2518 = vst [vmem:[%s2475_s21] sm:$0xff] (%p3664_p7), %v2517_v30 }
 0x6d8   : > { %2461 = vst [vmem:[%s4504_s16 + $0x38] sm:$0xff] %v2451_v7  ;;  %v2519_v54 = vld [vmem:[%s4504_s16 + $0x8] sm:$0xff] (%p3664_p7)  ;;  %2524 = vst [vmem:[%s2475_s21 + $0x30] sm:$0xff] (%p3664_p7), %v2523_v44 }
 0x6d9   : > { %2459 = vst [vmem:[%s4504_s16 + $0x28] sm:$0xff] %v2443_v56  ;;  %2520 = vst [vmem:[%s2475_s21 + $0x10] sm:$0xff] (%p3664_p7), %v2519_v54 }
 0x6dd   : > { %v2529_v8 = vld [vmem:[%s4504_s16 + $0x30] sm:$0xff] }
 0x6de   : > { %v2525_v58 = vld [vmem:[%s4504_s16 + $0x20] sm:$0xff]  ;;  %2530 = vst [vmem:[%s2475_s21 + $0x60] sm:$0xff] %v2529_v8 }
 0x6df   : > { %v2531_v42 = vld [vmem:[%s4504_s16 + $0x38] sm:$0xff]  ;;  %2526 = vst [vmem:[%s2475_s21 + $0x40] sm:$0xff] %v2525_v58 }
 0x6e0   : > { %v2527_v29 = vld [vmem:[%s4504_s16 + $0x28] sm:$0xff]  ;;  %2532 = vst [vmem:[%s2475_s21 + $0x70] sm:$0xff] %v2531_v42 }
 0x6e1   : > { %2528 = vst [vmem:[%s2475_s21 + $0x50] sm:$0xff] %v2527_v29 }
 0x6e2 PF: > { %s17_s9 = sadd.s32 1, %s3556_s9   ;;  %s4571_s14 = sld [smem:[#allocation4_spill]] }
 0x6e3   : > { %p14_p13 = scmp.ge.s32.totalorder %s17_s9, 10   ;;  %s4572_s11 = sld [smem:[#allocation5_spill]] }
 0x6e4   : > { %s4573_s24 = smov %s3528_s25  ;;  %s4574_s25 = smov %s3678_s22 }
 0x6e5   : > { %s4575_s26 = smov %s3544_s29  ;;  %s4576_s27 = smov %s3548_s30 }
 0x6e6   : > { %s4577_s28 = smov %s3552_s8  ;;  %s4578_s29 = smov %s4582_s10 }
 0x6e7   :  { %16 = sbr.rel (!%p14_p13) target bundleno = 5 (0x5), region = 159 }
 0x6e8   : > { %s4579_s30 = smov %s4571_s14 }
 0x6e9   : > { %s4580_s8 = smov %s4572_s11 }

// kernel: multi_branch_block.3
= control target key start
LH: loop header
LB: loop body
LE: loop exit
PB: predicated region body
PF: predicated region fallthrough
CT: control target
= control target key end

     0   :  { %s3680_s18 = smov 0   ;;  %s3682_s19 = smov 0   ;;  %s5169_s0 = inlined_call_operand.vmem [shape: f32[2,2,10,18,128], index: 0, kind: input, shape index: {}]   ;;  %s5170_s1 = inlined_call_operand.vmem [shape: f32[2,16,16,128], index: 1, kind: input, shape index: {}]   ;;  %s5171_s2 = inlined_call_operand.vmem [shape: f32[3,3,128], index: 2, kind: input, shape index: {}]   ;;  %s5172_s3 = inlined_call_operand.vmem [shape: f32[1,128], index: 3, kind: input, shape index: {}]   ;;  %s5173_s4 = inlined_call_operand.vmem [shape: bf16[128,128], index: 4, kind: input, shape index: {}]   ;;  %s5174_s5 = inlined_call_operand.vmem [shape: f32[1,128], index: 5, kind: input, shape index: {}]   ;;  %s5175_s6 = inlined_call_operand.vmem [shape: f32[1,128], index: 6, kind: input, shape index: {}]   ;;  %s5176_s7 = inlined_call_operand.vmem [shape: f32[1,128], index: 7, kind: input, shape index: {}]   ;;  %s5177_s8 = inlined_call_operand.vmem [shape: f32[1,128], index: 8, kind: input, shape index: {}]   ;;  %s5178_s9 = inlined_call_operand.vmem [shape: f32[1,128], index: 9, kind: input, shape index: {}]   ;;  %s5179_s10 = inlined_call_operand.vmem [shape: bf16[128,128], index: 10, kind: input, shape index: {}]   ;;  %s5180_s11 = inlined_call_operand.vmem [shape: bf16[128,128], index: 11, kind: input, shape index: {}]   ;;  %s5181_s12 = inlined_call_operand.vmem [shape: f32[1,128], index: 12, kind: input, shape index: {}]   ;;  %s5182_s13 = inlined_call_operand.vmem [shape: bf16[128,128], index: 13, kind: input, shape index: {}]   ;;  %s5183_s14 = inlined_call_operand.vmem [shape: f32[1,128], index: 14, kind: input, shape index: {}]   ;;  %s5184_s15 = inlined_call_operand.vmem [shape: f32[2,16,16,128], index: 15, kind: output, shape index: {}]  }
   0x1   :  { %s3684_s20 = smov 0   ;;  %s3686_s21 = smov 0  }
   0x2   :  { %s3688_s22 = smov 0  }
   0x3 LB: > { %5196 = sst [smem:[#allocation2_spill]] %s3590_s20  ;;  %s34_s23 = sadd.s32 1, %s3590_s20  ;;  %s3598_s22 = sphi %s3688_s22, %s25_s22   ;;  %s3594_s21 = sphi %s3686_s21, %s5233_s21   ;;  %s3590_s20 = sphi %s3684_s20, %s5232_s20   ;;  %s3586_s19 = sphi %s3682_s19, %s5231_s19   ;;  %s3582_s18 = sphi %s3680_s18, %s5230_s18  }
   0x4   : > { %5197 = sst [smem:[#allocation3_spill]] %s3594_s21  ;;  %s37_s24 = sadd.s32 1, %s3594_s21 }
   0x5   : > { %5198 = sst [smem:[#allocation4_spill]] %s3598_s22  ;;  %p35_p0 = scmp.ge.s32.totalorder %s34_s23, 2 }
   0x6   : > { %p3077_p1 = scmp.ge.s32.totalorder %s3598_s22, 1  ;;  %p475_p2 = scmp.lt.s32.totalorder %s3598_s22, 5 }
   0x7   : > { %s5235_s23 = smov (%p35_p0, %s34_s23), 0  ;;  %s5237_s24 = smov (!%p35_p0, %s37_s24), %s3594_s21 }
   0x8   : > { %5199 = sst [smem:[#allocation5_spill]] %s5235_s23  ;;  %p476_p3 = pnand %p3077_p1, %p475_p2 }
   0x9   : > { %p39_p4 = scmp.ge.s32.totalorder %s5237_s24, 2 }
   0xa   : > { %479 = sbr.rel (%p476_p3) target bundleno = 1106 (0x452), region = 80 }
   0xb   : > { %s5239_s24 = smov (%p39_p4, %s5237_s24), 0 }
   0xc   : > { %5200 = sst [smem:[#allocation6_spill]] %s5239_s24 }
  0x11   : > { %v3394_v0 = vld [vmem:[%s5173_s4] sm:$0xff]   ;;  %p542_p5 = scmp.lt.s32.totalorder %s3586_s19, 1  ;;  %v3395_v1 = vld [vmem:[%s5173_s4 + $0x8] sm:$0xff]   ;;  %p544_p6 = scmp.lt.s32.totalorder %s3582_s18, 1  ;;  %v3396_v2 = vld [vmem:[%s5173_s4 + $0x10] sm:$0xff]   ;;  %vm694_vm0 = vcmask 1046528  }
  0x12   : > { %3208 = vmatprep.subr.bf16.mxu0 %v3394_v0  ;;  %v3397_v3 = vld [vmem:[%s5173_s4 + $0x18] sm:$0xff]   ;;  %v3732_v4 = vld [vmem:[%s5171_s2] ss:$0 sm:$0xff]  ;;  %v3737_v5 = vld [vmem:[%s5171_s2 + $0x1] ss:$0 sm:$0xff]  ;;  %vm820_vm1 = vcmask 1045504  }
  0x13   : > { %s5241_s19 = smov (!%p542_p5, %s3586_s19), 1  ;;  %3209 = vmatpush3.bf16.msra.mxu0 %v3394_v0  ;;  %v3747_v6 = vld [vmem:[%s5171_s2 + $0x2] ss:$0 sm:$0xff]  ;;  %v3752_v7 = vld [vmem:[%s5171_s2 + $0x4] ss:$0 sm:$0xff]  ;;  %v3399_v37 = vld [vmem:[%s5173_s4 + $0x28] sm:$0xff]  }
  0x14   : > { %s545_s29 = scalar_select %p544_p6, %s3582_s18, 1  ;;  %3210 = vmatprep.subr.bf16.mxu0 %v3395_v1  ;;  %v3398_v11 = vld [vmem:[%s5173_s4 + $0x20] sm:$0xff]   ;;  %v3807_v42 = vld [vmem:[%s5171_s2 + $0x8] ss:$0 sm:$0xff]  ;;  %v3821_v52 = vld [vmem:[%s5171_s2 + $0x9] ss:$0 sm:$0xff] }
  0x15   : > { %s3353_s17 = smul.u32 60, %s5241_s19  ;;  %v3777_v22 = vld [vmem:[%s5171_s2 + $0x5] ss:$0 sm:$0xff]  ;;  %v3796_v36 = vld [vmem:[%s5171_s2 + $0x6] ss:$0 sm:$0xff]  ;;  %v3400_v53 = vld [vmem:[%s5173_s4 + $0x30] sm:$0xff]  }
  0x16   : > { %s3352_s25 = smul.u32 30, %s545_s29  ;;  %v3836_v63 = vld [vmem:[%s5171_s2 + $0xa] ss:$0 sm:$0xff] }
  0x17   : > { %3211 = vmatpush3.bf16.msra.mxu0 %v3395_v1 }
  0x18   : > { %s548_s26 = sadd.s32 %s3353_s17, %s3352_s25  ;;  %3212 = vmatprep.subr.bf16.mxu0 %v3396_v2  ;;  %s3079_s17 = sshll.u32 %s3582_s18, 3 }
  0x19   : > { %s3078_s28 = sshll.u32 %s548_s26, 3  ;;  %p554_p7 = scmp.lt.s32.totalorder %s3079_s17, 15 }
  0x1a   : > { %s3742_s16 = scalar_lea.vmem %s5169_s0, %s3078_s28  ;;  %s3081_s18 = sshll.u32 %s5241_s19, 5 }
  0x1b   : > { %v574_v8 = vld [vmem:[%s3742_s16] sm:$0xff]  ;;  %v575_v9 = vld [vmem:[%s3742_s16 + $0x8] sm:$0xff]  ;;  %v576_v10 = vld [vmem:[%s3742_s16 + $0x10] sm:$0x3]  ;;  %3213 = vmatpush3.bf16.msra.mxu0 %v3396_v2  ;;  %s5243_s17 = smov (!%p554_p7, %s3079_s17), 15 }
  0x1c   : > { %v609_v12 = vmul.f32 %v3732_v4, %v574_v8  ;;  %v610_v13 = vmul.f32 %v3732_v4, %v575_v9  ;;  %v646_v14 = vmul.f32 %v3737_v5, %v574_v8  ;;  %v647_v15 = vmul.f32 %v3737_v5, %v575_v9  ;;  %3214 = vmatprep.subr.bf16.mxu0 %v3397_v3  ;;  %v3765_v16 = vld [vmem:[%s3742_s16 + $0x18] sm:$0xff]  ;;  %v3768_v17 = vld [vmem:[%s3742_s16 + $0x20] sm:$0xff]  ;;  %v3784_v27 = vld [vmem:[%s3742_s16 + $0x28] sm:$0x3]  ;;  %s3080_s19 = sshll.u32 %s5243_s17, 1 }
  0x1d   : > { %v648_v18 = vmul.f32 %v3737_v5, %v576_v10  ;;  %v772_v19 = vmul.f32 %v3747_v6, %v574_v8  ;;  %v773_v20 = vmul.f32 %v3747_v6, %v575_v9  ;;  %v774_v21 = vmul.f32 %v3747_v6, %v576_v10  ;;  %v3810_v47 = vld [vmem:[%s3742_s16 + $0x30] sm:$0xff]  ;;  %v3831_v58 = vld [vmem:[%s3742_s16 + $0x38] sm:$0xff]  ;;  %v3839_v0 = vld [vmem:[%s3742_s16 + $0x40] sm:$0x3]  ;;  %s4049_s25 = sadd.s32 %s3081_s18, %s3080_s19 }
  0x1e   : > { %v695_v23 = vrot.slane %v646_v14, 1  ;;  %v696_v24 = vrot.slane %v647_v15, 1  ;;  %v899_v25 = vmul.f32 %v3752_v7, %v3765_v16  ;;  %v900_v26 = vmul.f32 %v3752_v7, %v3768_v17  ;;  %s3082_s21 = sshll.u32 %s4049_s25, 3 }
  0x1f   : > { %v698_v28 = vrot.slane %v648_v18, 1  ;;  %v821_v29 = vrot.slane %v772_v19, 2  ;;  %v822_v30 = vrot.slane %v773_v20, 2  ;;  %v824_v31 = vrot.slane %v774_v21, 2  ;;  %3215 = vmatpush3.bf16.msra.mxu0 %v3397_v3  ;;  %v3401_v19 = vld [vmem:[%s5173_s4 + $0x38] sm:$0xff]   ;;  %s4068_s22 = scalar_lea.vmem %s5170_s1, %s3082_s21  ;;  %s5089_s28 = scalar_lea.vmem %s5184_s15, %s3082_s21 }
  0x20   : > { %v697_v32 = vsel %vm694_vm0, %v695_v23, %v696_v24  ;;  %v936_v33 = vmul.f32 %v3777_v22, %v3765_v16  ;;  %v937_v34 = vmul.f32 %v3777_v22, %v3768_v17  ;;  %v938_v35 = vmul.f32 %v3777_v22, %v3784_v27  ;;  %3216 = vmatprep.subr.bf16.mxu0 %v3398_v11 }
  0x21   : > { %v699_v38 = vsel %vm694_vm0, %v696_v24, %v698_v28  ;;  %v751_v39 = vadd.f32 %v697_v32, %v609_v12  ;;  %v823_v40 = vsel %vm820_vm1, %v821_v29, %v822_v30  ;;  %v825_v41 = vsel %vm820_vm1, %v822_v30, %v824_v31 }
  0x22   : > { %v752_v43 = vadd.f32 %v699_v38, %v610_v13  ;;  %v984_v44 = vrot.slane %v936_v33, 1  ;;  %v985_v45 = vrot.slane %v937_v34, 1  ;;  %v987_v46 = vrot.slane %v938_v35, 1  ;;  %v3867_v35 = vld [vmem:[%s5172_s3] ss:$0 sm:$0xff] }
  0x23   : > { %v877_v48 = vadd.f32 %v823_v40, %v751_v39  ;;  %v1061_v49 = vmul.f32 %v3796_v36, %v3765_v16  ;;  %v1062_v50 = vmul.f32 %v3796_v36, %v3768_v17  ;;  %v1063_v51 = vmul.f32 %v3796_v36, %v3784_v27  ;;  %3217 = vmatpush3.bf16.msra.mxu0 %v3398_v11 }
  0x24   : > { %v878_v54 = vadd.f32 %v825_v41, %v752_v43  ;;  %v986_v55 = vsel %vm694_vm0, %v984_v44, %v985_v45  ;;  %v988_v56 = vsel %vm694_vm0, %v985_v45, %v987_v46  ;;  %v1187_v57 = vmul.f32 %v3807_v42, %v3810_v47  ;;  %3218 = vmatprep.subr.bf16.mxu0 %v3399_v37 }
  0x25   : > { %v915_v59 = vadd.f32 %v899_v25, %v877_v48  ;;  %v1109_v60 = vrot.slane %v1061_v49, 2  ;;  %v1110_v61 = vrot.slane %v1062_v50, 2  ;;  %v1112_v62 = vrot.slane %v1063_v51, 2 }
  0x26   : > { %v916_v1 = vadd.f32 %v900_v26, %v878_v54  ;;  %v1188_v2 = vmul.f32 %v3807_v42, %v3831_v58  ;;  %v1224_v3 = vmul.f32 %v3821_v52, %v3810_v47  ;;  %v1225_v8 = vmul.f32 %v3821_v52, %v3831_v58 }
  0x27   : > { %v1040_v9 = vadd.f32 %v986_v55, %v915_v59  ;;  %v1111_v10 = vsel %vm820_vm1, %v1109_v60, %v1110_v61  ;;  %v1113_v11 = vsel %vm820_vm1, %v1110_v61, %v1112_v62  ;;  %v1226_v12 = vmul.f32 %v3821_v52, %v3839_v0  ;;  %3219 = vmatpush3.bf16.msra.mxu0 %v3399_v37 }
  0x28   : > { %v1041_v13 = vadd.f32 %v988_v56, %v916_v1  ;;  %v1272_v14 = vrot.slane %v1224_v3, 1  ;;  %v1273_v15 = vrot.slane %v1225_v8, 1  ;;  %v1349_v18 = vmul.f32 %v3836_v63, %v3810_v47  ;;  %3220 = vmatprep.subr.bf16.mxu0 %v3400_v53 }
  0x29   : > { %v1165_v20 = vadd.f32 %v1111_v10, %v1040_v9  ;;  %v1275_v21 = vrot.slane %v1226_v12, 1  ;;  %v1350_v23 = vmul.f32 %v3836_v63, %v3831_v58  ;;  %v1351_v24 = vmul.f32 %v3836_v63, %v3839_v0  ;;  %v3896_v9 = vld [vmem:[%s3742_s16 + $0x48] sm:$0xff] }
  0x2a   : > { %v1166_v25 = vadd.f32 %v1113_v11, %v1041_v13  ;;  %v1274_v26 = vsel %vm694_vm0, %v1272_v14, %v1273_v15  ;;  %v1397_v28 = vrot.slane %v1349_v18, 2  ;;  %v611_v29 = vmul.f32 %v3732_v4, %v3765_v16  ;;  %v3904_v14 = vld [vmem:[%s3742_s16 + $0x50] sm:$0xff] }
  0x2b   : > { %v1203_v30 = vadd.f32 %v1187_v57, %v1165_v20  ;;  %v1276_v31 = vsel %vm694_vm0, %v1273_v15, %v1275_v21  ;;  %v1398_v32 = vrot.slane %v1350_v23, 2  ;;  %v1400_v33 = vrot.slane %v1351_v24, 2  ;;  %3221 = vmatpush3.bf16.msra.mxu0 %v3400_v53  ;;  %v3912_v23 = vld [vmem:[%s3742_s16 + $0x58] sm:$0x3] }
  0x2c   : > { %v1204_v34 = vadd.f32 %v1188_v2, %v1166_v25  ;;  %v612_v37 = vmul.f32 %v3732_v4, %v3768_v17  ;;  %v649_v38 = vmul.f32 %v3737_v5, %v3765_v16  ;;  %v650_v39 = vmul.f32 %v3737_v5, %v3768_v17  ;;  %3222 = vmatprep.subr.bf16.mxu0 %v3401_v19 }
  0x2d   : > { %v1328_v40 = vadd.f32 %v1274_v26, %v1203_v30  ;;  %v1399_v41 = vsel %vm820_vm1, %v1397_v28, %v1398_v32  ;;  %v1401_v43 = vsel %vm820_vm1, %v1398_v32, %v1400_v33  ;;  %v651_v44 = vmul.f32 %v3737_v5, %v3784_v27 }
  0x2e   : > { %v1329_v45 = vadd.f32 %v1276_v31, %v1204_v34  ;;  %v700_v46 = vrot.slane %v649_v38, 1  ;;  %v701_v48 = vrot.slane %v650_v39, 1  ;;  %v775_v49 = vmul.f32 %v3747_v6, %v3765_v16 }
  0x2f   : > { %v1453_v50 = vadd.f32 %v1399_v41, %v1328_v40  ;;  %v703_v51 = vrot.slane %v651_v44, 1  ;;  %v776_v53 = vmul.f32 %v3747_v6, %v3768_v17  ;;  %v777_v54 = vmul.f32 %v3747_v6, %v3784_v27  ;;  %3223 = vmatpush3.bf16.msra.mxu0 %v3401_v19 }
  0x30   : > { %v1454_v55 = vadd.f32 %v1401_v43, %v1329_v45  ;;  %v702_v56 = vsel %vm694_vm0, %v700_v46, %v701_v48  ;;  %v826_v57 = vrot.slane %v775_v49, 2  ;;  %v901_v59 = vmul.f32 %v3752_v7, %v3810_v47 }
  0x31   : > { %v1476_v16 = vadd.f32 %v3867_v35, %v1453_v50  ;;  %v704_v60 = vsel %vm694_vm0, %v701_v48, %v703_v51  ;;  %v753_v61 = vadd.f32 %v702_v56, %v611_v29  ;;  %v827_v62 = vrot.slane %v776_v53, 2 }
  0x32   : > { %v1477_v17 = vadd.f32 %v3867_v35, %v1454_v55  ;;  %v754_v1 = vadd.f32 %v704_v60, %v612_v37  ;;  %v829_v27 = vrot.slane %v777_v54, 2  ;;  %v902_v2 = vmul.f32 %v3752_v7, %v3831_v58 }
  0x33   : > { %v3893_v3 = vmul.f32 0.5, %v1476_v16  ;;  %v1508_v8 = vmul.f32 0.70710677, %v1476_v16  ;;  %v828_v10 = vsel %vm820_vm1, %v826_v57, %v827_v62  ;;  %v939_v11 = vmul.f32 %v3777_v22, %v3810_v47 }
  0x34   : > { %v3901_v12 = vmul.f32 0.5, %v1477_v17  ;;  %v1509_v13 = vmul.f32 0.70710677, %v1477_v17  ;;  %v830_v15 = vsel %vm820_vm1, %v827_v62, %v829_v27  ;;  %v879_v18 = vadd.f32 %v828_v10, %v753_v61 }
  0x35   : > { %3426 = verf.f32 %v1508_v8  ;;  %v880_v19 = vadd.f32 %v830_v15, %v754_v1  ;;  %v940_v20 = vmul.f32 %v3777_v22, %v3831_v58  ;;  %v941_v21 = vmul.f32 %v3777_v22, %v3839_v0 }
  0x36   : > { %3428 = verf.f32 %v1509_v13  ;;  %v917_v24 = vadd.f32 %v901_v59, %v879_v18  ;;  %v989_v25 = vrot.slane %v939_v11, 1  ;;  %v1064_v26 = vmul.f32 %v3796_v36, %v3810_v47 }
  0x37   : > { %v918_v28 = vadd.f32 %v902_v2, %v880_v19  ;;  %v990_v29 = vrot.slane %v940_v20, 1  ;;  %v992_v30 = vrot.slane %v941_v21, 1  ;;  %v1065_v31 = vmul.f32 %v3796_v36, %v3831_v58 }
  0x38   : > { %v1066_v32 = vmul.f32 %v3796_v36, %v3839_v0  ;;  %v1114_v33 = vrot.slane %v1064_v26, 2  ;;  %v1189_v34 = vmul.f32 %v3807_v42, %v3896_v9  ;;  %v1190_v37 = vmul.f32 %v3807_v42, %v3904_v14 }
  0x39   : > { %v991_v38 = vsel %vm694_vm0, %v989_v25, %v990_v29  ;;  %v993_v39 = vsel %vm694_vm0, %v990_v29, %v992_v30  ;;  %v1115_v40 = vrot.slane %v1065_v31, 2  ;;  %v1227_v41 = vmul.f32 %v3821_v52, %v3896_v9 }
  0x3a   : > { %v1042_v43 = vadd.f32 %v991_v38, %v917_v24  ;;  %v1043_v44 = vadd.f32 %v993_v39, %v918_v28  ;;  %v1117_v45 = vrot.slane %v1066_v32, 2  ;;  %v1228_v46 = vmul.f32 %v3821_v52, %v3904_v14 }
  0x3b   : > { %v1116_v48 = vsel %vm820_vm1, %v1114_v33, %v1115_v40  ;;  %v1229_v49 = vmul.f32 %v3821_v52, %v3912_v23  ;;  %v1277_v50 = vrot.slane %v1227_v41, 1  ;;  %v1352_v51 = vmul.f32 %v3836_v63, %v3896_v9 }
  0x3c   : > { %v1118_v53 = vsel %vm820_vm1, %v1115_v40, %v1117_v45  ;;  %v1167_v54 = vadd.f32 %v1116_v48, %v1042_v43  ;;  %v1278_v55 = vrot.slane %v1228_v46, 1  ;;  %v1353_v56 = vmul.f32 %v3836_v63, %v3904_v14 }
  0x3d   : > { %v1168_v57 = vadd.f32 %v1118_v53, %v1043_v44  ;;  %v1280_v59 = vrot.slane %v1229_v49, 1  ;;  %v1354_v16 = vmul.f32 %v3836_v63, %v3912_v23  ;;  %v1402_v60 = vrot.slane %v1352_v51, 2 }
  0x3e   : > { %v1205_v61 = vadd.f32 %v1189_v34, %v1167_v54  ;;  %v1279_v62 = vsel %vm694_vm0, %v1277_v50, %v1278_v55  ;;  %v1403_v17 = vrot.slane %v1353_v56, 2  ;;  %v613_v1 = vmul.f32 %v3732_v4, %v3810_v47 }
  0x3f   : > { %v3427_v27 = vpop.eup %3426  ;;  %v1206_v2 = vadd.f32 %v1190_v37, %v1168_v57  ;;  %v1281_v8 = vsel %vm694_vm0, %v1278_v55, %v1280_v59  ;;  %v1405_v10 = vrot.slane %v1354_v16, 2  ;;  %v614_v11 = vmul.f32 %v3732_v4, %v3831_v58 }
  0x40   : > { %v3429_v13 = vpop.eup %3428  ;;  %v1540_v15 = vadd.f32 1.0, %v3427_v27  ;;  %v1330_v18 = vadd.f32 %v1279_v62, %v1205_v61  ;;  %v1404_v19 = vsel %vm820_vm1, %v1402_v60, %v1403_v17  ;;  %v652_v20 = vmul.f32 %v3737_v5, %v3810_v47 }
  0x41   : > { %v1541_v21 = vadd.f32 1.0, %v3429_v13  ;;  %v1331_v24 = vadd.f32 %v1281_v8, %v1206_v2  ;;  %v1406_v25 = vsel %vm820_vm1, %v1403_v17, %v1405_v10  ;;  %v653_v26 = vmul.f32 %v3737_v5, %v3831_v58  ;;  %v3987_v2 = vld [vmem:[%s3742_s16 + $0x60] sm:$0xff] }
  0x42   : > { %v1556_v28 = vmul.f32 %v1540_v15, %v3893_v3  ;;  %v1455_v29 = vadd.f32 %v1404_v19, %v1330_v18  ;;  %v654_v30 = vmul.f32 %v3737_v5, %v3839_v0  ;;  %v705_v31 = vrot.slane %v652_v20, 1  ;;  %v3992_v15 = vld [vmem:[%s3742_s16 + $0x68] sm:$0xff] }
  0x43   : > { %v1557_v32 = vmul.f32 %v1541_v21, %v3901_v12  ;;  %v1456_v33 = vadd.f32 %v1406_v25, %v1331_v24  ;;  %v706_v34 = vrot.slane %v653_v26, 1  ;;  %v778_v37 = vmul.f32 %v3747_v6, %v3810_v47 }
  0x44   : > { %v1478_v38 = vadd.f32 %v3867_v35, %v1455_v29  ;;  %v708_v39 = vrot.slane %v654_v30, 1  ;;  %v779_v40 = vmul.f32 %v3747_v6, %v3831_v58  ;;  %v780_v3 = vmul.f32 %v3747_v6, %v3839_v0  ;;  %v4001_v29 = vld [vmem:[%s3742_s16 + $0x70] sm:$0x3] }
  0x45   : > { %v1572_v41 = vpack.c.bf16 %v1557_v32, %v1556_v28  ;;  %v1479_v43 = vadd.f32 %v3867_v35, %v1456_v33  ;;  %v707_v44 = vsel %vm694_vm0, %v705_v31, %v706_v34  ;;  %v831_v12 = vrot.slane %v778_v37, 2 }
  0x46   : > { %v3965_v45 = vmul.f32 0.5, %v1478_v38  ;;  %v1510_v46 = vmul.f32 0.70710677, %v1478_v38  ;;  %v709_v47 = vsel %vm694_vm0, %v706_v34, %v708_v39  ;;  %v755_v48 = vadd.f32 %v707_v44, %v613_v1 }
  0x47   : > { %3224 = vmatprep.mubr.bf16.mxu0 %v1572_v41  ;;  %v3968_v49 = vmul.f32 0.5, %v1479_v43  ;;  %v1511_v50 = vmul.f32 0.70710677, %v1479_v43  ;;  %v756_v58 = vadd.f32 %v709_v47, %v614_v11  ;;  %v832_v51 = vrot.slane %v779_v40, 2 }
  0x48   : > { %3430 = verf.f32 %v1510_v46  ;;  %v834_v0 = vrot.slane %v780_v3, 2  ;;  %v903_v53 = vmul.f32 %v3752_v7, %v3896_v9  ;;  %v904_v54 = vmul.f32 %v3752_v7, %v3904_v14 }
  0x49   : > { %3432 = verf.f32 %v1511_v50  ;;  %v833_v55 = vsel %vm820_vm1, %v831_v12, %v832_v51  ;;  %v942_v56 = vmul.f32 %v3777_v22, %v3896_v9  ;;  %v943_v57 = vmul.f32 %v3777_v22, %v3904_v14 }
  0x4a   : > { %v835_v59 = vsel %vm820_vm1, %v832_v51, %v834_v0  ;;  %v881_v16 = vadd.f32 %v833_v55, %v755_v48  ;;  %v944_v60 = vmul.f32 %v3777_v22, %v3912_v23  ;;  %v1067_v61 = vmul.f32 %v3796_v36, %v3896_v9 }
  0x4b   : > { %v882_v62 = vadd.f32 %v835_v59, %v756_v58  ;;  %v994_v17 = vrot.slane %v942_v56, 1  ;;  %v995_v1 = vrot.slane %v943_v57, 1  ;;  %v1068_v27 = vmul.f32 %v3796_v36, %v3904_v14 }
  0x4c   : > { %v919_v8 = vadd.f32 %v903_v53, %v881_v16  ;;  %v997_v10 = vrot.slane %v944_v60, 1  ;;  %v1069_v11 = vmul.f32 %v3796_v36, %v3912_v23  ;;  %v1119_v13 = vrot.slane %v1067_v61, 2 }
  0x4d   : > { %v920_v18 = vadd.f32 %v904_v54, %v882_v62  ;;  %v996_v19 = vsel %vm694_vm0, %v994_v17, %v995_v1  ;;  %v1120_v20 = vrot.slane %v1068_v27, 2  ;;  %v1191_v21 = vmul.f32 %v3807_v42, %v3987_v2 }
  0x4e   : > { %v998_v24 = vsel %vm694_vm0, %v995_v1, %v997_v10  ;;  %v1044_v25 = vadd.f32 %v996_v19, %v919_v8  ;;  %v1122_v26 = vrot.slane %v1069_v11, 2  ;;  %v1192_v28 = vmul.f32 %v3807_v42, %v3992_v15 }
  0x4f   : > { %v1045_v30 = vadd.f32 %v998_v24, %v920_v18  ;;  %v1121_v31 = vsel %vm820_vm1, %v1119_v13, %v1120_v20  ;;  %v1230_v32 = vmul.f32 %v3821_v52, %v3987_v2  ;;  %v1231_v33 = vmul.f32 %v3821_v52, %v3992_v15 }
  0x50   : > { %v1123_v34 = vsel %vm820_vm1, %v1120_v20, %v1122_v26  ;;  %v1169_v37 = vadd.f32 %v1121_v31, %v1044_v25  ;;  %v1232_v38 = vmul.f32 %v3821_v52, %v4001_v29  ;;  %v1355_v39 = vmul.f32 %v3836_v63, %v3987_v2 }
  0x51   : > { %v1170_v40 = vadd.f32 %v1123_v34, %v1045_v30  ;;  %v1282_v3 = vrot.slane %v1230_v32, 1  ;;  %v1283_v41 = vrot.slane %v1231_v33, 1  ;;  %v1356_v43 = vmul.f32 %v3836_v63, %v3992_v15 }
  0x52   : > { %v3431_v44 = vpop.eup %3430  ;;  %v1207_v12 = vadd.f32 %v1191_v21, %v1169_v37  ;;  %v1285_v46 = vrot.slane %v1232_v38, 1  ;;  %v1357_v47 = vmul.f32 %v3836_v63, %v4001_v29  ;;  %v1407_v48 = vrot.slane %v1355_v39, 2 }
  0x53   : > { %v3433_v50 = vpop.eup %3432  ;;  %v1542_v58 = vadd.f32 1.0, %v3431_v44  ;;  %v1208_v51 = vadd.f32 %v1192_v28, %v1170_v40  ;;  %v1284_v0 = vsel %vm694_vm0, %v1282_v3, %v1283_v41  ;;  %v1408_v53 = vrot.slane %v1356_v43, 2 }
  0x54   : > { %v1543_v54 = vadd.f32 1.0, %v3433_v50  ;;  %v1286_v55 = vsel %vm694_vm0, %v1283_v41, %v1285_v46  ;;  %v1332_v56 = vadd.f32 %v1284_v0, %v1207_v12  ;;  %v1410_v57 = vrot.slane %v1357_v47, 2  ;;  %v4071_v12 = vld [vmem:[%s3742_s16 + $0x78] sm:$0xff]  ;;  %v4085_v0 = vld [vmem:[%s3742_s16 + $0x80] sm:$0xff] }
  0x55   : > { %v1558_v59 = vmul.f32 %v1542_v58, %v3965_v45  ;;  %v1333_v16 = vadd.f32 %v1286_v55, %v1208_v51  ;;  %v1409_v60 = vsel %vm820_vm1, %v1407_v48, %v1408_v53  ;;  %v615_v61 = vmul.f32 %v3732_v4, %v3896_v9  ;;  %v4079_v58 = vld [vmem:[%s4068_s22] sm:$0xff]  ;;  %v4082_v51 = vld [vmem:[%s4068_s22 + $0x10] sm:$0xff] }
  0x56   : > { %v1559_v62 = vmul.f32 %v1543_v54, %v3968_v49  ;;  %v1411_v17 = vsel %vm820_vm1, %v1408_v53, %v1410_v57  ;;  %v1457_v1 = vadd.f32 %v1409_v60, %v1332_v56  ;;  %v616_v27 = vmul.f32 %v3732_v4, %v3904_v14  ;;  %1876 = vadd.xlane.f32.xlu1 %v4079_v58  ;;  %v4090_v57 = vld [vmem:[%s3742_s16 + $0x88] sm:$0x3] }
  0x57   : > { %v1458_v8 = vadd.f32 %v1411_v17, %v1333_v16  ;;  %v655_v45 = vmul.f32 %v3737_v5, %v3896_v9  ;;  %v656_v10 = vmul.f32 %v3737_v5, %v3904_v14  ;;  %v657_v11 = vmul.f32 %v3737_v5, %v3912_v23  ;;  %1880 = vadd.xlane.f32.xlu0 %v4082_v51 }
  0x58   : > { %v1573_v13 = vpack.c.bf16 %v1559_v62, %v1558_v59  ;;  %v1480_v49 = vadd.f32 %v3867_v35, %v1457_v1  ;;  %v781_v18 = vmul.f32 %v3747_v6, %v3896_v9  ;;  %v782_v19 = vmul.f32 %v3747_v6, %v3904_v14  ;;  %v4095_v62 = vld [vmem:[%s4068_s22 + $0x8] sm:$0xff] }
  0x59   : > { %v1481_v20 = vadd.f32 %v3867_v35, %v1458_v8  ;;  %v710_v21 = vrot.slane %v655_v45, 1  ;;  %v711_v24 = vrot.slane %v656_v10, 1  ;;  %v713_v25 = vrot.slane %v657_v11, 1 }
  0x5a   : > { %3225 = vmatmul.mubr.bf16.vlgmr.msra.gmra.mrb[0].mxu0 %v1573_v13  ;;  %v4041_v26 = vmul.f32 0.5, %v1480_v49  ;;  %v1512_v28 = vmul.f32 0.70710677, %v1480_v49  ;;  %v783_v30 = vmul.f32 %v3747_v6, %v3912_v23  ;;  %v836_v31 = vrot.slane %v781_v18, 2  ;;  %1878 = vadd.xlane.f32.xlu1 %v4095_v62 }
  0x5b   : > { %v4045_v32 = vmul.f32 0.5, %v1481_v20  ;;  %v1513_v9 = vmul.f32 0.70710677, %v1481_v20  ;;  %v712_v14 = vsel %vm694_vm0, %v710_v21, %v711_v24  ;;  %v714_v33 = vsel %vm694_vm0, %v711_v24, %v713_v25 }
  0x5c   : > { %3434 = verf.f32 %v1512_v28  ;;  %v757_v34 = vadd.f32 %v712_v14, %v615_v61  ;;  %v758_v37 = vadd.f32 %v714_v33, %v616_v27  ;;  %v837_v38 = vrot.slane %v782_v19, 2 }
  0x5d   : > { %3436 = verf.f32 %v1513_v9  ;;  %v839_v23 = vrot.slane %v783_v30, 2  ;;  %v905_v39 = vmul.f32 %v3752_v7, %v3987_v2  ;;  %v906_v40 = vmul.f32 %v3752_v7, %v3992_v15  ;;  %v4117_v30 = vld [vmem:[%s4068_s22 + $0x18] sm:$0xff] }
  0x5e   : > { %v838_v3 = vsel %vm820_vm1, %v836_v31, %v837_v38  ;;  %v945_v41 = vmul.f32 %v3777_v22, %v3987_v2  ;;  %v946_v43 = vmul.f32 %v3777_v22, %v3992_v15  ;;  %v947_v44 = vmul.f32 %v3777_v22, %v4001_v29  ;;  %1882 = vadd.xlane.f32.xlu1 %v4117_v30 }
  0x5f   : > { %v840_v46 = vsel %vm820_vm1, %v837_v38, %v839_v23  ;;  %v883_v47 = vadd.f32 %v838_v3, %v757_v34  ;;  %v1070_v48 = vmul.f32 %v3796_v36, %v3987_v2  ;;  %v1071_v50 = vmul.f32 %v3796_v36, %v3992_v15 }
  0x60   : > { %v884_v53 = vadd.f32 %v840_v46, %v758_v37  ;;  %v999_v54 = vrot.slane %v945_v41, 1  ;;  %v1000_v55 = vrot.slane %v946_v43, 1  ;;  %v1002_v56 = vrot.slane %v947_v44, 1 }
  0x61   : > { %v921_v59 = vadd.f32 %v905_v39, %v883_v47  ;;  %v1072_v16 = vmul.f32 %v3796_v36, %v4001_v29  ;;  %v1124_v60 = vrot.slane %v1070_v48, 2  ;;  %v1125_v61 = vrot.slane %v1071_v50, 2 }
  0x62   : > { %v922_v17 = vadd.f32 %v906_v40, %v884_v53  ;;  %v1001_v1 = vsel %vm694_vm0, %v999_v54, %v1000_v55  ;;  %v1003_v27 = vsel %vm694_vm0, %v1000_v55, %v1002_v56  ;;  %v1193_v8 = vmul.f32 %v3807_v42, %v4071_v12 }
  0x63   : > { %v1046_v45 = vadd.f32 %v1001_v1, %v921_v59  ;;  %v1126_v10 = vsel %vm820_vm1, %v1124_v60, %v1125_v61  ;;  %v1127_v11 = vrot.slane %v1072_v16, 2  ;;  %v1194_v13 = vmul.f32 %v3807_v42, %v4085_v0 }
  0x64   : > { %v1047_v49 = vadd.f32 %v1003_v27, %v922_v17  ;;  %v1233_v18 = vmul.f32 %v3821_v52, %v4071_v12  ;;  %v1234_v19 = vmul.f32 %v3821_v52, %v4085_v0  ;;  %v1235_v20 = vmul.f32 %v3821_v52, %v4090_v57 }
  0x65   : > { %v1128_v21 = vsel %vm820_vm1, %v1125_v61, %v1127_v11  ;;  %v1171_v24 = vadd.f32 %v1126_v10, %v1046_v45  ;;  %v1358_v25 = vmul.f32 %v3836_v63, %v4071_v12  ;;  %v1359_v28 = vmul.f32 %v3836_v63, %v4085_v0 }
  0x66   : > { %v3435_v31 = vpop.eup %3434  ;;  %v1172_v9 = vadd.f32 %v1128_v21, %v1047_v49  ;;  %v1287_v14 = vrot.slane %v1233_v18, 1  ;;  %v1288_v33 = vrot.slane %v1234_v19, 1  ;;  %v1290_v34 = vrot.slane %v1235_v20, 1 }
  0x67   : > { %v3437_v37 = vpop.eup %3436  ;;  %v1544_v38 = vadd.f32 1.0, %v3435_v31  ;;  %v1209_v23 = vadd.f32 %v1193_v8, %v1171_v24  ;;  %v1360_v39 = vmul.f32 %v3836_v63, %v4090_v57  ;;  %v1412_v40 = vrot.slane %v1358_v25, 2 }
  0x68   : > { %v1545_v3 = vadd.f32 1.0, %v3437_v37  ;;  %v1210_v41 = vadd.f32 %v1194_v13, %v1172_v9  ;;  %v1289_v43 = vsel %vm694_vm0, %v1287_v14, %v1288_v33  ;;  %v1291_v44 = vsel %vm694_vm0, %v1288_v33, %v1290_v34 }
  0x69   : > { %v1560_v46 = vmul.f32 %v1544_v38, %v4041_v26  ;;  %v1334_v47 = vadd.f32 %v1289_v43, %v1209_v23  ;;  %v1413_v48 = vrot.slane %v1359_v28, 2  ;;  %v1415_v50 = vrot.slane %v1360_v39, 2 }
  0x6a   : > { %v1561_v53 = vmul.f32 %v1545_v3, %v4045_v32  ;;  %v1335_v54 = vadd.f32 %v1291_v44, %v1210_v41  ;;  %v617_v55 = vmul.f32 %v3732_v4, %v3987_v2  ;;  %v618_v56 = vmul.f32 %v3732_v4, %v3992_v15 }
  0x6b   : > { %v1414_v59 = vsel %vm820_vm1, %v1412_v40, %v1413_v48  ;;  %v1416_v16 = vsel %vm820_vm1, %v1413_v48, %v1415_v50  ;;  %v658_v60 = vmul.f32 %v3737_v5, %v3987_v2  ;;  %v659_v26 = vmul.f32 %v3737_v5, %v3992_v15 }
  0x6c   : > { %v1574_v61 = vpack.c.bf16 %v1561_v53, %v1560_v46  ;;  %v1459_v17 = vadd.f32 %v1414_v59, %v1334_v47  ;;  %v1460_v32 = vadd.f32 %v1416_v16, %v1335_v54  ;;  %v660_v1 = vmul.f32 %v3737_v5, %v4001_v29  ;;  %v4174_v47 = vld [vmem:[%s3742_s16 + $0x98] sm:$0xff]  ;;  %v4182_v16 = vld [vmem:[%s3742_s16 + $0xa0] sm:$0x3] }
  0x6d   : > { %v715_v27 = vrot.slane %v658_v60, 1  ;;  %v716_v8 = vrot.slane %v659_v26, 1  ;;  %v784_v45 = vmul.f32 %v3747_v6, %v3987_v2  ;;  %v785_v10 = vmul.f32 %v3747_v6, %v3992_v15 }
  0x6e   : > { %3228 = vmatprep.mubr.bf16.mxu0 %v1574_v61  ;;  %v1482_v11 = vadd.f32 %v3867_v35, %v1459_v17  ;;  %v1483_v13 = vadd.f32 %v3867_v35, %v1460_v32  ;;  %v718_v49 = vrot.slane %v660_v1, 1  ;;  %v786_v18 = vmul.f32 %v3747_v6, %v4001_v29 }
  0x6f   : > { %v717_v19 = vsel %vm694_vm0, %v715_v27, %v716_v8  ;;  %v841_v5 = vrot.slane %v784_v45, 2  ;;  %v842_v20 = vrot.slane %v785_v10, 2  ;;  %v907_v21 = vmul.f32 %v3752_v7, %v4071_v12 }
  0x70   : > { %v4149_v2 = vmul.f32 0.5, %v1482_v11  ;;  %v4151_v24 = vmul.f32 0.5, %v1483_v13  ;;  %v1514_v15 = vmul.f32 0.70710677, %v1482_v11  ;;  %v1515_v25 = vmul.f32 0.70710677, %v1483_v13 }
  0x71   : > { %v719_v28 = vsel %vm694_vm0, %v716_v8, %v718_v49  ;;  %v759_v31 = vadd.f32 %v717_v19, %v617_v55  ;;  %v843_v9 = vsel %vm820_vm1, %v841_v5, %v842_v20  ;;  %v844_v6 = vrot.slane %v786_v18, 2 }
  0x72   : > { %3438 = verf.f32 %v1514_v15  ;;  %v760_v29 = vadd.f32 %v719_v28, %v618_v56  ;;  %v908_v14 = vmul.f32 %v3752_v7, %v4085_v0  ;;  %v948_v33 = vmul.f32 %v3777_v22, %v4071_v12  ;;  %v4167_v7 = vld [vmem:[%s3742_s16 + $0x90] sm:$0xff] }
  0x73   : > { %3440 = verf.f32 %v1515_v25  ;;  %v845_v34 = vsel %vm820_vm1, %v842_v20, %v844_v6  ;;  %v885_v37 = vadd.f32 %v843_v9, %v759_v31  ;;  %v949_v38 = vmul.f32 %v3777_v22, %v4085_v0 }
  0x74   : > { %v886_v23 = vadd.f32 %v845_v34, %v760_v29  ;;  %v950_v39 = vmul.f32 %v3777_v22, %v4090_v57  ;;  %v1004_v40 = vrot.slane %v948_v33, 1  ;;  %v1073_v3 = vmul.f32 %v3796_v36, %v4071_v12 }
  0x75   : > { %v923_v41 = vadd.f32 %v907_v21, %v885_v37  ;;  %v1005_v43 = vrot.slane %v949_v38, 1  ;;  %v1074_v44 = vmul.f32 %v3796_v36, %v4085_v0  ;;  %v1075_v46 = vmul.f32 %v3796_v36, %v4090_v57  ;;  %v4215_v38 = vld [vmem:[%s5171_s2 + $0x1] ss:$0 sm:$0xff] }
  0x76   : > { %v924_v48 = vadd.f32 %v908_v14, %v886_v23  ;;  %v1007_v50 = vrot.slane %v950_v39, 1  ;;  %v1129_v22 = vrot.slane %v1073_v3, 2  ;;  %v1195_v53 = vmul.f32 %v3807_v42, %v4167_v7 }
  0x77   : > { %v1006_v54 = vsel %vm694_vm0, %v1004_v40, %v1005_v43  ;;  %v1130_v55 = vrot.slane %v1074_v44, 2  ;;  %v1132_v56 = vrot.slane %v1075_v46, 2  ;;  %v1196_v59 = vmul.f32 %v3807_v42, %v4174_v47  ;;  %v4228_v46 = vld [vmem:[%s5171_s2 + $0x2] ss:$0 sm:$0xff] }
  0x78   : > { %v1008_v60 = vsel %vm694_vm0, %v1005_v43, %v1007_v50  ;;  %v1048_v36 = vadd.f32 %v1006_v54, %v923_v41  ;;  %v1236_v26 = vmul.f32 %v3821_v52, %v4167_v7  ;;  %v1237_v61 = vmul.f32 %v3821_v52, %v4174_v47 }
  0x79   : > { %v1049_v17 = vadd.f32 %v1008_v60, %v924_v48  ;;  %v1131_v32 = vsel %vm820_vm1, %v1129_v22, %v1130_v55  ;;  %v1133_v1 = vsel %vm820_vm1, %v1130_v55, %v1132_v56  ;;  %v1238_v27 = vmul.f32 %v3821_v52, %v4182_v16 }
  0x7a   : > { %v1173_v42 = vadd.f32 %v1131_v32, %v1048_v36  ;;  %v1292_v8 = vrot.slane %v1236_v26, 1  ;;  %v1293_v45 = vrot.slane %v1237_v61, 1  ;;  %v1361_v10 = vmul.f32 %v3836_v63, %v4167_v7 }
  0x7b   : > { %v1174_v11 = vadd.f32 %v1133_v1, %v1049_v17  ;;  %v1295_v13 = vrot.slane %v1238_v27, 1  ;;  %v1362_v49 = vmul.f32 %v3836_v63, %v4174_v47  ;;  %v1363_v18 = vmul.f32 %v3836_v63, %v4182_v16  ;;  %v4206_v63 = vld [vmem:[%s5171_s2] ss:$0 sm:$0xff] }
  0x7c   : > { %v3439_v19 = vpop.eup %3438  ;;  %v1211_v5 = vadd.f32 %v1195_v53, %v1173_v42  ;;  %v1294_v20 = vsel %vm694_vm0, %v1292_v8, %v1293_v45  ;;  %v1417_v21 = vrot.slane %v1361_v10, 2  ;;  %v619_v52 = vmul.f32 %v3732_v4, %v4071_v12  ;;  %v4248_v42 = vld [vmem:[%s5171_s2 + $0x4] ss:$0 sm:$0xff]  ;;  %v4255_v10 = vld [vmem:[%s3742_s16 + $0xa8] sm:$0xff] }
  0x7d   : > { %v3441_v15 = vpop.eup %3440  ;;  %v1546_v25 = vadd.f32 1.0, %v3439_v19  ;;  %v1212_v28 = vadd.f32 %v1196_v59, %v1174_v11  ;;  %v1296_v31 = vsel %vm694_vm0, %v1293_v45, %v1295_v13  ;;  %v1418_v9 = vrot.slane %v1362_v49, 2  ;;  %v4261_v13 = vld [vmem:[%s5171_s2 + $0x5] ss:$0 sm:$0xff] }
  0x7e   : > { %v1547_v6 = vadd.f32 1.0, %v3441_v15  ;;  %v1336_v29 = vadd.f32 %v1294_v20, %v1211_v5  ;;  %v1420_v14 = vrot.slane %v1363_v18, 2  ;;  %v620_v33 = vmul.f32 %v4206_v63, %v4085_v0  ;;  %v4270_v5 = vld [vmem:[%s3742_s16 + $0xb0] sm:$0xff] }
  0x7f   : > { %v1562_v34 = vmul.f32 %v1546_v25, %v4149_v2  ;;  %v1337_v4 = vadd.f32 %v1296_v31, %v1212_v28  ;;  %v1419_v37 = vsel %vm820_vm1, %v1417_v21, %v1418_v9  ;;  %v661_v23 = vmul.f32 %v4215_v38, %v4071_v12 }
  0x80   : > { %v1563_v39 = vmul.f32 %v1547_v6, %v4151_v24  ;;  %v1421_v40 = vsel %vm820_vm1, %v1418_v9, %v1420_v14  ;;  %v1461_v3 = vadd.f32 %v1419_v37, %v1336_v29  ;;  %v662_v41 = vmul.f32 %v4215_v38, %v4085_v0  ;;  %v4284_v29 = vld [vmem:[%s3742_s16 + $0xb8] sm:$0x3] }
  0x81   : > { %v1462_v2 = vadd.f32 %v1421_v40, %v1337_v4  ;;  %v663_v43 = vmul.f32 %v4215_v38, %v4090_v57  ;;  %v720_v44 = vrot.slane %v661_v23, 1  ;;  %v787_v48 = vmul.f32 %v4228_v46, %v4071_v12  ;;  %v4289_v4 = vld [vmem:[%s5171_s2 + $0x8] ss:$0 sm:$0xff] }
  0x82   : > { %v1575_v24 = vpack.c.bf16 %v1563_v39, %v1562_v34  ;;  %v1484_v50 = vadd.f32 %v3867_v35, %v1461_v3  ;;  %v721_v22 = vrot.slane %v662_v41, 1  ;;  %v788_v53 = vmul.f32 %v4228_v46, %v4085_v0 }
  0x83   : > { %v1485_v54 = vadd.f32 %v3867_v35, %v1462_v2  ;;  %v723_v55 = vrot.slane %v663_v43, 1  ;;  %v789_v56 = vmul.f32 %v4228_v46, %v4090_v57  ;;  %v846_v59 = vrot.slane %v787_v48, 2 }
  0x84   : > { %3229 = vmatmul.mubr.bf16.gmra.mrb[4].mxu0 %v1575_v24  ;;  %v4238_v60 = vmul.f32 0.5, %v1484_v50  ;;  %v1516_v36 = vmul.f32 0.70710677, %v1484_v50  ;;  %v722_v12 = vsel %vm694_vm0, %v720_v44, %v721_v22  ;;  %v847_v26 = vrot.slane %v788_v53, 2  ;;  %v4301_v44 = vld [vmem:[%s5171_s2 + $0x9] ss:$0 sm:$0xff] }
  0x85   : > { %v4241_v61 = vmul.f32 0.5, %v1485_v54  ;;  %v1517_v17 = vmul.f32 0.70710677, %v1485_v54  ;;  %v724_v0 = vsel %vm694_vm0, %v721_v22, %v723_v55  ;;  %v761_v32 = vadd.f32 %v722_v12, %v619_v52  ;;  %v4275_v52 = vld [vmem:[%s5171_s2 + $0x6] ss:$0 sm:$0xff] }
  0x86   : > { %3442 = verf.f32 %v1516_v36  ;;  %v762_v35 = vadd.f32 %v724_v0, %v620_v33  ;;  %v848_v57 = vsel %vm820_vm1, %v846_v59, %v847_v26  ;;  %v849_v1 = vrot.slane %v789_v56, 2  ;;  %v4313_v53 = vld [vmem:[%s5171_s2 + $0xa] ss:$0 sm:$0xff] }
  0x87   : > { %3444 = verf.f32 %v1517_v17  ;;  %v887_v27 = vadd.f32 %v848_v57, %v761_v32  ;;  %v909_v8 = vmul.f32 %v4248_v42, %v4167_v7  ;;  %v910_v45 = vmul.f32 %v4248_v42, %v4174_v47 }
  0x88   : > { %v850_v11 = vsel %vm820_vm1, %v847_v26, %v849_v1  ;;  %v951_v49 = vmul.f32 %v4261_v13, %v4167_v7  ;;  %v952_v18 = vmul.f32 %v4261_v13, %v4174_v47  ;;  %v953_v19 = vmul.f32 %v4261_v13, %v4182_v16 }
  0x89   : > { %v888_v20 = vadd.f32 %v850_v11, %v762_v35  ;;  %v925_v21 = vadd.f32 %v909_v8, %v887_v27  ;;  %v1076_v15 = vmul.f32 %v4275_v52, %v4167_v7  ;;  %v1077_v25 = vmul.f32 %v4275_v52, %v4174_v47 }
  0x8a   : > { %v1009_v28 = vrot.slane %v951_v49, 1  ;;  %v1010_v31 = vrot.slane %v952_v18, 1  ;;  %v1012_v9 = vrot.slane %v953_v19, 1  ;;  %v1078_v6 = vmul.f32 %v4275_v52, %v4182_v16 }
  0x8b   : > { %v926_v14 = vadd.f32 %v910_v45, %v888_v20  ;;  %v1134_v33 = vrot.slane %v1076_v15, 2  ;;  %v1135_v34 = vrot.slane %v1077_v25, 2  ;;  %v1197_v37 = vmul.f32 %v4289_v4, %v4255_v10 }
  0x8c   : > { %v1011_v23 = vsel %vm694_vm0, %v1009_v28, %v1010_v31  ;;  %v1013_v39 = vsel %vm694_vm0, %v1010_v31, %v1012_v9  ;;  %v1137_v40 = vrot.slane %v1078_v6, 2  ;;  %v1198_v3 = vmul.f32 %v4289_v4, %v4270_v5 }
  0x8d   : > { %v1050_v41 = vadd.f32 %v1011_v23, %v925_v21  ;;  %v1051_v2 = vadd.f32 %v1013_v39, %v926_v14  ;;  %v1136_v43 = vsel %vm820_vm1, %v1134_v33, %v1135_v34  ;;  %v1239_v48 = vmul.f32 %v4301_v44, %v4255_v10  ;;  %v4344_v39 = vld [vmem:[%s5172_s3] ss:$0 sm:$0xff] }
  0x8e   : > { %v1138_v24 = vsel %vm820_vm1, %v1135_v34, %v1137_v40  ;;  %v1240_v50 = vmul.f32 %v4301_v44, %v4270_v5  ;;  %v1241_v22 = vmul.f32 %v4301_v44, %v4284_v29  ;;  %v1364_v54 = vmul.f32 %v4313_v53, %v4255_v10 }
  0x8f   : > { %v1175_v55 = vadd.f32 %v1136_v43, %v1050_v41  ;;  %v1176_v56 = vadd.f32 %v1138_v24, %v1051_v2  ;;  %v1297_v59 = vrot.slane %v1239_v48, 1  ;;  %v1365_v36 = vmul.f32 %v4313_v53, %v4270_v5 }
  0x90   : > { %v3443_v12 = vpop.eup %3442  ;;  %v1298_v26 = vrot.slane %v1240_v50, 1  ;;  %v1300_v17 = vrot.slane %v1241_v22, 1  ;;  %v1366_v0 = vmul.f32 %v4313_v53, %v4284_v29  ;;  %v1422_v32 = vrot.slane %v1364_v54, 2 }
  0x91   : > { %v3445_v35 = vpop.eup %3444  ;;  %v1548_v57 = vadd.f32 1.0, %v3443_v12  ;;  %v1213_v1 = vadd.f32 %v1197_v37, %v1175_v55  ;;  %v1214_v27 = vadd.f32 %v1198_v3, %v1176_v56  ;;  %v1423_v8 = vrot.slane %v1365_v36, 2 }
  0x92   : > { %v1549_v45 = vadd.f32 1.0, %v3445_v35  ;;  %v1299_v11 = vsel %vm694_vm0, %v1297_v59, %v1298_v26  ;;  %v1301_v49 = vsel %vm694_vm0, %v1298_v26, %v1300_v17  ;;  %v1425_v18 = vrot.slane %v1366_v0, 2 }
  0x93   : > { %v1564_v19 = vmul.f32 %v1548_v57, %v4238_v60  ;;  %v1338_v20 = vadd.f32 %v1299_v11, %v1213_v1  ;;  %v1339_v21 = vadd.f32 %v1301_v49, %v1214_v27  ;;  %v1424_v15 = vsel %vm820_vm1, %v1422_v32, %v1423_v8 }
  0x94   : > { %v1565_v25 = vmul.f32 %v1549_v45, %v4241_v61  ;;  %v1426_v28 = vsel %vm820_vm1, %v1423_v8, %v1425_v18  ;;  %v621_v31 = vmul.f32 %v4206_v63, %v4167_v7  ;;  %v622_v9 = vmul.f32 %v4206_v63, %v4174_v47  ;;  %v4375_v18 = vld [vmem:[%s3742_s16 + $0xc0] sm:$0xff] }
  0x95   : > { %v1463_v6 = vadd.f32 %v1424_v15, %v1338_v20  ;;  %v1464_v14 = vadd.f32 %v1426_v28, %v1339_v21  ;;  %v664_v33 = vmul.f32 %v4215_v38, %v4167_v7  ;;  %v665_v60 = vmul.f32 %v4215_v38, %v4174_v47 }
  0x96   : > { %v1576_v34 = vpack.c.bf16 %v1565_v25, %v1564_v19  ;;  %v666_v61 = vmul.f32 %v4215_v38, %v4182_v16  ;;  %v790_v37 = vmul.f32 %v4228_v46, %v4167_v7  ;;  %v791_v23 = vmul.f32 %v4228_v46, %v4174_v47  ;;  %v4378_v25 = vld [vmem:[%s3742_s16 + $0xc8] sm:$0xff] }
  0x97   : > { %v1486_v40 = vadd.f32 %v4344_v39, %v1463_v6  ;;  %v1487_v3 = vadd.f32 %v4344_v39, %v1464_v14  ;;  %v725_v41 = vrot.slane %v664_v33, 1  ;;  %v726_v2 = vrot.slane %v665_v60, 1 }
  0x98   : > { %3232 = vmatprep.mubr.bf16.mxu0 %v1576_v34  ;;  %v728_v43 = vrot.slane %v666_v61, 1  ;;  %v792_v48 = vmul.f32 %v4228_v46, %v4182_v16  ;;  %v851_v7 = vrot.slane %v790_v37, 2  ;;  %v852_v24 = vrot.slane %v791_v23, 2  ;;  %v4389_v61 = vld [vmem:[%s3742_s16 + $0xd0] sm:$0x3] }
  0x99   : > { %v4350_v50 = vmul.f32 0.5, %v1486_v40  ;;  %v4352_v47 = vmul.f32 0.5, %v1487_v3  ;;  %v1518_v22 = vmul.f32 0.70710677, %v1486_v40  ;;  %v1519_v54 = vmul.f32 0.70710677, %v1487_v3 }
  0x9a   : > { %v727_v55 = vsel %vm694_vm0, %v725_v41, %v726_v2  ;;  %v729_v56 = vsel %vm694_vm0, %v726_v2, %v728_v43  ;;  %v853_v59 = vsel %vm820_vm1, %v851_v7, %v852_v24  ;;  %v854_v36 = vrot.slane %v792_v48, 2 }
  0x9b   : > { %3446 = verf.f32 %v1518_v22  ;;  %v763_v12 = vadd.f32 %v727_v55, %v621_v31  ;;  %v764_v26 = vadd.f32 %v729_v56, %v622_v9  ;;  %v911_v16 = vmul.f32 %v4248_v42, %v4255_v10 }
  0x9c   : > { %3448 = verf.f32 %v1519_v54  ;;  %v855_v17 = vsel %vm820_vm1, %v852_v24, %v854_v36  ;;  %v912_v0 = vmul.f32 %v4248_v42, %v4270_v5  ;;  %v954_v32 = vmul.f32 %v4261_v13, %v4255_v10 }
  0x9d   : > { %v889_v35 = vadd.f32 %v853_v59, %v763_v12  ;;  %v890_v57 = vadd.f32 %v855_v17, %v764_v26  ;;  %v955_v1 = vmul.f32 %v4261_v13, %v4270_v5  ;;  %v956_v27 = vmul.f32 %v4261_v13, %v4284_v29 }
  0x9e   : > { %v1014_v8 = vrot.slane %v954_v32, 1  ;;  %v1079_v45 = vmul.f32 %v4275_v52, %v4255_v10  ;;  %v1080_v11 = vmul.f32 %v4275_v52, %v4270_v5  ;;  %v1081_v49 = vmul.f32 %v4275_v52, %v4284_v29 }
  0x9f   : > { %v927_v19 = vadd.f32 %v911_v16, %v889_v35  ;;  %v928_v20 = vadd.f32 %v912_v0, %v890_v57  ;;  %v1015_v21 = vrot.slane %v955_v1, 1  ;;  %v1017_v15 = vrot.slane %v956_v27, 1 }
  0xa0   : > { %v1139_v28 = vrot.slane %v1079_v45, 2  ;;  %v1140_v31 = vrot.slane %v1080_v11, 2  ;;  %v1142_v9 = vrot.slane %v1081_v49, 2  ;;  %v1199_v6 = vmul.f32 %v4289_v4, %v4375_v18 }
  0xa1   : > { %v1016_v14 = vsel %vm694_vm0, %v1014_v8, %v1015_v21  ;;  %v1018_v33 = vsel %vm694_vm0, %v1015_v21, %v1017_v15  ;;  %v1200_v60 = vmul.f32 %v4289_v4, %v4378_v25  ;;  %v1242_v34 = vmul.f32 %v4301_v44, %v4375_v18 }
  0xa2   : > { %v1052_v37 = vadd.f32 %v1016_v14, %v927_v19  ;;  %v1053_v23 = vadd.f32 %v1018_v33, %v928_v20  ;;  %v1141_v40 = vsel %vm820_vm1, %v1139_v28, %v1140_v31  ;;  %v1143_v3 = vsel %vm820_vm1, %v1140_v31, %v1142_v9 }
  0xa3   : > { %v1243_v41 = vmul.f32 %v4301_v44, %v4378_v25  ;;  %v1244_v2 = vmul.f32 %v4301_v44, %v4389_v61  ;;  %v1302_v43 = vrot.slane %v1242_v34, 1  ;;  %v1367_v48 = vmul.f32 %v4313_v53, %v4375_v18 }
  0xa4   : > { %v1177_v7 = vadd.f32 %v1141_v40, %v1052_v37  ;;  %v1178_v24 = vadd.f32 %v1143_v3, %v1053_v23  ;;  %v1368_v22 = vmul.f32 %v4313_v53, %v4378_v25  ;;  %v1369_v54 = vmul.f32 %v4313_v53, %v4389_v61 }
  0xa5   : > { %v3447_v55 = vpop.eup %3446  ;;  %v1303_v56 = vrot.slane %v1243_v41, 1  ;;  %v1305_v59 = vrot.slane %v1244_v2, 1  ;;  %v1427_v36 = vrot.slane %v1367_v48, 2  ;;  %v623_v12 = vmul.f32 %v4206_v63, %v4255_v10 }
  0xa6   : > { %v3449_v26 = vpop.eup %3448  ;;  %v1550_v16 = vadd.f32 1.0, %v3447_v55  ;;  %v1215_v17 = vadd.f32 %v1199_v6, %v1177_v7  ;;  %v1216_v0 = vadd.f32 %v1200_v60, %v1178_v24  ;;  %v1428_v32 = vrot.slane %v1368_v22, 2 }
  0xa7   : > { %v1551_v35 = vadd.f32 1.0, %v3449_v26  ;;  %v1304_v57 = vsel %vm694_vm0, %v1302_v43, %v1303_v56  ;;  %v1306_v1 = vsel %vm694_vm0, %v1303_v56, %v1305_v59  ;;  %v1430_v27 = vrot.slane %v1369_v54, 2  ;;  %v601_v59 = vld [vmem:[%s3742_s16 + $0xd8] sm:$0xff] }
  0xa8   : > { %v1566_v8 = vmul.f32 %v1550_v16, %v4350_v50  ;;  %v1340_v45 = vadd.f32 %v1304_v57, %v1215_v17  ;;  %v1341_v11 = vadd.f32 %v1306_v1, %v1216_v0  ;;  %v1429_v49 = vsel %vm820_vm1, %v1427_v36, %v1428_v32 }
  0xa9   : > { %v1567_v19 = vmul.f32 %v1551_v35, %v4352_v47  ;;  %v1431_v20 = vsel %vm820_vm1, %v1428_v32, %v1430_v27  ;;  %v624_v21 = vmul.f32 %v4206_v63, %v4270_v5  ;;  %v667_v15 = vmul.f32 %v4215_v38, %v4255_v10 }
  0xaa   : > { %v1465_v28 = vadd.f32 %v1429_v49, %v1340_v45  ;;  %v1466_v31 = vadd.f32 %v1431_v20, %v1341_v11  ;;  %v668_v9 = vmul.f32 %v4215_v38, %v4270_v5  ;;  %v669_v50 = vmul.f32 %v4215_v38, %v4284_v29  ;;  %v603_v45 = vld [vmem:[%s3742_s16 + $0xe8] sm:$0x3] }
  0xab   : > { %v1577_v6 = vpack.c.bf16 %v1567_v19, %v1566_v8  ;;  %v730_v14 = vrot.slane %v667_v15, 1  ;;  %v793_v47 = vmul.f32 %v4228_v46, %v4255_v10  ;;  %v794_v33 = vmul.f32 %v4228_v46, %v4270_v5 }
  0xac   : > { %v1488_v63 = vadd.f32 %v4344_v39, %v1465_v28  ;;  %v1489_v60 = vadd.f32 %v4344_v39, %v1466_v31  ;;  %v731_v34 = vrot.slane %v668_v9, 1  ;;  %v733_v37 = vrot.slane %v669_v50, 1 }
  0xad   : > { %3233 = vmatmul.mubr.bf16.gmra.mrb[8].mxu0 %v1577_v6  ;;  %v795_v23 = vmul.f32 %v4228_v46, %v4284_v29  ;;  %v856_v40 = vrot.slane %v793_v47, 2  ;;  %v857_v38 = vrot.slane %v794_v33, 2  ;;  %v913_v3 = vmul.f32 %v4248_v42, %v4375_v18 }
  0xae   : > { %v4429_v41 = vmul.f32 0.5, %v1488_v63  ;;  %v4431_v10 = vmul.f32 0.5, %v1489_v60  ;;  %v1520_v5 = vmul.f32 0.70710677, %v1488_v63  ;;  %v1521_v2 = vmul.f32 0.70710677, %v1489_v60 }
  0xaf   : > { %v732_v43 = vsel %vm694_vm0, %v730_v14, %v731_v34  ;;  %v734_v48 = vsel %vm694_vm0, %v731_v34, %v733_v37  ;;  %v858_v7 = vsel %vm820_vm1, %v856_v40, %v857_v38  ;;  %v859_v46 = vrot.slane %v795_v23, 2 }
  0xb0   : > { %3450 = verf.f32 %v1520_v5  ;;  %v765_v29 = vadd.f32 %v732_v43, %v623_v12  ;;  %v766_v24 = vadd.f32 %v734_v48, %v624_v21  ;;  %v914_v22 = vmul.f32 %v4248_v42, %v4378_v25  ;;  %v602_v42 = vld [vmem:[%s3742_s16 + $0xe0] sm:$0xff] }
  0xb1   : > { %3452 = verf.f32 %v1521_v2  ;;  %v860_v54 = vsel %vm820_vm1, %v857_v38, %v859_v46  ;;  %v957_v55 = vmul.f32 %v4261_v13, %v4375_v18  ;;  %v958_v56 = vmul.f32 %v4261_v13, %v4378_v25 }
  0xb2   : > { %v891_v36 = vadd.f32 %v858_v7, %v765_v29  ;;  %v892_v26 = vadd.f32 %v860_v54, %v766_v24  ;;  %v959_v12 = vmul.f32 %v4261_v13, %v4389_v61  ;;  %v1082_v16 = vmul.f32 %v4275_v52, %v4375_v18 }
  0xb3   : > { %v1019_v17 = vrot.slane %v957_v55, 1  ;;  %v1020_v0 = vrot.slane %v958_v56, 1  ;;  %v1083_v32 = vmul.f32 %v4275_v52, %v4378_v25  ;;  %v1084_v35 = vmul.f32 %v4275_v52, %v4389_v61 }
  0xb4   : > { %v929_v57 = vadd.f32 %v913_v3, %v891_v36  ;;  %v930_v1 = vadd.f32 %v914_v22, %v892_v26  ;;  %v1022_v27 = vrot.slane %v959_v12, 1  ;;  %v1144_v8 = vrot.slane %v1082_v16, 2  ;;  %v4495_v16 = vld [vmem:[%s4068_s22 + $0x38] sm:$0xff] }
  0xb5   : > { %v1021_v11 = vsel %vm694_vm0, %v1019_v17, %v1020_v0  ;;  %v1145_v13 = vrot.slane %v1083_v32, 2  ;;  %v1147_v49 = vrot.slane %v1084_v35, 2  ;;  %v1201_v18 = vmul.f32 %v4289_v4, %v601_v59 }
  0xb6   : > { %v1023_v19 = vsel %vm694_vm0, %v1020_v0, %v1022_v27  ;;  %v1054_v20 = vadd.f32 %v1021_v11, %v929_v57  ;;  %v1202_v21 = vmul.f32 %v4289_v4, %v602_v42  ;;  %v1245_v25 = vmul.f32 %v4301_v44, %v601_v59  ;;  %v4507_v11 = vld [vmem:[%s4068_s22 + $0x40] sm:$0xff] }
  0xb7   : > { %v1055_v15 = vadd.f32 %v1023_v19, %v930_v1  ;;  %v1146_v52 = vsel %vm820_vm1, %v1144_v8, %v1145_v13  ;;  %v1148_v61 = vsel %vm820_vm1, %v1145_v13, %v1147_v49  ;;  %v1246_v28 = vmul.f32 %v4301_v44, %v602_v42  ;;  %v4514_v19 = vld [vmem:[%s4068_s22 + $0x50] sm:$0xff] }
  0xb8   : > { %v1179_v31 = vadd.f32 %v1146_v52, %v1054_v20  ;;  %v1247_v9 = vmul.f32 %v4301_v44, %v603_v45  ;;  %v1307_v50 = vrot.slane %v1245_v25, 1  ;;  %v1370_v6 = vmul.f32 %v4313_v53, %v601_v59  ;;  %v4519_v20 = vld [vmem:[%s4068_s22 + $0x58] sm:$0xff] }
  0xb9   : > { %v1180_v14 = vadd.f32 %v1148_v61, %v1055_v15  ;;  %v1308_v47 = vrot.slane %v1246_v28, 1  ;;  %v1371_v33 = vmul.f32 %v4313_v53, %v602_v42  ;;  %v1372_v4 = vmul.f32 %v4313_v53, %v603_v45  ;;  %v4531_v61 = vld [vmem:[%s4068_s22 + $0x60] sm:$0xff]  ;;  %v4535_v28 = vld [vmem:[%s4068_s22 + $0x68] sm:$0xff] }
  0xba   : > { %v3451_v63 = vpop.eup %3450  ;;  %v1217_v60 = vadd.f32 %v1201_v18, %v1179_v31  ;;  %v1310_v34 = vrot.slane %v1247_v9, 1  ;;  %v1432_v37 = vrot.slane %v1370_v6, 2  ;;  %v1972_v23 = vmul.f32 %v4079_v58, %v4079_v58  ;;  %v4511_v18 = vld [vmem:[%s4068_s22 + $0x48] sm:$0xff]  ;;  %5201 = vst [vmem:[#allocation7_spill] sm:$0xff] %v4531_v61  ;;  %5202 = vst [vmem:[#allocation8_spill] sm:$0xff] %v4535_v28  ;;  %v4538_v31 = vld [vmem:[%s4068_s22 + $0x70] sm:$0xff] }
  0xbb   : > { %v3453_v40 = vpop.eup %3452  ;;  %v1552_v38 = vadd.f32 1.0, %v3451_v63  ;;  %v1218_v3 = vadd.f32 %v1202_v21, %v1180_v14  ;;  %v1309_v44 = vsel %vm694_vm0, %v1307_v50, %v1308_v47  ;;  %v1433_v5 = vrot.slane %v1371_v33, 2  ;;  %5203 = vst [vmem:[#allocation9_spill] sm:$0xff] %v4538_v31  ;;  %v4543_v9 = vld [vmem:[%s4068_s22 + $0x78] sm:$0xff]  ;;  %v4553_v14 = vld [vmem:[%s5174_s5] ss:$0 sm:$0xff] }
  0xbc   : > { %v1553_v2 = vadd.f32 1.0, %v3453_v40  ;;  %v1311_v43 = vsel %vm694_vm0, %v1308_v47, %v1310_v34  ;;  %v1342_v48 = vadd.f32 %v1309_v44, %v1217_v60  ;;  %v1435_v7 = vrot.slane %v1372_v4, 2  ;;  %1988 = vadd.xlane.f32.xlu0 %v1972_v23  ;;  %5204 = vst [vmem:[#allocation10_spill] sm:$0xff] %v4543_v9 }
  0xbd   : > { %v1568_v53 = vmul.f32 %v1552_v38, %v4429_v41  ;;  %v1343_v46 = vadd.f32 %v1311_v43, %v1218_v3  ;;  %v1434_v29 = vsel %vm820_vm1, %v1432_v37, %v1433_v5  ;;  %v1973_v58 = vmul.f32 %v4095_v62, %v4095_v62 }
  0xbe   : > { %v1569_v24 = vmul.f32 %v1553_v2, %v4431_v10  ;;  %v1436_v22 = vsel %vm820_vm1, %v1433_v5, %v1435_v7  ;;  %v1467_v54 = vadd.f32 %v1434_v29, %v1342_v48  ;;  %v1974_v55 = vmul.f32 %v4082_v51, %v4082_v51  ;;  %v4483_v10 = vld [vmem:[%s4068_s22 + $0x20] sm:$0xff]  ;;  %v4487_v51 = vld [vmem:[%s4068_s22 + $0x28] sm:$0xff] }
  0xbf   : > { %v1468_v56 = vadd.f32 %v1436_v22, %v1343_v46  ;;  %1990 = vadd.xlane.f32.xlu1 %v1973_v58  ;;  %v1975_v41 = vmul.f32 %v4117_v30, %v4117_v30  ;;  %v4490_v30 = vld [vmem:[%s4068_s22 + $0x30] sm:$0xff]  ;;  %v1977_v42 = vmul.f32 %v4487_v51, %v4487_v51  ;;  %v1979_v27 = vmul.f32 %v4495_v16, %v4495_v16 }
  0xc0   : > { %v1578_v59 = vpack.c.bf16 %v1569_v24, %v1568_v53  ;;  %v1490_v36 = vadd.f32 %v4344_v39, %v1467_v54  ;;  %1992 = vadd.xlane.f32.xlu0 %v1974_v55  ;;  %v1978_v17 = vmul.f32 %v4490_v30, %v4490_v30  ;;  %v1980_v21 = vmul.f32 %v4507_v11, %v4507_v11 }
  0xc1   : > { %v1491_v62 = vadd.f32 %v4344_v39, %v1468_v56  ;;  %v1976_v39 = vmul.f32 %v4483_v10, %v4483_v10  ;;  %v1981_v25 = vmul.f32 %v4511_v18, %v4511_v18  ;;  %v1982_v15 = vmul.f32 %v4514_v19, %v4514_v19 }
  0xc2   : > { %3236 = vmatprep.mubr.bf16.mxu0 %v1578_v59  ;;  %v1522_v26 = vmul.f32 0.70710677, %v1490_v36  ;;  %v1506_v0 = vmul.f32 0.5, %v1490_v36  ;;  %v1983_v52 = vmul.f32 %v4519_v20, %v4519_v20  ;;  %v1984_v50 = vmul.f32 %v4531_v61, %v4531_v61  ;;  %v3402_v36 = vld [vmem:[%s5180_s11] sm:$0xff]  }
  0xc3   : > { %v1523_v12 = vmul.f32 0.70710677, %v1491_v62  ;;  %1994 = vadd.xlane.f32.xlu1 %v1975_v41  ;;  %v1507_v35 = vmul.f32 0.5, %v1491_v62  ;;  %v1985_v6 = vmul.f32 %v4535_v28, %v4535_v28  ;;  %3240 = vmatprep.subr.bf16.mxu1 %v3402_v36 }
  0xc4   : > { %3454 = verf.f32 %v1522_v26  ;;  %1884 = vadd.xlane.f32.xlu0 %v4483_v10  ;;  %3241 = vmatpush3.bf16.msra.mxu1 %v3402_v36 }
  0xc5   : > { %3456 = verf.f32 %v1523_v12  ;;  %v3403_v12 = vld [vmem:[%s5180_s11 + $0x8] sm:$0xff]  }
  0xc6   : > { %3242 = vmatprep.subr.bf16.mxu1 %v3403_v12 }
  0xc7   : > { %1886 = vadd.xlane.f32.xlu1 %v4487_v51 }
  0xc8   : > { %1888 = vadd.xlane.f32.xlu0 %v4490_v30  ;;  %3243 = vmatpush3.bf16.msra.mxu1 %v3403_v12  ;;  %v3409_v12 = vld [vmem:[%s5180_s11 + $0x38] sm:$0xff]  }
  0xcb   : > { %1890 = vadd.xlane.f32.xlu1 %v4495_v16 }
  0xcc   : > { %1996 = vadd.xlane.f32.xlu0 %v1976_v39 }
  0xce   : > { %v3455_v32 = vpop.eup %3454 }
  0xcf   : > { %v3457_v57 = vpop.eup %3456  ;;  %v1554_v1 = vadd.f32 1.0, %v3455_v32  ;;  %1998 = vadd.xlane.f32.xlu1 %v1977_v42 }
  0xd0   : > { %v1555_v8 = vadd.f32 1.0, %v3457_v57  ;;  %2000 = vadd.xlane.f32.xlu0 %v1978_v17  ;;  %v3405_v57 = vld [vmem:[%s5180_s11 + $0x18] sm:$0xff]  }
  0xd1   : > { %v1570_v45 = vmul.f32 %v1554_v1, %v1506_v0  ;;  %v3404_v0 = vld [vmem:[%s5180_s11 + $0x10] sm:$0xff]  }
  0xd2   : > { %v1571_v13 = vmul.f32 %v1555_v8, %v1507_v35  ;;  %3244 = vmatprep.subr.bf16.mxu1 %v3404_v0 }
  0xd3   : > { %2002 = vadd.xlane.f32.xlu1 %v1979_v27  ;;  %3245 = vmatpush3.bf16.msra.mxu1 %v3404_v0 }
  0xd4   : > { %v1579_v49 = vpack.c.bf16 %v1571_v13, %v1570_v45  ;;  %1892 = vadd.xlane.f32.xlu0 %v4507_v11  ;;  %3246 = vmatprep.subr.bf16.mxu1 %v3405_v57 }
  0xd6   : > { %3237 = vmatmul.mubr.bf16.gmra.mrb[12].mxu0 %v1579_v49 }
  0xd7   : > { %1894 = vadd.xlane.f32.xlu1 %v4511_v18  ;;  %3247 = vmatpush3.bf16.msra.mxu1 %v3405_v57 }
  0xd8   : > { %1896 = vadd.xlane.f32.xlu0 %v4514_v19 }
  0xdb   : > { %1898 = vadd.xlane.f32.xlu1 %v4519_v20 }
  0xdc   : > { %2004 = vadd.xlane.f32.xlu0 %v1980_v21 }
  0xdf   : > { %2006 = vadd.xlane.f32.xlu1 %v1981_v25 }
  0xe0   : > { %2008 = vadd.xlane.f32.xlu0 %v1982_v15 }
  0xe3   : > { %2010 = vadd.xlane.f32.xlu1 %v1983_v52  ;;  %v4594_v58 = vpop.xlane.xlu1 %1876 }
  0xe4   : > { %1900 = vadd.xlane.f32.xlu0 %v4531_v61  ;;  %v4607_v41 = vpop.xlane.xlu0 %1880 }
  0xe7   : > { %1902 = vadd.xlane.f32.xlu1 %v4535_v28  ;;  %v4603_v55 = vpop.xlane.xlu1 %1878 }
  0xe8   : > { %1904 = vadd.xlane.f32.xlu0 %v4538_v31 }
  0xeb   : > { %1906 = vadd.xlane.f32.xlu1 %v4543_v9  ;;  %v4609_v59 = vpop.xlane.xlu1 %1882 }
  0xec   : > { %2012 = vadd.xlane.f32.xlu0 %v1984_v50 }
  0xef   : > { %2014 = vadd.xlane.f32.xlu1 %v1985_v6 }
 0x12d   : > { %v3226_v47 = vpop.f32.mrb[0].mxu0 }
 0x12e   : > { %v4556_v33 = vadd.f32 %v3226_v47, %v4553_v14  ;;  %v1685_v4 = vpop.f32.mrb[1].mxu0 }
 0x12f   : > { %v3227_v63 = vpop.f32.mrb[2].mxu0  ;;  %v4563_v37 = vadd.f32 %v4553_v14, %v1685_v4 }
 0x130   : > { %v4559_v60 = vadd.f32 %v3227_v63, %v4553_v14  ;;  %1848 = vadd.xlane.f32.xlu0 %v4556_v33  ;;  %v1688_v34 = vpop.f32.mrb[3].mxu0  ;;  %v1926_v38 = vmul.f32 %v4556_v33, %v4556_v33 }
 0x131   : > { %v4567_v23 = vadd.f32 %v4553_v14, %v1688_v34  ;;  %v1924_v44 = vmul.f32 %v4563_v37, %v4563_v37 }
 0x132   : > { %1850 = vadd.xlane.f32.xlu1 %v4559_v60  ;;  %v1927_v40 = vmul.f32 %v4559_v60, %v4559_v60 }
 0x133   : > { %v1925_v3 = vmul.f32 %v4567_v23, %v4567_v23 }
 0x134   : > { %1844 = vadd.xlane.f32.xlu0 %v4563_v37 }
 0x136   : > { %1946 = vadd.xlane.f32.xlu1 %v1927_v40 }
 0x138   : > { %1944 = vadd.xlane.f32.xlu0 %v1926_v38 }
 0x13a   : > { %1942 = vadd.xlane.f32.xlu1 %v1925_v3 }
 0x13c   : > { %1846 = vadd.xlane.f32.xlu0 %v4567_v23 }
 0x140   : > { %1940 = vadd.xlane.f32.xlu0 %v1924_v44  ;;  %v3406_v44 = vld [vmem:[%s5180_s11 + $0x20] sm:$0xff]  }
 0x141   : > { %3248 = vmatprep.subr.bf16.mxu1 %v3406_v44 }
 0x142   : > { %3249 = vmatpush3.bf16.msra.mxu1 %v3406_v44 }
 0x149   : > { %v4614_v62 = vpop.xlane.xlu0 %1988 }
 0x14c   : > { %v4616_v26 = vpop.xlane.xlu1 %1990 }
 0x14d   : > { %v4621_v39 = vpop.xlane.xlu0 %1992 }
 0x150   : > { %v4623_v42 = vpop.xlane.xlu1 %1994 }
 0x151   : > { %v4625_v17 = vpop.xlane.xlu0 %1884 }
 0x154   : > { %v4630_v32 = vpop.xlane.xlu1 %1886 }
 0x155   : > { %v4638_v8 = vpop.xlane.xlu0 %1888 }
 0x157   : > { %v3230_v5 = vpop.f32.mrb[4].mxu0 }
 0x158   : > { %v4580_v2 = vadd.f32 %v3230_v5, %v4553_v14  ;;  %v1701_v43 = vpop.f32.mrb[5].mxu0  ;;  %v4644_v21 = vpop.xlane.xlu1 %1890 }
 0x159   : > { %v3231_v48 = vpop.f32.mrb[6].mxu0  ;;  %v4587_v46 = vadd.f32 %v4553_v14, %v1701_v43  ;;  %v4654_v52 = vpop.xlane.xlu0 %1996 }
 0x15a   : > { %v4583_v7 = vadd.f32 %v3231_v48, %v4553_v14  ;;  %v1704_v53 = vpop.f32.mrb[7].mxu0  ;;  %1856 = vadd.xlane.f32.xlu0 %v4580_v2  ;;  %v1930_v24 = vmul.f32 %v4580_v2, %v4580_v2  ;;  %v3407_v48 = vld [vmem:[%s5180_s11 + $0x28] sm:$0xff]  }
 0x15b   : > { %v4591_v29 = vadd.f32 %v4553_v14, %v1704_v53  ;;  %v1928_v54 = vmul.f32 %v4587_v46, %v4587_v46  ;;  %3250 = vmatprep.subr.bf16.mxu1 %v3407_v48 }
 0x15c   : > { %1858 = vadd.xlane.f32.xlu1 %v4583_v7  ;;  %v1931_v22 = vmul.f32 %v4583_v7, %v4583_v7  ;;  %v4659_v6 = vpop.xlane.xlu1 %1998  ;;  %3251 = vmatpush3.bf16.msra.mxu1 %v3407_v48 }
 0x15d   : > { %v1929_v56 = vmul.f32 %v4591_v29, %v4591_v29  ;;  %v4665_v63 = vpop.xlane.xlu0 %2000 }
 0x15e   : > { %1852 = vadd.xlane.f32.xlu0 %v4587_v46 }
 0x160   : > { %1854 = vadd.xlane.f32.xlu1 %v4591_v29  ;;  %v4669_v40 = vpop.xlane.xlu1 %2002 }
 0x161   : > { %v4671_v38 = vpop.xlane.xlu0 %1892 }
 0x162   : > { %1952 = vadd.xlane.f32.xlu0 %v1930_v24 }
 0x164   : > { %1954 = vadd.xlane.f32.xlu1 %v1931_v22  ;;  %v4673_v3 = vpop.xlane.xlu1 %1894 }
 0x165   : > { %v4678_v5 = vpop.xlane.xlu0 %1896 }
 0x166   : > { %1948 = vadd.xlane.f32.xlu0 %v1928_v54  ;;  %v3408_v54 = vld [vmem:[%s5180_s11 + $0x30] sm:$0xff]  }
 0x167   : > { %3252 = vmatprep.subr.bf16.mxu1 %v3408_v54 }
 0x168   : > { %1950 = vadd.xlane.f32.xlu1 %v1929_v56  ;;  %v4680_v43 = vpop.xlane.xlu1 %1898  ;;  %3253 = vmatpush3.bf16.msra.mxu1 %v3408_v54 }
 0x169   : > { %v4685_v53 = vpop.xlane.xlu0 %2004  ;;  %3254 = vmatprep.subr.bf16.mxu1 %v3409_v12 }
 0x16c   : > { %v4687_v24 = vpop.xlane.xlu1 %2006  ;;  %3255 = vmatpush3.bf16.msra.mxu1 %v3409_v12 }
 0x16d   : > { %v4689_v22 = vpop.xlane.xlu0 %2008 }
 0x170   : > { %v4694_v56 = vpop.xlane.xlu1 %2010 }
 0x180   : > { %v3234_v35 = vpop.f32.mrb[8].mxu0 }
 0x181   : > { %v4636_v1 = vadd.f32 %v3234_v35, %v4553_v14  ;;  %v1717_v27 = vpop.f32.mrb[9].mxu0 }
 0x182   : > { %v3235_v45 = vpop.f32.mrb[10].mxu0  ;;  %v4647_v25 = vadd.f32 %v4553_v14, %v1717_v27  ;;  %v4702_v27 = vpop.xlane.xlu0 %1900 }
 0x183   : > { %v4641_v13 = vadd.f32 %v3235_v45, %v4553_v14  ;;  %v1720_v49 = vpop.f32.mrb[11].mxu0  ;;  %1864 = vadd.xlane.f32.xlu0 %v4636_v1  ;;  %v1934_v50 = vmul.f32 %v4636_v1, %v4636_v1  ;;  %5206 = vst [vmem:[#allocation12_spill] sm:$0xff] %v4702_v27 }
 0x184   : > { %v4651_v15 = vadd.f32 %v4553_v14, %v1720_v49  ;;  %v1932_v4 = vmul.f32 %v4647_v25, %v4647_v25 }
 0x185   : > { %1866 = vadd.xlane.f32.xlu1 %v4641_v13  ;;  %v1935_v47 = vmul.f32 %v4641_v13, %v4641_v13 }
 0x186   : > { %v1933_v34 = vmul.f32 %v4651_v15, %v4651_v15 }
 0x187   : > { %1860 = vadd.xlane.f32.xlu0 %v4647_v25 }
 0x189   : > { %1862 = vadd.xlane.f32.xlu1 %v4651_v15 }
 0x18b   : > { %1960 = vadd.xlane.f32.xlu0 %v1934_v50  ;;  %v4708_v50 = vpop.xlane.xlu1 %1902 }
 0x18c   : > { %5208 = vst [vmem:[#allocation14_spill] sm:$0xff] %v4708_v50 }
 0x18d   : > { %1962 = vadd.xlane.f32.xlu1 %v1935_v47 }
 0x18f   : > { %1956 = vadd.xlane.f32.xlu0 %v1932_v4  ;;  %v4723_v48 = vpop.xlane.xlu1 %1906 }
 0x190   : > { %5212 = vst [vmem:[#allocation18_spill] sm:$0xff] %v4723_v48 }
 0x191   : > { %1958 = vadd.xlane.f32.xlu1 %v1933_v34  ;;  %v4718_v34 = vpop.xlane.xlu0 %1904 }
 0x192   : > { %5211 = vst [vmem:[#allocation17_spill] sm:$0xff] %v4718_v34 }
 0x1a9   : > { %v3238_v36 = vpop.f32.mrb[12].mxu0 }
 0x1aa   : > { %v4700_v0 = vadd.f32 %v3238_v36, %v4553_v14  ;;  %v1733_v35 = vpop.f32.mrb[13].mxu0  ;;  %v4729_v36 = vpop.xlane.xlu0 %2012 }
 0x1ab   : > { %v3239_v57 = vpop.f32.mrb[14].mxu0  ;;  %v4711_v47 = vadd.f32 %v4553_v14, %v1733_v35  ;;  %5213 = vst [vmem:[#allocation19_spill] sm:$0xff] %v4729_v36  ;;  %v1986_v35 = vmul.f32 %v4538_v31, %v4538_v31 }
 0x1ac   : > { %5205 = vst [vmem:[#allocation11_spill] sm:$0xff] %v4700_v0  ;;  %v4705_v45 = vadd.f32 %v3239_v57, %v4553_v14  ;;  %v1736_v49 = vpop.f32.mrb[15].mxu0  ;;  %1872 = vadd.xlane.f32.xlu0 %v4700_v0  ;;  %v1938_v44 = vmul.f32 %v4700_v0, %v4700_v0  ;;  %v4735_v57 = vpop.xlane.xlu1 %2014 }
 0x1ad   : > { %5209 = vst [vmem:[#allocation15_spill] sm:$0xff] %v4711_v47  ;;  %v4715_v4 = vadd.f32 %v4553_v14, %v1736_v49  ;;  %v1936_v14 = vmul.f32 %v4711_v47, %v4711_v47  ;;  %5214 = vst [vmem:[#allocation20_spill] sm:$0xff] %v4735_v57  ;;  %v1987_v49 = vmul.f32 %v4543_v9, %v4543_v9 }
 0x1ae   : > { %5207 = vst [vmem:[#allocation13_spill] sm:$0xff] %v4705_v45  ;;  %1874 = vadd.xlane.f32.xlu1 %v4705_v45  ;;  %v1939_v54 = vmul.f32 %v4705_v45, %v4705_v45 }
 0x1af   : > { %5210 = vst [vmem:[#allocation16_spill] sm:$0xff] %v4715_v4  ;;  %v1937_v12 = vmul.f32 %v4715_v4, %v4715_v4 }
 0x1b0   : > { %1868 = vadd.xlane.f32.xlu0 %v4711_v47 }
 0x1b2   : > { %1870 = vadd.xlane.f32.xlu1 %v4715_v4 }
 0x1b4   : > { %1968 = vadd.xlane.f32.xlu0 %v1938_v44 }
 0x1b6   : > { %1970 = vadd.xlane.f32.xlu1 %v1939_v54 }
 0x1b8   : > { %1964 = vadd.xlane.f32.xlu0 %v1936_v14 }
 0x1ba   : > { %1966 = vadd.xlane.f32.xlu1 %v1937_v12 }
 0x1bc   : > { %2016 = vadd.xlane.f32.xlu0 %v1986_v35 }
 0x1bd   : > { %v1849_v44 = vpop.xlane.xlu0 %1848 }
 0x1be   : > { %2018 = vadd.xlane.f32.xlu1 %v1987_v49  ;;  %v1910_v45 = vadd.f32 %v4607_v41, %v1849_v44 }
 0x1bf   : > { %v1851_v54 = vpop.xlane.xlu1 %1850 }
 0x1c0   : > { %v1911_v0 = vadd.f32 %v4609_v59, %v1851_v54  ;;  %v2038_v28 = vmul.f32 0.015625, %v1910_v45 }
 0x1c1   : > { %v1845_v47 = vpop.xlane.xlu0 %1844 }
 0x1c2   : > { %v4741_v4 = vmul.f32 0.015625, %v1911_v0  ;;  %v2070_v57 = vmul.f32 %v2038_v28, %v2038_v28  ;;  %v1908_v41 = vadd.f32 %v4594_v58, %v1845_v47 }
 0x1c3   : > { %v1947_v14 = vpop.xlane.xlu1 %1946 }
 0x1c4   : > { %v2023_v31 = vadd.f32 %v4623_v42, %v1947_v14  ;;  %v2071_v35 = vmul.f32 %v4741_v4, %v4741_v4 }
 0x1c5   : > { %v1945_v61 = vpop.xlane.xlu0 %1944 }
 0x1c6   : > { %v2022_v12 = vadd.f32 %v4621_v39, %v1945_v61  ;;  %v2055_v9 = vmul.f32 0.015625, %v2023_v31  ;;  %v2036_v61 = vmul.f32 0.015625, %v1908_v41  ;;  %v2151_v41 = vsub.f32 %v4559_v60, %v4741_v4 }
 0x1c7   : > { %v1943_v49 = vpop.xlane.xlu1 %1942 }
 0x1c8   : > { %v2054_v36 = vmul.f32 0.015625, %v2022_v12  ;;  %v2087_v59 = vsub.f32 %v2055_v9, %v2071_v35  ;;  %v2021_v54 = vadd.f32 %v4616_v26, %v1943_v49  ;;  %v2068_v58 = vmul.f32 %v2036_v61, %v2036_v61  ;;  %v3410_v35 = vld [vmem:[%s5179_s10] sm:$0xff]  }
 0x1c9   : > { %v1847_v44 = vpop.xlane.xlu0 %1846  ;;  %3272 = vmatprep.subr.bf16.mxu1 %v3410_v35 }
 0x1ca   : > { %v2086_v0 = vsub.f32 %v2054_v36, %v2070_v57  ;;  %v1909_v45 = vadd.f32 %v4603_v55, %v1847_v44  ;;  %v2103_v42 = vmax.f32 %v2087_v59, 0.0  ;;  %v2053_v31 = vmul.f32 0.015625, %v2021_v54  ;;  %v3532_v54 = vld [vmem:[%s4068_s22 + $0x10] sm:$0xff] }
 0x1cc   : > { %v2102_v14 = vmax.f32 %v2086_v0, 0.0  ;;  %v2037_v48 = vmul.f32 0.015625, %v1909_v45  ;;  %v2119_v39 = vadd.f32 1e-05, %v2103_v42  ;;  %v4765_v0 = vld [vmem:[%s5176_s7] ss:$0 sm:$0xff]  ;;  %v2228_v45 = vsub.f32 %v3532_v54, %v2038_v28 }
 0x1cd   : > { %v1941_v34 = vpop.xlane.xlu0 %1940  ;;  %v3533_v42 = vld [vmem:[%s4068_s22 + $0x18] sm:$0xff] }
 0x1ce   : > { %v2118_v50 = vadd.f32 1e-05, %v2102_v14  ;;  %v2069_v27 = vmul.f32 %v2037_v48, %v2037_v48  ;;  %3458 = vrsqrt.f32 %v2119_v39  ;;  %v2020_v12 = vadd.f32 %v4614_v62, %v1941_v34 }
 0x1cf   : > { %v2229_v14 = vsub.f32 %v3533_v42, %v4741_v4  ;;  %v2149_v39 = vsub.f32 %v4567_v23, %v2037_v48  ;;  %v2148_v4 = vsub.f32 %v4563_v37, %v2036_v61 }
 0x1d0   : > { %3460 = vrsqrt.f32 %v2118_v50  ;;  %v2085_v9 = vsub.f32 %v2053_v31, %v2069_v27  ;;  %v2052_v47 = vmul.f32 0.015625, %v2020_v12  ;;  %v2150_v27 = vsub.f32 %v4556_v33, %v2038_v28  ;;  %v4760_v50 = vld [vmem:[%s5175_s6] ss:$0 sm:$0xff]  ;;  %v3534_v31 = vld [vmem:[%s4068_s22 + $0x8] sm:$0xff] }
 0x1d1   : > { %v2227_v12 = vsub.f32 %v3534_v31, %v2037_v48  ;;  %v4787_v48 = vld [vmem:[%s5177_s8] ss:$0 sm:$0xff] }
 0x1d2   : > { %v2101_v36 = vmax.f32 %v2085_v9, 0.0  ;;  %v2084_v26 = vsub.f32 %v2052_v47, %v2068_v58 }
 0x1d4   : > { %v2117_v57 = vadd.f32 1e-05, %v2101_v36  ;;  %v2100_v55 = vmax.f32 %v2084_v26, 0.0 }
 0x1d6   : > { %3462 = vrsqrt.f32 %v2117_v57  ;;  %v2116_v49 = vadd.f32 1e-05, %v2100_v55 }
 0x1d8   : > { %v3459_v62 = vpop.eup %3458  ;;  %3464 = vrsqrt.f32 %v2116_v49  ;;  %v3535_v49 = vld [vmem:[%s4068_s22] sm:$0xff] }
 0x1d9   : > { %v2167_v59 = vmul.f32 %v3459_v62, %v2151_v41  ;;  %v2245_v57 = vmul.f32 %v3459_v62, %v2229_v14  ;;  %v2226_v23 = vsub.f32 %v3535_v49, %v2036_v61  ;;  %v4797_v61 = vld [vmem:[%s5178_s9] ss:$0 sm:$0xff]  ;;  %v3411_v49 = vld [vmem:[%s5179_s10 + $0x8] sm:$0xff]  }
 0x1da   : > { %v3461_v34 = vpop.eup %3460 }
 0x1db   : > { %v2166_v44 = vmul.f32 %v3461_v34, %v2150_v27  ;;  %v2190_v60 = vmul.f32 %v4760_v50, %v2167_v59  ;;  %v2244_v9 = vmul.f32 %v3461_v34, %v2228_v45 }
 0x1dd   : > { %v2189_v33 = vmul.f32 %v4760_v50, %v2166_v44  ;;  %v4778_v47 = vadd.f32 %v4765_v0, %v2190_v60  ;;  %v2267_v27 = vmul.f32 %v4787_v48, %v2244_v9  ;;  %v2268_v60 = vmul.f32 %v4787_v48, %v2245_v57 }
 0x1df   : > { %v4775_v58 = vadd.f32 %v4765_v0, %v2189_v33  ;;  %v2290_v33 = vadd.f32 %v4797_v61, %v2267_v27  ;;  %v2291_v9 = vadd.f32 %v4797_v61, %v2268_v60 }
 0x1e0   : > { %v3463_v36 = vpop.eup %3462 }
 0x1e1   : > { %v2165_v26 = vmul.f32 %v3463_v36, %v2149_v39  ;;  %v2243_v28 = vmul.f32 %v3463_v36, %v2227_v12  ;;  %v2305_v55 = vpack.c.bf16 %v4778_v47, %v4775_v58  ;;  %v5228_v47 = vld [vmem:[#allocation13_spill] sm:$0xff] }
 0x1e2   : > { %v3465_v41 = vpop.eup %3464 }
 0x1e3   : > { %v2242_v34 = vmul.f32 %v3465_v41, %v2226_v23  ;;  %v2266_v59 = vmul.f32 %v4787_v48, %v2243_v28  ;;  %v2164_v44 = vmul.f32 %v3465_v41, %v2148_v4  ;;  %v2188_v62 = vmul.f32 %v4760_v50, %v2165_v26 }
 0x1e4   : > { %v2329_v4 = vpack.c.bf16 %v2291_v9, %v2290_v33  ;;  %v3413_v33 = vld [vmem:[%s5179_s10 + $0x18] sm:$0xff]  }
 0x1e5   : > { %v2265_v37 = vmul.f32 %v4787_v48, %v2242_v34  ;;  %v2187_v54 = vmul.f32 %v4760_v50, %v2164_v44  ;;  %v2289_v14 = vadd.f32 %v4797_v61, %v2266_v59  ;;  %v4807_v31 = vadd.f32 %v4765_v0, %v2188_v62 }
 0x1e7   : > { %v1857_v45 = vpop.xlane.xlu0 %1856  ;;  %v2288_v42 = vadd.f32 %v4797_v61, %v2265_v37  ;;  %v4804_v39 = vadd.f32 %v4765_v0, %v2187_v54 }
 0x1e8   : > { %v1914_v28 = vadd.f32 %v4638_v8, %v1857_v45  ;;  %v3412_v8 = vld [vmem:[%s5179_s10 + $0x10] sm:$0xff]  }
 0x1e9   : > { %v1859_v12 = vpop.xlane.xlu1 %1858  ;;  %v2328_v36 = vpack.c.bf16 %v2289_v14, %v2288_v42  ;;  %v2304_v26 = vpack.c.bf16 %v4807_v31, %v4804_v39  ;;  %v5227_v39 = vld [vmem:[#allocation11_spill] sm:$0xff] }
 0x1ea   : > { %v1915_v23 = vadd.f32 %v4644_v21, %v1859_v12  ;;  %v4818_v34 = vmul.f32 0.015625, %v1914_v28 }
 0x1eb   : > { %v1853_v57 = vpop.xlane.xlu0 %1852  ;;  %3256 = vmatprep.mubr.bf16.mxu1 %v2328_v36 }
 0x1ec   : > { %3257 = vmatmul.mubr.bf16.vlgmr.msra.gmra.mrb[0].mxu1 %v2329_v4  ;;  %v1912_v27 = vadd.f32 %v4625_v17, %v1853_v57  ;;  %v4823_v44 = vmul.f32 0.015625, %v1915_v23  ;;  %v2074_v17 = vmul.f32 %v4818_v34, %v4818_v34 }
 0x1ed   : > { %v1855_v41 = vpop.xlane.xlu1 %1854  ;;  %3273 = vmatpush3.bf16.msra.mxu1 %v3410_v35 }
 0x1ee   : > { %3274 = vmatprep.subr.bf16.mxu1 %v3411_v49  ;;  %v1913_v62 = vadd.f32 %v4630_v32, %v1855_v41  ;;  %v4828_v54 = vmul.f32 0.015625, %v1912_v27  ;;  %v2075_v32 = vmul.f32 %v4823_v44, %v4823_v44 }
 0x1ef   : > { %v1953_v59 = vpop.xlane.xlu0 %1952 }
 0x1f0   : > { %v2026_v21 = vadd.f32 %v4665_v63, %v1953_v59  ;;  %v4835_v42 = vmul.f32 0.015625, %v1913_v62  ;;  %v2072_v28 = vmul.f32 %v4828_v54, %v4828_v54 }
 0x1f1   : > { %v1955_v60 = vpop.xlane.xlu1 %1954  ;;  %3275 = vmatpush3.bf16.msra.mxu1 %v3411_v49  ;;  %v3414_v49 = vld [vmem:[%s5179_s10 + $0x20] sm:$0xff]  }
 0x1f2   : > { %v2027_v37 = vadd.f32 %v4669_v40, %v1955_v60  ;;  %v2058_v35 = vmul.f32 0.015625, %v2026_v21  ;;  %3276 = vmatprep.subr.bf16.mxu1 %v3412_v8 }
 0x1f3   : > { %v1949_v45 = vpop.xlane.xlu0 %1948 }
 0x1f4   : > { %v2059_v63 = vmul.f32 0.015625, %v2027_v37  ;;  %v2024_v40 = vadd.f32 %v4654_v52, %v1949_v45  ;;  %v2090_v12 = vsub.f32 %v2058_v35, %v2074_v17  ;;  %v2073_v52 = vmul.f32 %v4835_v42, %v4835_v42  ;;  %v3416_v35 = vld [vmem:[%s5179_s10 + $0x30] sm:$0xff]   ;;  %v3417_v45 = vld [vmem:[%s5179_s10 + $0x38] sm:$0xff]  }
 0x1f5   : > { %v1951_v14 = vpop.xlane.xlu1 %1950  ;;  %3277 = vmatpush3.bf16.msra.mxu1 %v3412_v8  ;;  %v3415_v8 = vld [vmem:[%s5179_s10 + $0x28] sm:$0xff]  }
 0x1f6   : > { %v2091_v9 = vsub.f32 %v2059_v63, %v2075_v32  ;;  %v2025_v36 = vadd.f32 %v4659_v6, %v1951_v14  ;;  %v2056_v57 = vmul.f32 0.015625, %v2024_v40  ;;  %v2106_v4 = vmax.f32 %v2090_v12, 0.0  ;;  %3278 = vmatprep.subr.bf16.mxu1 %v3413_v33 }
 0x1f7   : > { %v2232_v32 = vsub.f32 %v4490_v30, %v4818_v34  ;;  %v2155_v40 = vsub.f32 %v4583_v7, %v4823_v44  ;;  %v2233_v12 = vsub.f32 %v4495_v16, %v4823_v44  ;;  %v2231_v16 = vsub.f32 %v4487_v51, %v4835_v42 }
 0x1f8   : > { %v2107_v23 = vmax.f32 %v2091_v9, 0.0  ;;  %v2057_v41 = vmul.f32 0.015625, %v2025_v36  ;;  %v2088_v27 = vsub.f32 %v2056_v57, %v2072_v28  ;;  %v2122_v59 = vadd.f32 1e-05, %v2106_v4 }
 0x1f9   : > { %3279 = vmatpush3.bf16.msra.mxu1 %v3413_v33  ;;  %v2154_v33 = vsub.f32 %v4580_v2, %v4818_v34  ;;  %v2152_v28 = vsub.f32 %v4587_v46, %v4828_v54  ;;  %v2230_v2 = vsub.f32 %v4483_v10, %v4828_v54  ;;  %v2153_v34 = vsub.f32 %v4591_v29, %v4835_v42  ;;  %v3418_v10 = vld [vmem:[%s5182_s13] sm:$0xff]   ;;  %v3419_v46 = vld [vmem:[%s5182_s13 + $0x8] sm:$0xff]  }
 0x1fa   : > { %v2123_v62 = vadd.f32 1e-05, %v2107_v23  ;;  %v2089_v6 = vsub.f32 %v2057_v41, %v2073_v52  ;;  %v2104_v21 = vmax.f32 %v2088_v27, 0.0  ;;  %3466 = vrsqrt.f32 %v2122_v59  ;;  %3280 = vmatprep.subr.bf16.mxu1 %v3414_v49  ;;  %3304 = vmatprep.subr.bf16.mxu0 %v3418_v10 }
 0x1fb   : > { %3305 = vmatpush3.bf16.msra.mxu0 %v3418_v10 }
 0x1fc   : > { %3468 = vrsqrt.f32 %v2123_v62  ;;  %v2105_v60 = vmax.f32 %v2089_v6, 0.0  ;;  %v2120_v37 = vadd.f32 1e-05, %v2104_v21  ;;  %3306 = vmatprep.subr.bf16.mxu0 %v3419_v46 }
 0x1fd   : > { %3281 = vmatpush3.bf16.msra.mxu1 %v3414_v49 }
 0x1fe   : > { %v2121_v17 = vadd.f32 1e-05, %v2105_v60  ;;  %3470 = vrsqrt.f32 %v2120_v37  ;;  %3282 = vmatprep.subr.bf16.mxu1 %v3415_v8 }
 0x1ff   : > { %3307 = vmatpush3.bf16.msra.mxu0 %v3419_v46 }
 0x200   : > { %3472 = vrsqrt.f32 %v2121_v17 }
 0x201   : > { %3283 = vmatpush3.bf16.msra.mxu1 %v3415_v8 }
 0x202   : > { %3284 = vmatprep.subr.bf16.mxu1 %v3416_v35 }
 0x204   : > { %v3467_v63 = vpop.eup %3466 }
 0x205   : > { %v2248_v9 = vmul.f32 %v3467_v63, %v2232_v32  ;;  %3285 = vmatpush3.bf16.msra.mxu1 %v3416_v35  ;;  %v2170_v36 = vmul.f32 %v3467_v63, %v2154_v33 }
 0x206   : > { %v3469_v14 = vpop.eup %3468  ;;  %3286 = vmatprep.subr.bf16.mxu1 %v3417_v45 }
 0x207   : > { %v2171_v57 = vmul.f32 %v3469_v14, %v2155_v40  ;;  %v2249_v7 = vmul.f32 %v3469_v14, %v2233_v12  ;;  %v2193_v4 = vmul.f32 %v4760_v50, %v2170_v36  ;;  %v2271_v29 = vmul.f32 %v4787_v48, %v2248_v9 }
 0x208   : > { %v3471_v30 = vpop.eup %3470 }
 0x209   : > { %v2246_v44 = vmul.f32 %v3471_v30, %v2230_v2  ;;  %v2168_v49 = vmul.f32 %v3471_v30, %v2152_v28  ;;  %v2194_v23 = vmul.f32 %v4760_v50, %v2171_v57  ;;  %3287 = vmatpush3.bf16.msra.mxu1 %v3417_v45  ;;  %v4883_v52 = vadd.f32 %v4765_v0, %v2193_v4 }
 0x20a   : > { %v3473_v54 = vpop.eup %3472  ;;  %v2272_v27 = vmul.f32 %v4787_v48, %v2249_v7  ;;  %v2294_v60 = vadd.f32 %v4797_v61, %v2271_v29 }
 0x20b   : > { %v2247_v51 = vmul.f32 %v3473_v54, %v2231_v16  ;;  %v2269_v42 = vmul.f32 %v4787_v48, %v2246_v44  ;;  %v2169_v41 = vmul.f32 %v3473_v54, %v2153_v34  ;;  %v2191_v59 = vmul.f32 %v4760_v50, %v2168_v49 }
 0x20c   : > { %v4889_v62 = vadd.f32 %v4765_v0, %v2194_v23  ;;  %v2295_v32 = vadd.f32 %v4797_v61, %v2272_v27 }
 0x20d   : > { %v2270_v6 = vmul.f32 %v4787_v48, %v2247_v51  ;;  %v2292_v21 = vadd.f32 %v4797_v61, %v2269_v42  ;;  %v2192_v8 = vmul.f32 %v4760_v50, %v2169_v41  ;;  %v4896_v37 = vadd.f32 %v4765_v0, %v2191_v59 }
 0x20e   : > { %v2307_v17 = vpack.c.bf16 %v4889_v62, %v4883_v52  ;;  %v2331_v12 = vpack.c.bf16 %v2295_v32, %v2294_v60 }
 0x20f   : > { %v2293_v35 = vadd.f32 %v4797_v61, %v2270_v6  ;;  %v4902_v45 = vadd.f32 %v4765_v0, %v2192_v8 }
 0x210   : > { %v1865_v33 = vpop.xlane.xlu0 %1864 }
 0x211   : > { %v2330_v63 = vpack.c.bf16 %v2293_v35, %v2292_v21  ;;  %v2306_v40 = vpack.c.bf16 %v4902_v45, %v4896_v37  ;;  %v1918_v9 = vadd.f32 %v4678_v5, %v1865_v33 }
 0x212   : > { %v1867_v14 = vpop.xlane.xlu1 %1866 }
 0x213   : > { %3260 = vmatprep.mubr.bf16.mxu1 %v2330_v63  ;;  %v1919_v28 = vadd.f32 %v4680_v43, %v1867_v14  ;;  %v2046_v30 = vmul.f32 0.015625, %v1918_v9 }
 0x214   : > { %v1861_v36 = vpop.xlane.xlu0 %1860  ;;  %3261 = vmatmul.mubr.bf16.gmra.mrb[4].mxu1 %v2331_v12 }
 0x215   : > { %v1916_v57 = vadd.f32 %v4671_v38, %v1861_v36  ;;  %v2047_v7 = vmul.f32 0.015625, %v1919_v28  ;;  %v2078_v10 = vmul.f32 %v2046_v30, %v2046_v30  ;;  %v2236_v12 = vsub.f32 %v4514_v19, %v2046_v30 }
 0x216   : > { %v1863_v2 = vpop.xlane.xlu1 %1862 }
 0x217   : > { %v1917_v4 = vadd.f32 %v4673_v3, %v1863_v2  ;;  %v2044_v23 = vmul.f32 0.015625, %v1916_v57  ;;  %v2079_v29 = vmul.f32 %v2047_v7, %v2047_v7  ;;  %v2159_v36 = vsub.f32 %v4641_v13, %v2047_v7 }
 0x218   : > { %v1961_v34 = vpop.xlane.xlu0 %1960  ;;  %v2237_v2 = vsub.f32 %v4519_v20, %v2047_v7 }
 0x219   : > { %v2030_v16 = vadd.f32 %v4689_v22, %v1961_v34  ;;  %v2045_v54 = vmul.f32 0.015625, %v1917_v4  ;;  %v2076_v3 = vmul.f32 %v2044_v23, %v2044_v23  ;;  %v2156_v4 = vsub.f32 %v4647_v25, %v2044_v23 }
 0x21a   : > { %v1963_v44 = vpop.xlane.xlu1 %1962 }
 0x21b   : > { %v2031_v49 = vadd.f32 %v4694_v56, %v1963_v44  ;;  %v2062_v5 = vmul.f32 0.015625, %v2030_v16  ;;  %v2077_v21 = vmul.f32 %v2045_v54, %v2045_v54  ;;  %v2234_v16 = vsub.f32 %v4507_v11, %v2044_v23 }
 0x21c   : > { %v1957_v46 = vpop.xlane.xlu0 %1956  ;;  %v2235_v19 = vsub.f32 %v4511_v18, %v2045_v54 }
 0x21d   : > { %v2063_v43 = vmul.f32 0.015625, %v2031_v49  ;;  %v2028_v51 = vadd.f32 %v4685_v53, %v1957_v46  ;;  %v2094_v42 = vsub.f32 %v2062_v5, %v2078_v10  ;;  %v2157_v10 = vsub.f32 %v4651_v15, %v2045_v54 }
 0x21e   : > { %v1959_v38 = vpop.xlane.xlu1 %1958 }
 0x21f   : > { %v2095_v41 = vsub.f32 %v2063_v43, %v2079_v29  ;;  %v2029_v27 = vadd.f32 %v4687_v24, %v1959_v38  ;;  %v2060_v59 = vmul.f32 0.015625, %v2028_v51  ;;  %v2110_v22 = vmax.f32 %v2094_v42, 0.0 }
 0x220   : > { %v2158_v24 = vsub.f32 %v4636_v1, %v2046_v30 }
 0x221   : > { %v2111_v6 = vmax.f32 %v2095_v41, 0.0  ;;  %v2061_v56 = vmul.f32 0.015625, %v2029_v27  ;;  %v2092_v8 = vsub.f32 %v2060_v59, %v2076_v3  ;;  %v2126_v60 = vadd.f32 1e-05, %v2110_v22 }
 0x223   : > { %v2127_v35 = vadd.f32 1e-05, %v2111_v6  ;;  %v2093_v33 = vsub.f32 %v2061_v56, %v2077_v21  ;;  %v2108_v32 = vmax.f32 %v2092_v8, 0.0  ;;  %3474 = vrsqrt.f32 %v2126_v60 }
 0x225   : > { %3476 = vrsqrt.f32 %v2127_v35  ;;  %v2109_v63 = vmax.f32 %v2093_v33, 0.0  ;;  %v2124_v53 = vadd.f32 1e-05, %v2108_v32  ;;  %v5215_v32 = vld [vmem:[#allocation12_spill] sm:$0xff] }
 0x227   : > { %v2125_v14 = vadd.f32 1e-05, %v2109_v63  ;;  %3478 = vrsqrt.f32 %v2124_v53 }
 0x229   : > { %3480 = vrsqrt.f32 %v2125_v14  ;;  %v5216_v14 = vld [vmem:[#allocation14_spill] sm:$0xff] }
 0x22d   : > { %v3475_v9 = vpop.eup %3474 }
 0x22e   : > { %v2252_v57 = vmul.f32 %v3475_v9, %v2236_v12  ;;  %v2174_v34 = vmul.f32 %v3475_v9, %v2158_v24  ;;  %v5217_v12 = vld [vmem:[#allocation17_spill] sm:$0xff] }
 0x22f   : > { %v3477_v28 = vpop.eup %3476 }
 0x230   : > { %v2175_v44 = vmul.f32 %v3477_v28, %v2159_v36  ;;  %v2253_v5 = vmul.f32 %v3477_v28, %v2237_v2  ;;  %v2197_v1 = vmul.f32 %v4760_v50, %v2174_v34  ;;  %v2275_v7 = vmul.f32 %v4787_v48, %v2252_v57  ;;  %v5218_v2 = vld [vmem:[#allocation18_spill] sm:$0xff] }
 0x231   : > { %v3479_v49 = vpop.eup %3478 }
 0x232   : > { %v2250_v30 = vmul.f32 %v3479_v49, %v2234_v16  ;;  %v2172_v13 = vmul.f32 %v3479_v49, %v2156_v4  ;;  %v2198_v46 = vmul.f32 %v4760_v50, %v2175_v44  ;;  %v4927_v25 = vadd.f32 %v4765_v0, %v2197_v1  ;;  %v5219_v16 = vld [vmem:[#allocation19_spill] sm:$0xff] }
 0x233   : > { %v3481_v20 = vpop.eup %3480  ;;  %v2276_v15 = vmul.f32 %v4787_v48, %v2253_v5  ;;  %v2298_v42 = vadd.f32 %v4797_v61, %v2275_v7  ;;  %v5220_v5 = vld [vmem:[#allocation20_spill] sm:$0xff] }
 0x234   : > { %v2251_v11 = vmul.f32 %v3481_v20, %v2235_v19  ;;  %v2273_v23 = vmul.f32 %v4787_v48, %v2250_v30  ;;  %v2173_v29 = vmul.f32 %v3481_v20, %v2157_v10  ;;  %v2195_v43 = vmul.f32 %v4760_v50, %v2172_v13 }
 0x235   : > { %v4933_v18 = vadd.f32 %v4765_v0, %v2198_v46  ;;  %v2299_v6 = vadd.f32 %v4797_v61, %v2276_v15 }
 0x236   : > { %v2274_v54 = vmul.f32 %v4787_v48, %v2251_v11  ;;  %v2296_v51 = vadd.f32 %v4797_v61, %v2273_v23  ;;  %v2196_v38 = vmul.f32 %v4760_v50, %v2173_v29  ;;  %v4940_v41 = vadd.f32 %v4765_v0, %v2195_v43 }
 0x237   : > { %v2309_v27 = vpack.c.bf16 %v4933_v18, %v4927_v25  ;;  %v2333_v60 = vpack.c.bf16 %v2299_v6, %v2298_v42  ;;  %v3421_v25 = vld [vmem:[%s5182_s13 + $0x18] sm:$0xff]   ;;  %v3424_v18 = vld [vmem:[%s5182_s13 + $0x30] sm:$0xff]  }
 0x238   : > { %v2297_v3 = vadd.f32 %v4797_v61, %v2274_v54  ;;  %v4946_v59 = vadd.f32 %v4765_v0, %v2196_v38 }
 0x239   : > { %v1873_v22 = vpop.xlane.xlu0 %1872 }
 0x23a   : > { %v2332_v21 = vpack.c.bf16 %v2297_v3, %v2296_v51  ;;  %v2308_v56 = vpack.c.bf16 %v4946_v59, %v4940_v41  ;;  %v1922_v9 = vadd.f32 %v5217_v12, %v1873_v22  ;;  %v5222_v12 = vld [vmem:[#allocation8_spill] sm:$0xff]  ;;  %v3420_v59 = vld [vmem:[%s5182_s13 + $0x10] sm:$0xff]  }
 0x23b   : > { %v1875_v8 = vpop.xlane.xlu1 %1874  ;;  %3308 = vmatprep.subr.bf16.mxu0 %v3420_v59 }
 0x23c   : > { %3264 = vmatprep.mubr.bf16.mxu1 %v2332_v21  ;;  %v1923_v57 = vadd.f32 %v5218_v2, %v1875_v8  ;;  %v4960_v49 = vmul.f32 0.015625, %v1922_v9  ;;  %3309 = vmatpush3.bf16.msra.mxu0 %v3420_v59 }
 0x23d   : > { %v1869_v35 = vpop.xlane.xlu0 %1868  ;;  %3265 = vmatmul.mubr.bf16.gmra.mrb[8].mxu1 %v2333_v60  ;;  %3310 = vmatprep.subr.bf16.mxu0 %v3421_v25 }
 0x23e   : > { %v1920_v63 = vadd.f32 %v5215_v32, %v1869_v35  ;;  %v4965_v13 = vmul.f32 0.015625, %v1923_v57  ;;  %v2082_v15 = vmul.f32 %v4960_v49, %v4960_v49  ;;  %v5223_v57 = vld [vmem:[#allocation9_spill] sm:$0xff]  ;;  %v2162_v31 = vsub.f32 %v5227_v39, %v4960_v49 }
 0x23f   : > { %v1871_v33 = vpop.xlane.xlu1 %1870 }
 0x240   : > { %v1921_v24 = vadd.f32 %v5216_v14, %v1871_v33  ;;  %v4954_v28 = vmul.f32 0.015625, %v1920_v63  ;;  %v2083_v42 = vmul.f32 %v4965_v13, %v4965_v13  ;;  %3311 = vmatpush3.bf16.msra.mxu0 %v3421_v25 }
 0x241   : > { %v1969_v53 = vpop.xlane.xlu0 %1968 }
 0x242   : > { %v4957_v4 = vmul.f32 0.015625, %v1921_v24  ;;  %v2080_v19 = vmul.f32 %v4954_v28, %v4954_v28 }
 0x243   : > { %v1971_v36 = vpop.xlane.xlu1 %1970 }
 0x244   : > { %v2081_v20 = vmul.f32 %v4957_v4, %v4957_v4  ;;  %v2239_v9 = vsub.f32 %v5222_v12, %v4957_v4 }
 0x245   : > { %v1965_v34 = vpop.xlane.xlu0 %1964 }
 0x246   : > { %v2032_v44 = vadd.f32 %v5219_v16, %v1965_v34  ;;  %v2240_v34 = vsub.f32 %v5223_v57, %v4960_v49 }
 0x247   : > { %v1967_v10 = vpop.xlane.xlu1 %1966 }
 0x248   : > { %v2033_v1 = vadd.f32 %v5220_v5, %v1967_v10  ;;  %v2064_v30 = vmul.f32 0.015625, %v2032_v44  ;;  %v5224_v5 = vld [vmem:[#allocation10_spill] sm:$0xff] }
 0x249   : > { %v2017_v46 = vpop.xlane.xlu0 %2016 }
 0x24a   : > { %v2065_v7 = vmul.f32 0.015625, %v2033_v1  ;;  %v2096_v11 = vsub.f32 %v2064_v30, %v2080_v19  ;;  %v2034_v23 = vadd.f32 %v2017_v46, %v1969_v53  ;;  %v5221_v53 = vld [vmem:[#allocation7_spill] sm:$0xff]  ;;  %v2241_v1 = vsub.f32 %v5224_v5, %v4965_v13 }
 0x24b   : > { %v2019_v29 = vpop.xlane.xlu1 %2018  ;;  %v2238_v14 = vsub.f32 %v5221_v53, %v4954_v28 }
 0x24c   : > { %v2097_v43 = vsub.f32 %v2065_v7, %v2081_v20  ;;  %v2035_v54 = vadd.f32 %v2019_v29, %v1971_v36  ;;  %v2112_v51 = vmax.f32 %v2096_v11, 0.0  ;;  %v2066_v38 = vmul.f32 0.015625, %v2034_v23 }
 0x24e   : > { %v2113_v3 = vmax.f32 %v2097_v43, 0.0  ;;  %v2067_v22 = vmul.f32 0.015625, %v2035_v54  ;;  %v2128_v6 = vadd.f32 1e-05, %v2112_v51  ;;  %v2098_v21 = vsub.f32 %v2066_v38, %v2082_v15  ;;  %v5225_v38 = vld [vmem:[#allocation15_spill] sm:$0xff] }
 0x250   : > { %v2129_v8 = vadd.f32 1e-05, %v2113_v3  ;;  %v2099_v60 = vsub.f32 %v2067_v22, %v2083_v42  ;;  %3482 = vrsqrt.f32 %v2128_v6  ;;  %v2114_v35 = vmax.f32 %v2098_v21, 0.0 }
 0x251   : > { %v2160_v42 = vsub.f32 %v5225_v38, %v4954_v28 }
 0x252   : > { %3484 = vrsqrt.f32 %v2129_v8  ;;  %v2115_v33 = vmax.f32 %v2099_v60, 0.0  ;;  %v2130_v32 = vadd.f32 1e-05, %v2114_v35 }
 0x254   : > { %v2131_v63 = vadd.f32 1e-05, %v2115_v33  ;;  %3486 = vrsqrt.f32 %v2130_v32 }
 0x256   : > { %3488 = vrsqrt.f32 %v2131_v63 }
 0x25a   : > { %v3483_v24 = vpop.eup %3482 }
 0x25b   : > { %v2254_v36 = vmul.f32 %v3483_v24, %v2238_v14  ;;  %v2176_v3 = vmul.f32 %v3483_v24, %v2160_v42 }
 0x25c   : > { %v3485_v2 = vpop.eup %3484 }
 0x25d   : > { %v2255_v16 = vmul.f32 %v3485_v2, %v2239_v9  ;;  %v2277_v44 = vmul.f32 %v4787_v48, %v2254_v36  ;;  %v2199_v6 = vmul.f32 %v4760_v50, %v2176_v3 }
 0x25e   : > { %v3487_v10 = vpop.eup %3486 }
 0x25f   : > { %v2278_v19 = vmul.f32 %v4787_v48, %v2255_v16  ;;  %v2300_v30 = vadd.f32 %v4797_v61, %v2277_v44  ;;  %v2256_v46 = vmul.f32 %v3487_v10, %v2240_v34  ;;  %v2222_v37 = vadd.f32 %v4765_v0, %v2199_v6 }
 0x260   : > { %v3489_v20 = vpop.eup %3488 }
 0x261   : > { %v2301_v7 = vadd.f32 %v4797_v61, %v2278_v19  ;;  %v2257_v11 = vmul.f32 %v3489_v20, %v2241_v1  ;;  %v2279_v23 = vmul.f32 %v4787_v48, %v2256_v46 }
 0x263   : > { %v2334_v29 = vpack.c.bf16 %v2301_v7, %v2300_v30  ;;  %v2280_v15 = vmul.f32 %v4787_v48, %v2257_v11  ;;  %v2302_v43 = vadd.f32 %v4797_v61, %v2279_v23  ;;  %v5226_v48 = vld [vmem:[#allocation16_spill] sm:$0xff] }
 0x265   : > { %3268 = vmatprep.mubr.bf16.mxu1 %v2334_v29  ;;  %v2303_v54 = vadd.f32 %v4797_v61, %v2280_v15  ;;  %v2161_v61 = vsub.f32 %v5226_v48, %v4957_v4 }
 0x267   : > { %v2335_v51 = vpack.c.bf16 %v2303_v54, %v2302_v43  ;;  %v2177_v22 = vmul.f32 %v3485_v2, %v2161_v61 }
 0x269   : > { %3269 = vmatmul.mubr.bf16.gmra.mrb[12].mxu1 %v2335_v51  ;;  %v2200_v58 = vmul.f32 %v4760_v50, %v2177_v22 }
 0x26a   : > { %3288 = vmatprep.mubr.bf16.mxu1 %v2304_v26  ;;  %v2178_v26 = vmul.f32 %v3487_v10, %v2162_v31 }
 0x26c   : > { %v2201_v28 = vmul.f32 %v4760_v50, %v2178_v26 }
 0x26e   : > { %v2224_v62 = vadd.f32 %v4765_v0, %v2201_v28 }
 0x271   : > { %3289 = vmatmul.mubr.bf16.vlgmr.msra.gmra.mrb[0].mxu1 %v2305_v55  ;;  %v2163_v55 = vsub.f32 %v5228_v47, %v4965_v13 }
 0x272   : > { %3292 = vmatprep.mubr.bf16.mxu1 %v2306_v40  ;;  %v2223_v40 = vadd.f32 %v4765_v0, %v2200_v58 }
 0x273   : > { %v2179_v45 = vmul.f32 %v3489_v20, %v2163_v55 }
 0x274   : > { %v2310_v4 = vpack.c.bf16 %v2223_v40, %v2222_v37 }
 0x275   : > { %v2202_v52 = vmul.f32 %v4760_v50, %v2179_v45  ;;  %v3422_v50 = vld [vmem:[%s5182_s13 + $0x20] sm:$0xff]  }
 0x276   : > { %3312 = vmatprep.subr.bf16.mxu0 %v3422_v50 }
 0x277   : > { %3313 = vmatpush3.bf16.msra.mxu0 %v3422_v50 }
 0x279   : > { %3293 = vmatmul.mubr.bf16.gmra.mrb[4].mxu1 %v2307_v17  ;;  %v2225_v17 = vadd.f32 %v4765_v0, %v2202_v52  ;;  %v3423_v0 = vld [vmem:[%s5182_s13 + $0x28] sm:$0xff]  }
 0x27a   : > { %3296 = vmatprep.mubr.bf16.mxu1 %v2308_v56  ;;  %3314 = vmatprep.subr.bf16.mxu0 %v3423_v0  ;;  %v5044_v56 = vld [vmem:[%s5181_s12] ss:$0 sm:$0xff] }
 0x27b   : > { %v2311_v41 = vpack.c.bf16 %v2225_v17, %v2224_v62  ;;  %3315 = vmatpush3.bf16.msra.mxu0 %v3423_v0 }
 0x27c   : > { %3316 = vmatprep.subr.bf16.mxu0 %v3424_v18 }
 0x27f   : > { %3317 = vmatpush3.bf16.msra.mxu0 %v3424_v18 }
 0x281   : > { %3297 = vmatmul.mubr.bf16.gmra.mrb[8].mxu1 %v2309_v27  ;;  %v3425_v27 = vld [vmem:[%s5182_s13 + $0x38] sm:$0xff]  }
 0x282   : > { %3300 = vmatprep.mubr.bf16.mxu1 %v2310_v4  ;;  %3318 = vmatprep.subr.bf16.mxu0 %v3425_v27 }
 0x283   : > { %3319 = vmatpush3.bf16.msra.mxu0 %v3425_v27 }
 0x289   : > { %3301 = vmatmul.mubr.bf16.gmra.mrb[12].mxu1 %v2311_v41 }
 0x344   : > { %v3290_v49 = vpop.f32.mrb[0].mxu1 }
 0x345   : > { %v2651_v13 = vadd.f32 %v3290_v49, %v5044_v56  ;;  %v2579_v21 = vpop.f32.mrb[1].mxu1 }
 0x346   : > { %v2649_v8 = vadd.f32 %v5044_v56, %v2579_v21  ;;  %v3291_v60 = vpop.f32.mrb[2].mxu1 }
 0x347   : > { %v2683_v35 = vmul.f32 0.70710677, %v2651_v13  ;;  %v2652_v33 = vadd.f32 %v3291_v60, %v5044_v56  ;;  %v2582_v32 = vpop.f32.mrb[3].mxu1  ;;  %v2667_v54 = vmul.f32 0.5, %v2651_v13 }
 0x348   : > { %v2681_v63 = vmul.f32 0.70710677, %v2649_v8  ;;  %v2650_v53 = vadd.f32 %v5044_v56, %v2582_v32  ;;  %v2665_v61 = vmul.f32 0.5, %v2649_v8 }
 0x349   : > { %3490 = verf.f32 %v2683_v35  ;;  %v2684_v14 = vmul.f32 0.70710677, %v2652_v33  ;;  %v2668_v51 = vmul.f32 0.5, %v2652_v33 }
 0x34a   : > { %3492 = verf.f32 %v2681_v63  ;;  %v2682_v24 = vmul.f32 0.70710677, %v2650_v53  ;;  %v2666_v3 = vmul.f32 0.5, %v2650_v53 }
 0x34b   : > { %3494 = verf.f32 %v2684_v14 }
 0x34c   : > { %3496 = verf.f32 %v2682_v24  ;;  %v3294_v12 = vpop.f32.mrb[4].mxu1 }
 0x34d   : > { %v2655_v9 = vadd.f32 %v3294_v12, %v5044_v56  ;;  %v2595_v36 = vpop.f32.mrb[5].mxu1 }
 0x34e   : > { %v2653_v2 = vadd.f32 %v5044_v56, %v2595_v36  ;;  %v3295_v57 = vpop.f32.mrb[6].mxu1 }
 0x34f   : > { %v2687_v34 = vmul.f32 0.70710677, %v2655_v9  ;;  %v2656_v16 = vadd.f32 %v3295_v57, %v5044_v56  ;;  %v2598_v44 = vpop.f32.mrb[7].mxu1  ;;  %v2671_v49 = vmul.f32 0.5, %v2655_v9 }
 0x350   : > { %v2685_v10 = vmul.f32 0.70710677, %v2653_v2  ;;  %v2654_v5 = vadd.f32 %v5044_v56, %v2598_v44  ;;  %v2669_v35 = vmul.f32 0.5, %v2653_v2 }
 0x351   : > { %3498 = verf.f32 %v2687_v34  ;;  %v2688_v1 = vmul.f32 0.70710677, %v2656_v16  ;;  %v2672_v13 = vmul.f32 0.5, %v2656_v16 }
 0x352   : > { %3500 = verf.f32 %v2685_v10  ;;  %v2686_v19 = vmul.f32 0.70710677, %v2654_v5  ;;  %v2670_v33 = vmul.f32 0.5, %v2654_v5 }
 0x353   : > { %v3491_v30 = vpop.eup %3490  ;;  %3502 = verf.f32 %v2688_v1 }
 0x354   : > { %v3493_v46 = vpop.eup %3492  ;;  %v2715_v20 = vadd.f32 1.0, %v3491_v30  ;;  %3504 = verf.f32 %v2686_v19  ;;  %v3298_v7 = vpop.f32.mrb[8].mxu1 }
 0x355   : > { %v3495_v11 = vpop.eup %3494  ;;  %v2713_v23 = vadd.f32 1.0, %v3493_v46  ;;  %v5055_v29 = vadd.f32 %v3298_v7, %v5044_v56  ;;  %v2611_v15 = vpop.f32.mrb[9].mxu1 }
 0x356   : > { %v3497_v43 = vpop.eup %3496  ;;  %v2716_v38 = vadd.f32 1.0, %v3495_v11  ;;  %v5058_v42 = vadd.f32 %v5044_v56, %v2611_v15  ;;  %v3299_v48 = vpop.f32.mrb[10].mxu1  ;;  %v2731_v31 = vmul.f32 %v2715_v20, %v2667_v54 }
 0x357   : > { %v2714_v22 = vadd.f32 1.0, %v3497_v43  ;;  %v2691_v6 = vmul.f32 0.70710677, %v5055_v29  ;;  %v2614_v39 = vpop.f32.mrb[11].mxu1  ;;  %v2660_v55 = vadd.f32 %v3299_v48, %v5044_v56  ;;  %v2729_v26 = vmul.f32 %v2713_v23, %v2665_v61 }
 0x358   : > { %v2732_v58 = vmul.f32 %v2716_v38, %v2668_v51  ;;  %v2689_v47 = vmul.f32 0.70710677, %v5058_v42  ;;  %v2658_v45 = vadd.f32 %v5044_v56, %v2614_v39  ;;  %v2675_v7 = vmul.f32 0.5, %v5055_v29 }
 0x359   : > { %v2730_v37 = vmul.f32 %v2714_v22, %v2666_v3  ;;  %3506 = verf.f32 %v2691_v6  ;;  %v2692_v28 = vmul.f32 0.70710677, %v2660_v55  ;;  %v2676_v11 = vmul.f32 0.5, %v2660_v55 }
 0x35a   : > { %v2746_v40 = vpack.c.bf16 %v2732_v58, %v2731_v31  ;;  %3508 = verf.f32 %v2689_v47  ;;  %v2690_v52 = vmul.f32 0.70710677, %v2658_v45  ;;  %v2674_v15 = vmul.f32 0.5, %v2658_v45 }
 0x35b   : > { %v3499_v4 = vpop.eup %3498  ;;  %v2745_v62 = vpack.c.bf16 %v2730_v37, %v2729_v26  ;;  %3510 = verf.f32 %v2692_v28 }
 0x35c   : > { %v3501_v17 = vpop.eup %3500  ;;  %v2719_v41 = vadd.f32 1.0, %v3499_v4  ;;  %v3302_v59 = vpop.f32.mrb[12].mxu1  ;;  %3512 = verf.f32 %v2690_v52 }
 0x35d   : > { %v3503_v25 = vpop.eup %3502  ;;  %v2717_v50 = vadd.f32 1.0, %v3501_v17  ;;  %v2663_v0 = vadd.f32 %v3302_v59, %v5044_v56  ;;  %v2627_v18 = vpop.f32.mrb[13].mxu1  ;;  %3320 = vmatprep.mubr.bf16.mxu0 %v2745_v62 }
 0x35e   : > { %v3505_v27 = vpop.eup %3504  ;;  %v2720_v21 = vadd.f32 1.0, %v3503_v25  ;;  %v2661_v8 = vadd.f32 %v5044_v56, %v2627_v18  ;;  %v3303_v60 = vpop.f32.mrb[14].mxu1  ;;  %3321 = vmatmul.mubr.bf16.vlgmr.msra.gmra.mrb[16].mxu0 %v2746_v40  ;;  %v2735_v14 = vmul.f32 %v2719_v41, %v2671_v49  ;;  %v3536_v41 = vld [vmem:[%s3742_s16 + $0x30] sm:$0xff]  ;;  %v3537_v25 = vld [vmem:[%s3742_s16 + $0x38] sm:$0xff] }
 0x35f   : > { %v2718_v32 = vadd.f32 1.0, %v3505_v27  ;;  %v2695_v63 = vmul.f32 0.70710677, %v2663_v0  ;;  %v2630_v53 = vpop.f32.mrb[15].mxu1  ;;  %v2664_v36 = vadd.f32 %v3303_v60, %v5044_v56  ;;  %v2733_v57 = vmul.f32 %v2717_v50, %v2669_v35  ;;  %v3539_v27 = vld [vmem:[%s3742_s16 + $0x20] sm:$0xff] }
 0x360   : > { %v2736_v24 = vmul.f32 %v2720_v21, %v2672_v13  ;;  %v2693_v12 = vmul.f32 0.70710677, %v2661_v8  ;;  %v2662_v9 = vadd.f32 %v5044_v56, %v2630_v53  ;;  %v2673_v56 = vmul.f32 0.5, %v5058_v42  ;;  %v5077_v13 = vld [vmem:[%s5183_s14] ss:$0 sm:$0xff] }
 0x361   : > { %v2734_v34 = vmul.f32 %v2718_v32, %v2670_v33  ;;  %3514 = verf.f32 %v2695_v63  ;;  %v2696_v16 = vmul.f32 0.70710677, %v2664_v36  ;;  %v2679_v29 = vmul.f32 0.5, %v2663_v0  ;;  %v3538_v0 = vld [vmem:[%s3742_s16 + $0x18] sm:$0xff]  ;;  %v3540_v21 = vld [vmem:[%s3742_s16 + $0x40] sm:$0x3] }
 0x362   : > { %3516 = verf.f32 %v2693_v12  ;;  %v2748_v44 = vpack.c.bf16 %v2736_v24, %v2735_v14  ;;  %v2694_v1 = vmul.f32 0.70710677, %v2662_v9  ;;  %v2680_v55 = vmul.f32 0.5, %v2664_v36  ;;  %v3541_v60 = vld [vmem:[%s3742_s16 + $0x28] sm:$0x3] }
 0x363   : > { %v3507_v10 = vpop.eup %3506  ;;  %v2747_v2 = vpack.c.bf16 %v2734_v34, %v2733_v57  ;;  %3518 = verf.f32 %v2696_v16  ;;  %v2677_v26 = vmul.f32 0.5, %v2661_v8  ;;  %v2678_v37 = vmul.f32 0.5, %v2662_v9 }
 0x364   : > { %v3509_v5 = vpop.eup %3508  ;;  %v2723_v19 = vadd.f32 1.0, %v3507_v10  ;;  %3520 = verf.f32 %v2694_v1  ;;  %v1793_v59 = vrot.slane %v3536_v41, 1  ;;  %v1794_v50 = vrot.slane %v3537_v25, 1  ;;  %v3542_v1 = vld [vmem:[%s3742_s16 + $0x60] sm:$0xff] }
 0x365   : > { %3324 = vmatprep.mubr.bf16.mxu0 %v2747_v2  ;;  %v3511_v30 = vpop.eup %3510  ;;  %v2721_v46 = vadd.f32 1.0, %v3509_v5  ;;  %v1788_v18 = vrot.slane %v3538_v0, 1  ;;  %v1789_v49 = vrot.slane %v3539_v27, 1  ;;  %v1796_v8 = vrot.slane %v3540_v21, 1  ;;  %v3543_v5 = vld [vmem:[%s3742_s16 + $0x68] sm:$0xff] }
 0x366   : > { %3325 = vmatmul.mubr.bf16.gmra.mrb[20].mxu0 %v2748_v44  ;;  %v3513_v20 = vpop.eup %3512  ;;  %v2724_v23 = vadd.f32 1.0, %v3511_v30  ;;  %v2739_v54 = vmul.f32 %v2723_v19, %v2675_v7  ;;  %v1791_v35 = vrot.slane %v3541_v60, 1  ;;  %v1795_v33 = vsel %vm694_vm0, %v1793_v59, %v1794_v50  ;;  %v3545_v7 = vld [vmem:[%s3742_s16 + $0x50] sm:$0xff]  ;;  %v3552_v59 = vld [vmem:[%s3742_s16 + $0xa0] sm:$0x3] }
 0x367   : > { %v2722_v43 = vadd.f32 1.0, %v3513_v20  ;;  %v2737_v38 = vmul.f32 %v2721_v46, %v2673_v56  ;;  %v1790_v53 = vsel %vm694_vm0, %v1788_v18, %v1789_v49  ;;  %v1797_v12 = vsel %vm694_vm0, %v1794_v50, %v1796_v8  ;;  %v3544_v46 = vld [vmem:[%s3742_s16 + $0x48] sm:$0xff]  ;;  %v3546_v56 = vld [vmem:[%s3742_s16 + $0x70] sm:$0x3] }
 0x368   : > { %v2740_v51 = vmul.f32 %v2724_v23, %v2676_v11  ;;  %v1792_v9 = vsel %vm694_vm0, %v1789_v49, %v1791_v35  ;;  %v1803_v2 = vrot.slane %v3542_v1, 1  ;;  %v1804_v19 = vrot.slane %v3543_v5, 1  ;;  %v3553_v50 = vld [vmem:[%s3742_s16 + $0x88] sm:$0x3]  ;;  %v3557_v1 = vld [vmem:[%s3742_s16 + $0xb0] sm:$0xff] }
 0x369   : > { %v2738_v48 = vmul.f32 %v2722_v43, %v2674_v15  ;;  %v1798_v20 = vrot.slane %v3544_v46, 1  ;;  %v1799_v11 = vrot.slane %v3545_v7, 1  ;;  %v1806_v15 = vrot.slane %v3546_v56, 1  ;;  %v3547_v43 = vld [vmem:[%s3742_s16 + $0x58] sm:$0x3] }
 0x36a   : > { %v2750_v3 = vpack.c.bf16 %v2740_v51, %v2739_v54  ;;  %v1801_v54 = vrot.slane %v3547_v43, 1  ;;  %v1805_v51 = vsel %vm694_vm0, %v1803_v2, %v1804_v19  ;;  %v1816_v25 = vrot.slane %v3552_v59, 1  ;;  %v3559_v46 = vld [vmem:[%s3742_s16 + $0xb8] sm:$0x3] }
 0x36b   : > { %v3515_v61 = vpop.eup %3514  ;;  %v2749_v6 = vpack.c.bf16 %v2738_v48, %v2737_v38  ;;  %v1811_v0 = vrot.slane %v3553_v50, 1  ;;  %v1819_v2 = vrot.slane %v3557_v1, 1 }
 0x36c   : > { %v3517_v22 = vpop.eup %3516  ;;  %v2727_v39 = vadd.f32 1.0, %v3515_v61  ;;  %v1800_v61 = vsel %vm694_vm0, %v1798_v20, %v1799_v11  ;;  %v1821_v20 = vrot.slane %v3559_v46, 1 }
 0x36d   : > { %v3519_v31 = vpop.eup %3518  ;;  %v2725_v58 = vadd.f32 1.0, %v3517_v22  ;;  %3328 = vmatprep.mubr.bf16.mxu0 %v2749_v6  ;;  %v1807_v6 = vsel %vm694_vm0, %v1804_v19, %v1806_v15  ;;  %v3558_v19 = vld [vmem:[%s3742_s16 + $0xd0] sm:$0x3] }
 0x36e   : > { %v3521_v47 = vpop.eup %3520  ;;  %v2728_v42 = vadd.f32 1.0, %v3519_v31  ;;  %3329 = vmatmul.mubr.bf16.gmra.mrb[24].mxu0 %v2750_v3  ;;  %v2743_v40 = vmul.f32 %v2727_v39, %v2679_v29 }
 0x36f   : > { %v2726_v45 = vadd.f32 1.0, %v3521_v47  ;;  %v2741_v4 = vmul.f32 %v2725_v58, %v2677_v26  ;;  %v1802_v47 = vsel %vm694_vm0, %v1799_v11, %v1801_v54 }
 0x370   : > { %v2744_v28 = vmul.f32 %v2728_v42, %v2680_v55 }
 0x371   : > { %v2742_v52 = vmul.f32 %v2726_v45, %v2678_v37  ;;  %v3548_v37 = vld [vmem:[%s3742_s16 + $0x90] sm:$0xff] }
 0x372   : > { %v2752_v62 = vpack.c.bf16 %v2744_v28, %v2743_v40  ;;  %v1813_v45 = vrot.slane %v3548_v37, 1  ;;  %v3549_v40 = vld [vmem:[%s3742_s16 + $0x98] sm:$0xff] }
 0x373   : > { %v2751_v17 = vpack.c.bf16 %v2742_v52, %v2741_v4  ;;  %v1814_v28 = vrot.slane %v3549_v40, 1  ;;  %v3550_v52 = vld [vmem:[%s3742_s16 + $0x78] sm:$0xff] }
 0x375   : > { %3332 = vmatprep.mubr.bf16.mxu0 %v2751_v17  ;;  %v3551_v17 = vld [vmem:[%s3742_s16 + $0x80] sm:$0xff]  ;;  %v1815_v18 = vsel %vm694_vm0, %v1813_v45, %v1814_v28  ;;  %v1817_v35 = vsel %vm694_vm0, %v1814_v28, %v1816_v25 }
 0x376   : > { %3333 = vmatmul.mubr.bf16.gmra.mrb[28].mxu0 %v2752_v62  ;;  %v1808_v62 = vrot.slane %v3550_v52, 1  ;;  %v1809_v41 = vrot.slane %v3551_v17, 1 }
 0x378   : > { %v1810_v21 = vsel %vm694_vm0, %v1808_v62, %v1809_v41 }
 0x431   : > { %v3322_v32 = vpop.f32.mrb[16].mxu0 }
 0x432   : > { %v2867_v63 = vadd.f32 %v3322_v32, %v5077_v13  ;;  %v2858_v14 = vpop.f32.mrb[17].mxu0 }
 0x433   : > { %v2859_v24 = vadd.f32 %v5077_v13, %v2858_v14  ;;  %v3323_v36 = vpop.f32.mrb[18].mxu0 }
 0x434   : > { %v2923_v57 = vadd.f32 %v2867_v63, %v1795_v33  ;;  %v2870_v34 = vadd.f32 %v3323_v36, %v5077_v13  ;;  %v2861_v16 = vpop.f32.mrb[19].mxu0  ;;  %v3554_v36 = vld [vmem:[%s3742_s16 + $0xc0] sm:$0xff] }
 0x435   : > { %v2921_v44 = vadd.f32 %v2859_v24, %v1790_v53  ;;  %v2862_v10 = vadd.f32 %v5077_v13, %v2861_v16  ;;  %v1812_v53 = vsel %vm694_vm0, %v1809_v41, %v1811_v0 }
 0x436   : > { %2939 = vst [vmem:[%s5089_s28 + $0x10] sm:$0xff] %v2923_v57  ;;  %v2924_v30 = vadd.f32 %v2870_v34, %v1797_v12  ;;  %v1823_v57 = vrot.slane %v3554_v36, 1  ;;  %v3555_v34 = vld [vmem:[%s3742_s16 + $0xc8] sm:$0xff] }
 0x437   : > { %2937 = vst [vmem:[%s5089_s28] sm:$0xff] %v2921_v44  ;;  %v2922_v23 = vadd.f32 %v2862_v10, %v1792_v9  ;;  %v1824_v9 = vrot.slane %v3555_v34, 1  ;;  %v3556_v44 = vld [vmem:[%s3742_s16 + $0xa8] sm:$0xff] }
 0x438   : > { %2940 = vst [vmem:[%s5089_s28 + $0x18] sm:$0xff] %v2924_v30  ;;  %v1818_v10 = vrot.slane %v3556_v44, 1  ;;  %v1826_v30 = vrot.slane %v3558_v19, 1 }
 0x439   : > { %2938 = vst [vmem:[%s5089_s28 + $0x8] sm:$0xff] %v2922_v23  ;;  %v3326_v38 = vpop.f32.mrb[20].mxu0  ;;  %v1825_v7 = vsel %vm694_vm0, %v1823_v57, %v1824_v9 }
 0x43a   : > { %v2883_v48 = vadd.f32 %v3326_v38, %v5077_v13  ;;  %v2874_v3 = vpop.f32.mrb[21].mxu0  ;;  %v1820_v56 = vsel %vm694_vm0, %v1818_v10, %v1819_v2  ;;  %v1827_v54 = vsel %vm694_vm0, %v1824_v9, %v1826_v30 }
 0x43b   : > { %v2875_v22 = vadd.f32 %v5077_v13, %v2874_v3  ;;  %v3327_v39 = vpop.f32.mrb[22].mxu0 }
 0x43c   : > { %v2927_v31 = vadd.f32 %v2883_v48, %v1805_v51  ;;  %v2886_v58 = vadd.f32 %v3327_v39, %v5077_v13  ;;  %v2877_v29 = vpop.f32.mrb[23].mxu0 }
 0x43d   : > { %v2925_v55 = vadd.f32 %v2875_v22, %v1800_v61  ;;  %v2878_v42 = vadd.f32 %v5077_v13, %v2877_v29  ;;  %v1822_v61 = vsel %vm694_vm0, %v1819_v2, %v1821_v20 }
 0x43e   : > { %2943 = vst [vmem:[%s5089_s28 + $0x30] sm:$0xff] %v2927_v31  ;;  %v2928_v26 = vadd.f32 %v2886_v58, %v1807_v6 }
 0x43f   : > { %2941 = vst [vmem:[%s5089_s28 + $0x20] sm:$0xff] %v2925_v55  ;;  %v2926_v4 = vadd.f32 %v2878_v42, %v1802_v47 }
 0x440   : > { %2944 = vst [vmem:[%s5089_s28 + $0x38] sm:$0xff] %v2928_v26 }
 0x441   : > { %2942 = vst [vmem:[%s5089_s28 + $0x28] sm:$0xff] %v2926_v4  ;;  %v3330_v27 = vpop.f32.mrb[24].mxu0 }
 0x442   : > { %v2899_v49 = vadd.f32 %v3330_v27, %v5077_v13  ;;  %v2890_v8 = vpop.f32.mrb[25].mxu0 }
 0x443   : > { %v2891_v60 = vadd.f32 %v5077_v13, %v2890_v8  ;;  %v3331_v33 = vpop.f32.mrb[26].mxu0 }
 0x444   : > { %v2931_v32 = vadd.f32 %v2899_v49, %v1815_v18  ;;  %v2902_v63 = vadd.f32 %v3331_v33, %v5077_v13  ;;  %v2893_v14 = vpop.f32.mrb[27].mxu0 }
 0x445   : > { %v2929_v24 = vadd.f32 %v2891_v60, %v1810_v21  ;;  %v2894_v12 = vadd.f32 %v5077_v13, %v2893_v14 }
 0x446   : > { %2947 = vst [vmem:[%s5089_s28 + $0x50] sm:$0xff] %v2931_v32  ;;  %v2932_v16 = vadd.f32 %v2902_v63, %v1817_v35 }
 0x447   : > { %2945 = vst [vmem:[%s5089_s28 + $0x40] sm:$0xff] %v2929_v24  ;;  %v2930_v5 = vadd.f32 %v2894_v12, %v1812_v53 }
 0x448   : > { %2948 = vst [vmem:[%s5089_s28 + $0x58] sm:$0xff] %v2932_v16 }
 0x449   : > { %2946 = vst [vmem:[%s5089_s28 + $0x48] sm:$0xff] %v2930_v5  ;;  %v3334_v11 = vpop.f32.mrb[28].mxu0 }
 0x44a   : > { %v2915_v23 = vadd.f32 %v3334_v11, %v5077_v13  ;;  %v2906_v15 = vpop.f32.mrb[29].mxu0 }
 0x44b   : > { %v2907_v43 = vadd.f32 %v5077_v13, %v2906_v15  ;;  %v3335_v51 = vpop.f32.mrb[30].mxu0 }
 0x44c   : > { %v2935_v38 = vadd.f32 %v2915_v23, %v1825_v7  ;;  %v2918_v48 = vadd.f32 %v3335_v51, %v5077_v13  ;;  %v2909_v3 = vpop.f32.mrb[31].mxu0 }
 0x44d   : > { %v2933_v22 = vadd.f32 %v2907_v43, %v1820_v56  ;;  %v2910_v6 = vadd.f32 %v5077_v13, %v2909_v3 }
 0x44e   : > { %2951 = vst [vmem:[%s5089_s28 + $0x70] sm:$0xff] %v2935_v38  ;;  %v2936_v39 = vadd.f32 %v2918_v48, %v1827_v54 }
 0x44f   : > { %2949 = vst [vmem:[%s5089_s28 + $0x60] sm:$0xff] %v2933_v22  ;;  %v2934_v31 = vadd.f32 %v2910_v6, %v1822_v61 }
 0x450   : > { %2952 = vst [vmem:[%s5089_s28 + $0x78] sm:$0xff] %v2936_v39 }
 0x451   : > { %2950 = vst [vmem:[%s5089_s28 + $0x68] sm:$0xff] %v2934_v31 }
 0x452 PF: > { %s5229_s16 = sld [smem:[#allocation4_spill]]  ;;  %s5230_s18 = sld [smem:[#allocation2_spill]] }
 0x453   : > { %s5231_s19 = sld [smem:[#allocation3_spill]]  ;;  %s5232_s20 = sld [smem:[#allocation5_spill]] }
 0x454   : > { %s5233_s21 = sld [smem:[#allocation6_spill]] }
 0x458   : > { %s25_s22 = sadd.s32 1, %s5229_s16  }
 0x459   : > { %p22_p8 = scmp.ge.s32.totalorder %s25_s22, 6  }
 0x45b   :  { %24 = sbr.rel (!%p22_p8) target bundleno = 3 (0x3), region = 115 }

</bundles_post_ra>
